<compile_context>
chip_gen: v7x
topology: tpu7x:2x2x1
jax: 0.10.0
libtpu: 0.0.40
codegen_flags: <defaults>
</compile_context>

<pallas_src>
import functools

import numpy as np

import jax
import jax.numpy as jnp
from jax.experimental import pallas as pl
from jax.experimental.pallas import tpu as pltpu


EN_LANES = 128  # lane-dense energy output width, independent of D


# ---------------------------------------------------------------------------
# Fused kernel: 4 x (bf16 GEMM + bias + PReLU)  +  expand head (mul + reduce)
#   s_ref   : SMEM (5,) f32 = [alpha1, alpha2, alpha3, alpha4, expand_bias]
#   x_ref   : (TB, Cin*H*W) bf16       flattened NCHW input images (batch tile)
#   k*_ref  : (Cin*Hi*Wi, Cout*Ho*Wo) bf16  dense conv operators (VMEM resident)
#   fb*_ref : (1, Cout*Ho*Wo) bf16     per-output-element bias
#   ew_ref  : (1, 2*2*dim) bf16        expand weight (torch .view(B,-1) order)
#   out_refs: (fmap_ref, en_ref) or (en_ref,)
# ---------------------------------------------------------------------------
def _make_energy_kernel(with_fmap):
    def kernel(s_ref, x_ref,
               k1_ref, fb1_ref, k2_ref, fb2_ref,
               k3_ref, fb3_ref, k4_ref, fb4_ref,
               ew_ref, *out_refs):
        def layer(a_bf16, k_ref, fb_ref, alpha):
            # bf16 x bf16 -> f32 accumulate on the MXU
            y = jnp.dot(a_bf16, k_ref[...], preferred_element_type=jnp.float32)
            y = y + fb_ref[...].astype(jnp.float32)      # (1, N) row broadcast
            return jnp.where(y > 0.0, y, alpha * y)      # PReLU (scalar slope)

        a = x_ref[...]                                               # bf16
        a = layer(a, k1_ref, fb1_ref, s_ref[0]).astype(jnp.bfloat16)
        a = layer(a, k2_ref, fb2_ref, s_ref[1]).astype(jnp.bfloat16)
        a = layer(a, k3_ref, fb3_ref, s_ref[2]).astype(jnp.bfloat16)
        feat = layer(a, k4_ref, fb4_ref, s_ref[3])       # (TB, D) f32 feature map

        if with_fmap:
            fmap_ref, en_ref = out_refs
            fmap_ref[...] = feat
        else:
            (en_ref,) = out_refs

        # expand head: energies = feat @ ew.T + eb, as a VPU mul + lane reduce
        en = jnp.sum(feat * ew_ref[...].astype(jnp.float32),
                     axis=1, keepdims=True) + s_ref[4]   # (TB, 1)
        en_ref[...] = jnp.broadcast_to(en, en_ref.shape) # lane-dense (TB, 128)

    return kernel


# ---------------------------------------------------------------------------
# Host-side (init-time) preprocessing: conv -> dense GEMM operator
# ---------------------------------------------------------------------------
def conv_as_gemm_operator(w, hi, wi, stride=2, pad=2):
    """Dense operator K s.t. flatten(conv(x, w)) = flatten(x) @ K (NCHW flatten).

    w: (Cout, Cin, k, k).  Returns K of shape (Cin*Hi*Wi, Cout*Ho*Wo), Ho, Wo.
    Row index: c*Hi*Wi + ih*Wi + iw.  Col index: d*Ho*Wo + oh*Wo + ow.
    """
    w = np.asarray(w, np.float32)
    cout, cin, k, _ = w.shape
    ho = (hi + 2 * pad - k) // stride + 1
    wo = (wi + 2 * pad - k) // stride + 1
    K = np.zeros((cin * hi * wi, cout * ho * wo), np.float32)
    rows_c = np.arange(cin) * (hi * wi)
    cols_d = np.arange(cout) * (ho * wo)
    for oh in range(ho):
        for ow in range(wo):
            col = oh * wo + ow
            for kh in range(k):
                ih = stride * oh + kh - pad
                if ih < 0 or ih >= hi:
                    continue
                for kw in range(k):
                    iw = stride * ow + kw - pad
                    if iw < 0 or iw >= wi:
                        continue
                    K[np.ix_(rows_c + ih * wi + iw, cols_d + col)] += \
                        w[:, :, kh, kw].T
    return K, ho, wo


def pack_params(raw, hw=32):
    """Hoisted weight preprocessing: build kernel-ready (bf16) operands once."""
    hi = wi = hw
    Ks, fbs, alphas = [], [], []
    for (w, b, alpha) in raw["convs"]:
        K, ho, wo = conv_as_gemm_operator(np.asarray(w), hi, wi)
        Ks.append(jnp.asarray(K, jnp.bfloat16))
        fb = np.repeat(np.asarray(b, np.float32), ho * wo)[None, :]
        fbs.append(jnp.asarray(fb, jnp.bfloat16))
        alphas.append(float(np.asarray(alpha)))
        hi, wi = ho, wo
    ew, eb = raw["expand"]
    assert hi * wi * raw["convs"][-1][0].shape[0] == np.asarray(ew).shape[1]
    scalars = jnp.asarray(np.array(alphas + [float(np.asarray(eb)[0])], np.float32))
    return {"K": Ks, "fb": fbs, "ew": jnp.asarray(ew, jnp.bfloat16),
            "scalars": scalars}


# ---------------------------------------------------------------------------
# Tiling helpers
# ---------------------------------------------------------------------------
def _round_up(n, m):
    return ((n + m - 1) // m) * m


def _num_tensorcores_per_chip():
    try:
        kind = jax.devices()[0].device_kind.lower()
    except Exception:
        return 1
    return 2 if "v7" in kind else 1


# ---------------------------------------------------------------------------
# EnergyModel forward (single pallas_call)
# ---------------------------------------------------------------------------
def energy_model_forward(x, packed, return_fmap=False):
    """x: (B, input_dim, 32, 32) NCHW float32 (any float dtype)."""
    B = x.shape[0]
    xf = x.astype(jnp.bfloat16).reshape(B, -1)           # NCHW flatten, bf16

    k1, k2, k3, k4 = packed["K"]
    fb1, fb2, fb3, fb4 = packed["fb"]
    ew = packed["ew"]
    scalars = packed["scalars"]
    D = ew.shape[1]

    # ---- batch tiling: pad to a multiple of 8; >=2 parallel tiles on v7x ----
    Bp = _round_up(max(B, 8), 8)
    if _num_tensorcores_per_chip() >= 2 and Bp >= 16:
        TB = min(256, _round_up(-(-Bp // 2), 8))         # split across 2 TCs
    else:
        TB = min(256, Bp)                                # one big tile (v5e/v6e)
    Bp = _round_up(Bp, TB)
    if Bp != B:
        xf = jnp.pad(xf, ((0, Bp - B), (0, 0)))
    grid = (Bp // TB,)

    # ---- specs ----
    def const(shape):
        # Grid-constant operand: single-buffered, resident across all steps.
        return pl.BlockSpec(shape, lambda i: (0, 0), pipeline_mode=pl.Buffered(1))

    in_specs = [
        pl.BlockSpec(memory_space=pltpu.MemorySpace.SMEM),        # scalars
        pl.BlockSpec((TB, xf.shape[1]), lambda i: (i, 0)),        # image tile
        const(k1.shape), const(fb1.shape),
        const(k2.shape), const(fb2.shape),
        const(k3.shape), const(fb3.shape),
        const(k4.shape), const(fb4.shape),
        const(ew.shape),
    ]

    en_spec = pl.BlockSpec((TB, EN_LANES), lambda i: (i, 0))
    en_shape = jax.ShapeDtypeStruct((Bp, EN_LANES), jnp.float32)
    if return_fmap:
        out_specs = [pl.BlockSpec((TB, D), lambda i: (i, 0)), en_spec]
        out_shape = [jax.ShapeDtypeStruct((Bp, D), jnp.float32), en_shape]
    else:
        out_specs = [en_spec]
        out_shape = [en_shape]

    # ---- VMEM budget: actual footprint + headroom (tight for v7x's 64 MiB) ----
    const_bytes = sum(int(a.size) * a.dtype.itemsize
                      for a in (k1, k2, k3, k4, fb1, fb2, fb3, fb4, ew))
    tile_bytes = (2 * TB * xf.shape[1] * 2            # double-buffered x tile (bf16)
                  + 2 * TB * D * 4 + 2 * TB * EN_LANES * 4)  # output tiles (f32)
    vmem_limit = int(min(64 * 1024 * 1024,
                         const_bytes + tile_bytes + 10 * 1024 * 1024))

    outs = pl.pallas_call(
        _make_energy_kernel(return_fmap),
        grid=grid,
        in_specs=in_specs,
        out_specs=out_specs,
        out_shape=out_shape,
        compiler_params=pltpu.CompilerParams(
            dimension_semantics=("parallel",),
            vmem_limit_bytes=vmem_limit),
    )(scalars, xf, k1, fb1, k2, fb2, k3, fb3, k4, fb4, ew)

    if return_fmap:
        fmap, en = outs
        return fmap[:B], en[:B, 0]
    return outs[0][:B, 0]


# ---------------------------------------------------------------------------
# Raw (torch-layout) parameters + plain-XLA reference for correctness checking
# ---------------------------------------------------------------------------
def init_params(key, input_dim=1, dim=32):
    chans = [input_dim, dim // 8, dim // 4, dim // 2, dim]
    convs = []
    for i in range(4):
        key, kw = jax.random.split(key)
        w = 0.02 * jax.random.normal(kw, (chans[i + 1], chans[i], 5, 5),
                                     jnp.float32)        # weights_init: N(0, 0.02)
        b = jnp.zeros((chans[i + 1],), jnp.float32)
        convs.append((w, b, jnp.float32(0.25)))           # nn.PReLU() default slope
    key, kw = jax.random.split(key)
    ew = 0.02 * jax.random.normal(kw, (1, 2 * 2 * dim), jnp.float32)
    eb = jnp.zeros((1,), jnp.float32)
    return {"convs": convs, "expand": (ew, eb)}, key


def _reference_forward(x, raw):
    h = x.astype(jnp.float32)
    for (w, b, alpha) in raw["convs"]:
        h = jax.lax.conv_general_dilated(
            h, w, window_strides=(2, 2), padding=((2, 2), (2, 2)),
            dimension_numbers=("NCHW", "OIHW", "NCHW"),
            precision=jax.lax.Precision.HIGHEST)
        h = h + b[None, :, None, None]
        h = jnp.where(h > 0, h, alpha * h)
    feat = h.reshape(x.shape[0], -1)
    ew, eb = raw["expand"]
    en = jnp.matmul(feat, ew.T, precision=jax.lax.Precision.HIGHEST) + eb[None, :]
    return feat, en[:, 0]


if __name__ == "__main__":
    key = jax.random.PRNGKey(0)
    raw, key = init_params(key, input_dim=1, dim=32)
    packed = pack_params(raw, hw=32)

    def rel_err(a, b):
        a = np.asarray(a, np.float64)
        b = np.asarray(b, np.float64)
        return float(np.linalg.norm(a - b) / (np.linalg.norm(b) + 1e-30))

    # ---- main test: B=2, return_fmap=True ----
    key, kx = jax.random.split(key)
    x = jax.random.normal(kx, (2, 1, 32, 32), jnp.float32)   # NCHW, like torch

    fwd_fmap = jax.jit(functools.partial(energy_model_forward, return_fmap=True))
    feat, energies = fwd_fmap(x, packed)
    jax.block_until_ready((feat, energies))
    assert feat.shape == (2, 2 * 2 * 32)
    assert energies.shape == (2,)

    feat_ref, en_ref = jax.jit(_reference_forward)(x, raw)
    jax.block_until_ready((feat_ref, en_ref))
    assert rel_err(feat, feat_ref) < 3e-2, rel_err(feat, feat_ref)
    assert rel_err(energies, en_ref) < 1e-1, rel_err(energies, en_ref)

    # ---- energies-only path (no fmap writeback) + B not a multiple of 8 ----
    key, kx2 = jax.random.split(key)
    x2 = jax.random.normal(kx2, (10, 1, 32, 32), jnp.float32)
    fwd = jax.jit(energy_model_forward)
    en2 = fwd(x2, packed)
    jax.block_until_ready(en2)
    assert en2.shape == (10,)
    _, en2_ref = jax.jit(_reference_forward)(x2, raw)
    jax.block_until_ready(en2_ref)
    assert rel_err(en2, en2_ref) < 1e-1, rel_err(en2, en2_ref)

    print("KERNEL_OK")
</pallas_src>

<mosaic_0001>
module attributes {stable_mosaic.version = 11 : i64} {
  func.func @kernel(%arg0: i32, %arg1: memref<5xf32, #tpu.memory_space<smem>>, %arg2: memref<8x1024xbf16, #tpu.memory_space<vmem>>, %arg3: memref<1024x1024xbf16, #tpu.memory_space<vmem>>, %arg4: memref<1x1024xbf16, #tpu.memory_space<vmem>>, %arg5: memref<1024x512xbf16, #tpu.memory_space<vmem>>, %arg6: memref<1x512xbf16, #tpu.memory_space<vmem>>, %arg7: memref<512x256xbf16, #tpu.memory_space<vmem>>, %arg8: memref<1x256xbf16, #tpu.memory_space<vmem>>, %arg9: memref<256x128xbf16, #tpu.memory_space<vmem>>, %arg10: memref<1x128xbf16, #tpu.memory_space<vmem>>, %arg11: memref<1x128xbf16, #tpu.memory_space<vmem>>, %arg12: memref<8x128xf32, #tpu.memory_space<vmem>>, %arg13: memref<8x128xf32, #tpu.memory_space<vmem>>) attributes {dimension_semantics = [#tpu.dimension_semantics<parallel>], iteration_bounds = array<i64: 1>, scalar_prefetch = 0 : i64, scratch_operands = 0 : i64, tpu.core_type = #tpu.core_type<tc>, window_params = [{transform_indices = @transform_0, window_bounds = array<i64: 5>}, {transform_indices = @transform_1, window_bounds = array<i64: 8, 1024>}, {pipeline_mode = #tpu.pipeline_mode<synchronous>, transform_indices = @transform_2, window_bounds = array<i64: 1024, 1024>}, {pipeline_mode = #tpu.pipeline_mode<synchronous>, transform_indices = @transform_3, window_bounds = array<i64: 1, 1024>}, {pipeline_mode = #tpu.pipeline_mode<synchronous>, transform_indices = @transform_4, window_bounds = array<i64: 1024, 512>}, {pipeline_mode = #tpu.pipeline_mode<synchronous>, transform_indices = @transform_5, window_bounds = array<i64: 1, 512>}, {pipeline_mode = #tpu.pipeline_mode<synchronous>, transform_indices = @transform_6, window_bounds = array<i64: 512, 256>}, {pipeline_mode = #tpu.pipeline_mode<synchronous>, transform_indices = @transform_7, window_bounds = array<i64: 1, 256>}, {pipeline_mode = #tpu.pipeline_mode<synchronous>, transform_indices = @transform_8, window_bounds = array<i64: 256, 128>}, {pipeline_mode = #tpu.pipeline_mode<synchronous>, transform_indices = @transform_9, window_bounds = array<i64: 1, 128>}, {pipeline_mode = #tpu.pipeline_mode<synchronous>, transform_indices = @transform_10, window_bounds = array<i64: 1, 128>}, {transform_indices = @transform_11, window_bounds = array<i64: 8, 128>}, {transform_indices = @transform_12, window_bounds = array<i64: 8, 128>}]} {
    %c0 = arith.constant 0 : index
    %c0_0 = arith.constant 0 : index
    %0 = vector.load %arg2[%c0, %c0_0] : memref<8x1024xbf16, #tpu.memory_space<vmem>>, vector<8x1024xbf16>
    %c0_1 = arith.constant 0 : index
    %1 = memref.load %arg1[%c0_1] : memref<5xf32, #tpu.memory_space<smem>>
    %c0_2 = arith.constant 0 : index
    %c0_3 = arith.constant 0 : index
    %2 = vector.load %arg3[%c0_2, %c0_3] : memref<1024x1024xbf16, #tpu.memory_space<vmem>>, vector<1024x1024xbf16>
    %cst = arith.constant dense<0.000000e+00> : vector<8x1024xf32>
    %3 = tpu.matmul %0, %2, %cst {dimension_numbers = #tpu.dot_dimension_numbers<[1], [0], [0], [1], [0, 0, 1, 1], [], []>} : vector<8x1024xbf16>, vector<1024x1024xbf16>, vector<8x1024xf32> -> vector<8x1024xf32>
    %c0_4 = arith.constant 0 : index
    %c0_5 = arith.constant 0 : index
    %4 = vector.load %arg4[%c0_4, %c0_5] : memref<1x1024xbf16, #tpu.memory_space<vmem>>, vector<1x1024xbf16>
    %5 = arith.extf %4 : vector<1x1024xbf16> to vector<1x1024xf32>
    %6 = vector.broadcast %5 : vector<1x1024xf32> to vector<8x1024xf32>
    %7 = arith.addf %3, %6 : vector<8x1024xf32>
    %cst_6 = arith.constant 0.000000e+00 : f32
    %8 = vector.broadcast %cst_6 : f32 to vector<8x1024xf32>
    %9 = arith.cmpf ogt, %7, %8 : vector<8x1024xf32>
    %10 = vector.broadcast %1 : f32 to vector<8x1024xf32>
    %11 = arith.mulf %10, %7 : vector<8x1024xf32>
    %12 = arith.select %9, %7, %11 : vector<8x1024xi1>, vector<8x1024xf32>
    %13 = arith.truncf %12 : vector<8x1024xf32> to vector<8x1024xbf16>
    %c1 = arith.constant 1 : index
    %14 = memref.load %arg1[%c1] : memref<5xf32, #tpu.memory_space<smem>>
    %c0_7 = arith.constant 0 : index
    %c0_8 = arith.constant 0 : index
    %15 = vector.load %arg5[%c0_7, %c0_8] : memref<1024x512xbf16, #tpu.memory_space<vmem>>, vector<1024x512xbf16>
    %cst_9 = arith.constant dense<0.000000e+00> : vector<8x512xf32>
    %16 = tpu.matmul %13, %15, %cst_9 {dimension_numbers = #tpu.dot_dimension_numbers<[1], [0], [0], [1], [0, 0, 1, 1], [], []>} : vector<8x1024xbf16>, vector<1024x512xbf16>, vector<8x512xf32> -> vector<8x512xf32>
    %c0_10 = arith.constant 0 : index
    %c0_11 = arith.constant 0 : index
    %17 = vector.load %arg6[%c0_10, %c0_11] : memref<1x512xbf16, #tpu.memory_space<vmem>>, vector<1x512xbf16>
    %18 = arith.extf %17 : vector<1x512xbf16> to vector<1x512xf32>
    %19 = vector.broadcast %18 : vector<1x512xf32> to vector<8x512xf32>
    %20 = arith.addf %16, %19 : vector<8x512xf32>
    %cst_12 = arith.constant 0.000000e+00 : f32
    %21 = vector.broadcast %cst_12 : f32 to vector<8x512xf32>
    %22 = arith.cmpf ogt, %20, %21 : vector<8x512xf32>
    %23 = vector.broadcast %14 : f32 to vector<8x512xf32>
    %24 = arith.mulf %23, %20 : vector<8x512xf32>
    %25 = arith.select %22, %20, %24 : vector<8x512xi1>, vector<8x512xf32>
    %26 = arith.truncf %25 : vector<8x512xf32> to vector<8x512xbf16>
    %c2 = arith.constant 2 : index
    %27 = memref.load %arg1[%c2] : memref<5xf32, #tpu.memory_space<smem>>
    %c0_13 = arith.constant 0 : index
    %c0_14 = arith.constant 0 : index
    %28 = vector.load %arg7[%c0_13, %c0_14] : memref<512x256xbf16, #tpu.memory_space<vmem>>, vector<512x256xbf16>
    %cst_15 = arith.constant dense<0.000000e+00> : vector<8x256xf32>
    %29 = tpu.matmul %26, %28, %cst_15 {dimension_numbers = #tpu.dot_dimension_numbers<[1], [0], [0], [1], [0, 0, 1, 1], [], []>} : vector<8x512xbf16>, vector<512x256xbf16>, vector<8x256xf32> -> vector<8x256xf32>
    %c0_16 = arith.constant 0 : index
    %c0_17 = arith.constant 0 : index
    %30 = vector.load %arg8[%c0_16, %c0_17] : memref<1x256xbf16, #tpu.memory_space<vmem>>, vector<1x256xbf16>
    %31 = arith.extf %30 : vector<1x256xbf16> to vector<1x256xf32>
    %32 = vector.broadcast %31 : vector<1x256xf32> to vector<8x256xf32>
    %33 = arith.addf %29, %32 : vector<8x256xf32>
    %cst_18 = arith.constant 0.000000e+00 : f32
    %34 = vector.broadcast %cst_18 : f32 to vector<8x256xf32>
    %35 = arith.cmpf ogt, %33, %34 : vector<8x256xf32>
    %36 = vector.broadcast %27 : f32 to vector<8x256xf32>
    %37 = arith.mulf %36, %33 : vector<8x256xf32>
    %38 = arith.select %35, %33, %37 : vector<8x256xi1>, vector<8x256xf32>
    %39 = arith.truncf %38 : vector<8x256xf32> to vector<8x256xbf16>
    %c3 = arith.constant 3 : index
    %40 = memref.load %arg1[%c3] : memref<5xf32, #tpu.memory_space<smem>>
    %c0_19 = arith.constant 0 : index
    %c0_20 = arith.constant 0 : index
    %41 = vector.load %arg9[%c0_19, %c0_20] : memref<256x128xbf16, #tpu.memory_space<vmem>>, vector<256x128xbf16>
    %cst_21 = arith.constant dense<0.000000e+00> : vector<8x128xf32>
    %42 = tpu.matmul %39, %41, %cst_21 {dimension_numbers = #tpu.dot_dimension_numbers<[1], [0], [0], [1], [0, 0, 1, 1], [], []>} : vector<8x256xbf16>, vector<256x128xbf16>, vector<8x128xf32> -> vector<8x128xf32>
    %c0_22 = arith.constant 0 : index
    %c0_23 = arith.constant 0 : index
    %43 = vector.load %arg10[%c0_22, %c0_23] : memref<1x128xbf16, #tpu.memory_space<vmem>>, vector<1x128xbf16>
    %44 = arith.extf %43 : vector<1x128xbf16> to vector<1x128xf32>
    %45 = vector.broadcast %44 : vector<1x128xf32> to vector<8x128xf32>
    %46 = arith.addf %42, %45 : vector<8x128xf32>
    %cst_24 = arith.constant 0.000000e+00 : f32
    %47 = vector.broadcast %cst_24 : f32 to vector<8x128xf32>
    %48 = arith.cmpf ogt, %46, %47 : vector<8x128xf32>
    %49 = vector.broadcast %40 : f32 to vector<8x128xf32>
    %50 = arith.mulf %49, %46 : vector<8x128xf32>
    %51 = arith.select %48, %46, %50 : vector<8x128xi1>, vector<8x128xf32>
    %c0_25 = arith.constant 0 : index
    %c0_26 = arith.constant 0 : index
    %52 = vector.load %arg12[%c0_25, %c0_26] : memref<8x128xf32, #tpu.memory_space<vmem>>, vector<8x128xf32>
    tpu.vector_store %arg12[%c0_25, %c0_26], %51 {strides = array<i32>} : memref<8x128xf32, #tpu.memory_space<vmem>>, vector<8x128xf32>,
    %c0_27 = arith.constant 0 : index
    %c0_28 = arith.constant 0 : index
    %53 = vector.load %arg11[%c0_27, %c0_28] : memref<1x128xbf16, #tpu.memory_space<vmem>>, vector<1x128xbf16>
    %54 = arith.extf %53 : vector<1x128xbf16> to vector<1x128xf32>
    %55 = vector.broadcast %54 : vector<1x128xf32> to vector<8x128xf32>
    %56 = arith.mulf %51, %55 : vector<8x128xf32>
    %cst_29 = arith.constant dense<0.000000e+00> : vector<8xf32>
    %57 = vector.multi_reduction <add>, %56, %cst_29 [1] : vector<8x128xf32> to vector<8xf32>
    %58 = vector.shape_cast %57 : vector<8xf32> to vector<8x1xf32>
    %c4 = arith.constant 4 : index
    %59 = memref.load %arg1[%c4] : memref<5xf32, #tpu.memory_space<smem>>
    %60 = vector.broadcast %59 : f32 to vector<8x1xf32>
    %61 = arith.addf %58, %60 : vector<8x1xf32>
    %62 = vector.shape_cast %61 : vector<8x1xf32> to vector<8x1xf32>
    %63 = vector.broadcast %62 : vector<8x1xf32> to vector<8x128xf32>
    %c0_30 = arith.constant 0 : index
    %c0_31 = arith.constant 0 : index
    %64 = vector.load %arg13[%c0_30, %c0_31] : memref<8x128xf32, #tpu.memory_space<vmem>>, vector<8x128xf32>
    tpu.vector_store %arg13[%c0_30, %c0_31], %63 {strides = array<i32>} : memref<8x128xf32, #tpu.memory_space<vmem>>, vector<8x128xf32>,
    return
  }
  func.func @transform_0(%arg0: i32) -> i32 {
    %c0_i32 = arith.constant 0 : i32
    %c0_i32_0 = arith.constant 0 : i32
    return %c0_i32 : i32
  }
  func.func @transform_1(%arg0: i32) -> (i32, i32) {
    %c0_i32 = arith.constant 0 : i32
    %c0_i32_0 = arith.constant 0 : i32
    return %arg0, %c0_i32 : i32, i32
  }
  func.func @transform_2(%arg0: i32) -> (i32, i32) {
    %c0_i32 = arith.constant 0 : i32
    %c0_i32_0 = arith.constant 0 : i32
    %c0_i32_1 = arith.constant 0 : i32
    return %c0_i32, %c0_i32_0 : i32, i32
  }
  func.func @transform_3(%arg0: i32) -> (i32, i32) {
    %c0_i32 = arith.constant 0 : i32
    %c0_i32_0 = arith.constant 0 : i32
    %c0_i32_1 = arith.constant 0 : i32
    return %c0_i32, %c0_i32_0 : i32, i32
  }
  func.func @transform_4(%arg0: i32) -> (i32, i32) {
    %c0_i32 = arith.constant 0 : i32
    %c0_i32_0 = arith.constant 0 : i32
    %c0_i32_1 = arith.constant 0 : i32
    return %c0_i32, %c0_i32_0 : i32, i32
  }
  func.func @transform_5(%arg0: i32) -> (i32, i32) {
    %c0_i32 = arith.constant 0 : i32
    %c0_i32_0 = arith.constant 0 : i32
    %c0_i32_1 = arith.constant 0 : i32
    return %c0_i32, %c0_i32_0 : i32, i32
  }
  func.func @transform_6(%arg0: i32) -> (i32, i32) {
    %c0_i32 = arith.constant 0 : i32
    %c0_i32_0 = arith.constant 0 : i32
    %c0_i32_1 = arith.constant 0 : i32
    return %c0_i32, %c0_i32_0 : i32, i32
  }
  func.func @transform_7(%arg0: i32) -> (i32, i32) {
    %c0_i32 = arith.constant 0 : i32
    %c0_i32_0 = arith.constant 0 : i32
    %c0_i32_1 = arith.constant 0 : i32
    return %c0_i32, %c0_i32_0 : i32, i32
  }
  func.func @transform_8(%arg0: i32) -> (i32, i32) {
    %c0_i32 = arith.constant 0 : i32
    %c0_i32_0 = arith.constant 0 : i32
    %c0_i32_1 = arith.constant 0 : i32
    return %c0_i32, %c0_i32_0 : i32, i32
  }
  func.func @transform_9(%arg0: i32) -> (i32, i32) {
    %c0_i32 = arith.constant 0 : i32
    %c0_i32_0 = arith.constant 0 : i32
    %c0_i32_1 = arith.constant 0 : i32
    return %c0_i32, %c0_i32_0 : i32, i32
  }
  func.func @transform_10(%arg0: i32) -> (i32, i32) {
    %c0_i32 = arith.constant 0 : i32
    %c0_i32_0 = arith.constant 0 : i32
    %c0_i32_1 = arith.constant 0 : i32
    return %c0_i32, %c0_i32_0 : i32, i32
  }
  func.func @transform_11(%arg0: i32) -> (i32, i32) {
    %c0_i32 = arith.constant 0 : i32
    %c0_i32_0 = arith.constant 0 : i32
    return %arg0, %c0_i32 : i32, i32
  }
  func.func @transform_12(%arg0: i32) -> (i32, i32) {
    %c0_i32 = arith.constant 0 : i32
    %c0_i32_0 = arith.constant 0 : i32
    return %arg0, %c0_i32 : i32, i32
  }
}

</mosaic_0001>

<bundles_post_ra>
// kernel: energy_model_forward.1
= control target key start
LH: loop header
LB: loop body
LE: loop exit
PB: predicated region body
PF: predicated region fallthrough
CT: control target
= control target key end

     0   :  { %18 = vsyncpa [#allocation4], 0  ;;  %s8779_s0 = inlined_call_operand.hbm [shape: f32[5], index: 0, kind: input, shape index: {}]   ;;  %s8780_s1 = inlined_call_operand.vmem [shape: bf16[8,1024], index: 1, kind: input, shape index: {}]   ;;  %s8781_s2 = inlined_call_operand.hbm [shape: bf16[1024,1024], index: 2, kind: input, shape index: {}]   ;;  %s8782_s3 = inlined_call_operand.hbm [shape: bf16[1,1024], index: 3, kind: input, shape index: {}]   ;;  %s8783_s4 = inlined_call_operand.hbm [shape: bf16[1024,512], index: 4, kind: input, shape index: {}]   ;;  %s8784_s5 = inlined_call_operand.hbm [shape: bf16[1,512], index: 5, kind: input, shape index: {}]   ;;  %s8785_s6 = inlined_call_operand.hbm [shape: bf16[512,256], index: 6, kind: input, shape index: {}]   ;;  %s8786_s7 = inlined_call_operand.hbm [shape: bf16[1,256], index: 7, kind: input, shape index: {}]   ;;  %s8787_s8 = inlined_call_operand.hbm [shape: bf16[256,128], index: 8, kind: input, shape index: {}]   ;;  %s8788_s9 = inlined_call_operand.hbm [shape: bf16[1,128], index: 9, kind: input, shape index: {}]   ;;  %s8789_s10 = inlined_call_operand.hbm [shape: bf16[1,128], index: 10, kind: input, shape index: {}]   ;;  %s8790_s11 = inlined_call_operand.vmem [shape: f32[8,128], index: 11, kind: output, shape index: {0}]   ;;  %s8791_s12 = inlined_call_operand.vmem [shape: f32[8,128], index: 12, kind: output, shape index: {1}]  }
   0x1   :  { %19 = vsyncpa [#allocation3], 0 }
   0x2   :  { %20 = vsyncpa [#allocation7], 0 }
   0x3   :  { %21 = vsyncpa [#allocation10], 0 }
   0x4   :  { %22 = vsyncpa [#allocation13], 0 }
   0x5   :  { %23 = vsyncpa [#allocation16], 0  ;;  %s8373_s21 = smov [#allocation6]   ;;  %s8374_s23 = smov [#allocation9]  }
   0x6   :  { %s52_s22 = sshll.u32 %s8373_s21, 4  ;;  %s74_s24 = sshll.u32 %s8374_s23, 4  ;;  %s53_s22 = int_to_ptr.vmem [resolvable:$true] %s52_s22  ;;  %s75_s24 = int_to_ptr.vmem [resolvable:$true] %s74_s24 }
   0x7   :  { %s8153_s27 = scalar_lea.hbm %s8782_s3, 128 }
   0x8   :  { %p8154_p0 = scmp.ne.s32.totalorder %s8782_s3, %s8153_s27  ;;  %p8157_p1 = scmp.lt.u32.totalorder %s8153_s27, %s8782_s3 }
   0xa   :  { %p8159_p2 = pnand %p8157_p1, %p8154_p0 }
   0xc   :  { %8162 = shalt.err (!%p8159_p2)
}
   0xd   :  { %s8163_s14 = scalar_lea.vmem %s53_s22, 128  ;;  %p8168_p4 = scmp.lt.s32.totalorder %s53_s22, %s53_s22 }
   0xe   :  { %p8164_p3 = scmp.ne.s32.totalorder %s53_s22, %s8163_s14  ;;  %p8169_p5 = scmp.lt.s32.totalorder %s8163_s14, %s8163_s14 }
  0x10   :  { %p8170_p6 = por %p8169_p5, %p8168_p4 }
  0x12   :  { %p8171_p7 = pnand %p8170_p6, %p8164_p3 }
  0x14   :  { %8174 = shalt.err (!%p8171_p7)
}
  0x15   :  { %55 = dma.hbm_to_vmem [thread:$0]  %s8782_s3, 128, %s53_s22, [#allocation7]  }
  0x16   :  { %s8175_s19 = scalar_lea.hbm %s8784_s5, 64 }
  0x17   :  { %p8176_p8 = scmp.ne.s32.totalorder %s8784_s5, %s8175_s19  ;;  %p8179_p9 = scmp.lt.u32.totalorder %s8175_s19, %s8784_s5 }
  0x19   :  { %p8181_p10 = pnand %p8179_p9, %p8176_p8 }
  0x1b   :  { %8184 = shalt.err (!%p8181_p10)
}
  0x1c   :  { %s8185_s26 = scalar_lea.vmem %s75_s24, 64  ;;  %p8190_p12 = scmp.lt.s32.totalorder %s75_s24, %s75_s24 }
  0x1d   :  { %p8186_p11 = scmp.ne.s32.totalorder %s75_s24, %s8185_s26  ;;  %p8191_p13 = scmp.lt.s32.totalorder %s8185_s26, %s8185_s26 }
  0x1f   :  { %p8192_p0 = por %p8191_p13, %p8190_p12 }
  0x21   :  { %p8193_p1 = pnand %p8192_p0, %p8186_p11 }
  0x23   :  { %8196 = shalt.err (!%p8193_p1)
}
  0x24   :  { %77 = dma.hbm_to_vmem [thread:$0]  %s8784_s5, 64, %s75_s24, [#allocation10]  }
  0x25   :  { %s8375_s27 = smov [#allocation12]   ;;  %s8376_s29 = smov [#allocation15]  }
  0x26   :  { %s96_s28 = sshll.u32 %s8375_s27, 4  ;;  %s118_s30 = sshll.u32 %s8376_s29, 4  ;;  %s97_s28 = int_to_ptr.vmem [resolvable:$true] %s96_s28  ;;  %s119_s30 = int_to_ptr.vmem [resolvable:$true] %s118_s30 }
  0x27   :  { %s8197_s15 = scalar_lea.hbm %s8786_s7, 32 }
  0x28   :  { %p8198_p2 = scmp.ne.s32.totalorder %s8786_s7, %s8197_s15  ;;  %p8201_p3 = scmp.lt.u32.totalorder %s8197_s15, %s8786_s7 }
  0x2a   :  { %p8203_p4 = pnand %p8201_p3, %p8198_p2 }
  0x2c   :  { %8206 = shalt.err (!%p8203_p4)
}
  0x2d   :  { %s8207_s5 = scalar_lea.vmem %s97_s28, 32  ;;  %p8212_p6 = scmp.lt.s32.totalorder %s97_s28, %s97_s28 }
  0x2e   :  { %p8208_p5 = scmp.ne.s32.totalorder %s97_s28, %s8207_s5  ;;  %p8213_p7 = scmp.lt.s32.totalorder %s8207_s5, %s8207_s5 }
  0x30   :  { %p8214_p8 = por %p8213_p7, %p8212_p6 }
  0x32   :  { %p8215_p9 = pnand %p8214_p8, %p8208_p5 }
  0x34   :  { %8218 = shalt.err (!%p8215_p9)
}
  0x35   :  { %99 = dma.hbm_to_vmem [thread:$0]  %s8786_s7, 32, %s97_s28, [#allocation13]  }
  0x36   :  { %s8219_s25 = scalar_lea.hbm %s8788_s9, 16 }
  0x37   :  { %p8220_p10 = scmp.ne.s32.totalorder %s8788_s9, %s8219_s25  ;;  %p8223_p11 = scmp.lt.u32.totalorder %s8219_s25, %s8788_s9 }
  0x39   :  { %p8225_p12 = pnand %p8223_p11, %p8220_p10 }
  0x3b   :  { %8228 = shalt.err (!%p8225_p12)
}
  0x3c   :  { %s8229_s29 = scalar_lea.vmem %s119_s30, 16  ;;  %s8233_s13 = scalar_lea.vmem %s119_s30, 32 }
  0x3d   :  { %p8230_p13 = scmp.ne.s32.totalorder %s119_s30, %s8229_s29  ;;  %p8234_p0 = scmp.lt.s32.totalorder %s119_s30, %s119_s30 }
  0x3e   :  { %p8235_p1 = scmp.lt.s32.totalorder %s8233_s13, %s8229_s29 }
  0x40   :  { %p8236_p2 = por %p8235_p1, %p8234_p0 }
  0x42   :  { %p8237_p3 = pnand %p8236_p2, %p8230_p13 }
  0x44   :  { %8240 = shalt.err (!%p8237_p3)
}
  0x45   :  { %121 = dma.hbm_to_vmem [thread:$0]  %s8788_s9, 16, %s119_s30, [#allocation16]  }
  0x46   :  { %s8241_s16 = scalar_lea.hbm %s8779_s0, 16 }
  0x47   :  { %p8242_p4 = scmp.ne.s32.totalorder %s8779_s0, %s8241_s16  ;;  %p8245_p5 = scmp.lt.u32.totalorder %s8241_s16, %s8779_s0 }
  0x49   :  { %p8247_p6 = pnand %p8245_p5, %p8242_p4 }
  0x4b   :  { %8250 = shalt.err (!%p8247_p6)
}
  0x4c   :  { %s8377_s24 = smov [#allocation2]   ;;  %s8378_s9 = smov [#allocation5]  }
  0x4d   :  { %31 = dma.hbm_to_smem %s8779_s0, 16, %s8377_s24, [#allocation4]  }
  0x4e   :  { %s39_s30 = sshll.u32 %s8378_s9, 4  ;;  %s8251_s26 = scalar_lea.hbm %s8781_s2, 65536  ;;  %s40_s30 = int_to_ptr.vmem [resolvable:$true] %s39_s30 }
  0x4f   :  { %p8252_p7 = scmp.ne.s32.totalorder %s8781_s2, %s8251_s26  ;;  %p8255_p8 = scmp.lt.u32.totalorder %s8251_s26, %s8781_s2 }
  0x51   :  { %p8257_p9 = pnand %p8255_p8, %p8252_p7 }
  0x53   :  { %8260 = shalt.err (!%p8257_p9)
}
  0x54   :  { %s8261_s13 = scalar_lea.vmem %s40_s30, 65536  ;;  %p8266_p11 = scmp.lt.s32.totalorder %s40_s30, %s40_s30 }
  0x55   :  { %p8262_p10 = scmp.ne.s32.totalorder %s40_s30, %s8261_s13  ;;  %p8267_p12 = scmp.lt.s32.totalorder %s8261_s13, %s8261_s13 }
  0x57   :  { %p8268_p13 = por %p8267_p12, %p8266_p11 }
  0x59   :  { %p8269_p0 = pnand %p8268_p13, %p8262_p10 }
  0x5b   :  { %8272 = shalt.err (!%p8269_p0)
}
  0x5c   :  { %s8379_s0 = smov 512   ;;  %s8380_s7 = smov 32  }
  0x5d   :  { %45 = dma.hbm_to_vmem [thread:$0]  %s8781_s2, 65536, %s40_s30, [#allocation3], %s8379_s0, %s8379_s0, %s8380_s7  }
  0x5e   :  { %s8381_s15 = smov [#allocation8]   ;;  %s8273_s19 = scalar_lea.hbm %s8783_s4, 32768 }
  0x5f   :  { %s61_s16 = sshll.u32 %s8381_s15, 4  ;;  %p8274_p1 = scmp.ne.s32.totalorder %s8783_s4, %s8273_s19  ;;  %s62_s16 = int_to_ptr.vmem [resolvable:$true] %s61_s16 }
  0x60   :  { %p8277_p2 = scmp.lt.u32.totalorder %s8273_s19, %s8783_s4 }
  0x62   :  { %p8279_p3 = pnand %p8277_p2, %p8274_p1 }
  0x64   :  { %8282 = shalt.err (!%p8279_p3)
}
  0x65   :  { %s8283_s9 = scalar_lea.vmem %s62_s16, 32768  ;;  %p8288_p5 = scmp.lt.s32.totalorder %s62_s16, %s62_s16 }
  0x66   :  { %p8284_p4 = scmp.ne.s32.totalorder %s62_s16, %s8283_s9  ;;  %p8289_p6 = scmp.lt.s32.totalorder %s8283_s9, %s8283_s9 }
  0x68   :  { %p8290_p7 = por %p8289_p6, %p8288_p5 }
  0x6a   :  { %p8291_p8 = pnand %p8290_p7, %p8284_p4 }
  0x6c   :  { %8294 = shalt.err (!%p8291_p8)
}
  0x6d   :  { %s8382_s2 = smov 256   ;;  %s8383_s30 = smov 16  }
  0x6e   :  { %67 = dma.hbm_to_vmem [thread:$0]  %s8783_s4, 32768, %s62_s16, [#allocation7], %s8382_s2, %s8382_s2, %s8383_s30  }
  0x6f   :  { %s8384_s26 = smov [#allocation11]   ;;  %s8295_s29 = scalar_lea.hbm %s8785_s6, 8192 }
  0x70   :  { %s83_s3 = sshll.u32 %s8384_s26, 4  ;;  %p8296_p9 = scmp.ne.s32.totalorder %s8785_s6, %s8295_s29  ;;  %s84_s3 = int_to_ptr.vmem [resolvable:$true] %s83_s3 }
  0x71   :  { %p8299_p10 = scmp.lt.u32.totalorder %s8295_s29, %s8785_s6 }
  0x73   :  { %p8301_p11 = pnand %p8299_p10, %p8296_p9 }
  0x75   :  { %8304 = shalt.err (!%p8301_p11)
}
  0x76   :  { %s8305_s14 = scalar_lea.vmem %s84_s3, 8192  ;;  %p8310_p13 = scmp.lt.s32.totalorder %s84_s3, %s84_s3 }
  0x77   :  { %p8306_p12 = scmp.ne.s32.totalorder %s84_s3, %s8305_s14  ;;  %p8311_p0 = scmp.lt.s32.totalorder %s8305_s14, %s8305_s14 }
  0x79   :  { %p8312_p1 = por %p8311_p0, %p8310_p13 }
  0x7b   :  { %p8313_p2 = pnand %p8312_p1, %p8306_p12 }
  0x7d   :  { %8316 = shalt.err (!%p8313_p2)
}
  0x7e   :  { %s8385_s4 = smov 128   ;;  %s8386_s15 = smov 8  }
  0x7f   :  { %89 = dma.hbm_to_vmem [thread:$0]  %s8785_s6, 8192, %s84_s3, [#allocation10], %s8385_s4, %s8385_s4, %s8386_s15  }
  0x80   :  { %s8387_s18 = smov [#allocation14]   ;;  %s8317_s20 = scalar_lea.hbm %s8787_s8, 2048 }
  0x81   :  { %s105_s19 = sshll.u32 %s8387_s18, 4  ;;  %p8318_p3 = scmp.ne.s32.totalorder %s8787_s8, %s8317_s20  ;;  %s106_s19 = int_to_ptr.vmem [resolvable:$true] %s105_s19 }
  0x82   :  { %p8321_p4 = scmp.lt.u32.totalorder %s8317_s20, %s8787_s8 }
  0x84   :  { %p8323_p5 = pnand %p8321_p4, %p8318_p3 }
  0x86   :  { %8326 = shalt.err (!%p8323_p5)
}
  0x87   :  { %s8327_s23 = scalar_lea.vmem %s106_s19, 2048  ;;  %p8332_p7 = scmp.lt.s32.totalorder %s106_s19, %s106_s19 }
  0x88   :  { %p8328_p6 = scmp.ne.s32.totalorder %s106_s19, %s8327_s23  ;;  %p8333_p8 = scmp.lt.s32.totalorder %s8327_s23, %s8327_s23 }
  0x8a   :  { %p8334_p9 = por %p8333_p8, %p8332_p7 }
  0x8c   :  { %p8335_p10 = pnand %p8334_p9, %p8328_p6 }
  0x8e   :  { %8338 = shalt.err (!%p8335_p10)
}
  0x8f   :  { %s8388_s6 = smov 64   ;;  %s8389_s25 = smov 4  }
  0x90   :  { %111 = dma.hbm_to_vmem [thread:$0]  %s8787_s8, 2048, %s106_s19, [#allocation13], %s8388_s6, %s8388_s6, %s8389_s25  }
  0x91   :  { %s8390_s22 = smov [#allocation17]   ;;  %s8339_s0 = scalar_lea.hbm %s8789_s10, 16 }
  0x92   :  { %s128_s27 = sshll.u32 %s8390_s22, 4  ;;  %p8340_p11 = scmp.ne.s32.totalorder %s8789_s10, %s8339_s0  ;;  %s129_s27 = int_to_ptr.vmem [resolvable:$true] %s128_s27 }
  0x93   :  { %p8343_p12 = scmp.lt.u32.totalorder %s8339_s0, %s8789_s10 }
  0x95   :  { %p8345_p13 = pnand %p8343_p12, %p8340_p11 }
  0x97   :  { %8348 = shalt.err (!%p8345_p13)
}
  0x98   :  { %s8349_s15 = scalar_lea.vmem %s129_s27, 16  ;;  %s8353_s8 = scalar_lea.vmem %s129_s27, 32 }
  0x99   :  { %p8350_p0 = scmp.ne.s32.totalorder %s129_s27, %s8349_s15  ;;  %p8354_p1 = scmp.lt.s32.totalorder %s129_s27, %s129_s27 }
  0x9a   :  { %p8355_p2 = scmp.lt.s32.totalorder %s8353_s8, %s8349_s15 }
  0x9c   :  { %p8356_p3 = por %p8355_p2, %p8354_p1 }
  0x9e   :  { %p8357_p4 = pnand %p8356_p3, %p8350_p0 }
  0xa0   :  { %8360 = shalt.err (!%p8357_p4)
}
  0xa1   :  { %131 = dma.hbm_to_vmem [thread:$0]  %s8789_s10, 16, %s129_s27, [#allocation16]  }
  0xa2   :  { %8361 = dma.done.wait [#allocation4], 16  }
  0xa3   :  { %8362 = vsyncadd [#allocation4], 4294967280 }
  0xa4   :  { %8363 = dma.done.wait [#allocation3], 65536  }
  0xa5   :  { %8364 = vsyncadd [#allocation3], 4294901760 }
  0xa6   :  { %8365 = dma.done.wait [#allocation7], 32896  }
  0xa7   :  { %8366 = vsyncadd [#allocation7], 4294934400 }
  0xa8   :  { %8367 = dma.done.wait [#allocation10], 8256  }
  0xa9   :  { %8368 = vsyncadd [#allocation10], 4294959040 }
  0xaa   :  { %8369 = dma.done.wait [#allocation13], 2080  }
  0xab   :  { %8370 = vsyncadd [#allocation13], 4294965216 }
  0xac   :  { %8371 = dma.done.wait [#allocation16], 32  }
  0xad   :  { %8372 = vsyncadd [#allocation16], 4294967264 }
  0xae   :  { %162 = sfence }
  0xaf   :  { %v169_v0 = vld [vmem:[#allocation5] sm:$0xff]  ;;  %v8584_v54 = vld [vmem:[%s8780_s1 + $0x8] sm:$0xff]  ;;  %s7180_s2 = sld [smem:[#allocation2 + $0x1]]  ;;  %s7437_s30 = sld [smem:[#allocation2 + $0x2]] }
  0xb0   :  { %v173_v1 = vld [vmem:[#allocation5 + $0x20] sm:$0xff]  ;;  %v8592_v61 = vcombine.high %v8584_v54, %v8584_v54  ;;  %s7502_s23 = sld [smem:[#allocation2 + $0x3]]  ;;  %s7519_s26 = sld [smem:[#allocation2 + $0x4]] }
  0xb1   :  { %v297_v2 = vld [vmem:[#allocation5 + $0x400] sm:$0xff]  ;;  %v6669_v3 = vcombine.high %v169_v0, %v173_v1  ;;  %v6668_v5 = vcombine.low %v169_v0, %v173_v1 }
  0xb2   :  { %v301_v4 = vld [vmem:[#allocation5 + $0x420] sm:$0xff]  ;;  %3419 = vmatprep.mubr.bf16.mxu0 %v8592_v61 }
  0xb3   :  { %v177_v6 = vld [vmem:[#allocation5 + $0x40] sm:$0xff]  ;;  %v6797_v8 = vcombine.high %v297_v2, %v301_v4  ;;  %v6796_v9 = vcombine.low %v297_v2, %v301_v4  ;;  %3346 = vmatprep.subr.bf16.mxu1 %v6669_v3 }
  0xb4   :  { %v181_v7 = vld [vmem:[#allocation5 + $0x60] sm:$0xff]  ;;  %3347 = vmatpush1.bf16.msra.mxu1 %v6668_v5 }
  0xb5   :  { %v6677_v10 = vcombine.high %v177_v6, %v181_v7  ;;  %v305_v11 = vld [vmem:[#allocation5 + $0x440] sm:$0xff]  ;;  %3387 = vmatprep.subr.bf16.mxu0 %v6797_v8  ;;  %v6676_v18 = vcombine.low %v177_v6, %v181_v7 }
  0xb6   :  { %v309_v12 = vld [vmem:[#allocation5 + $0x460] sm:$0xff]  ;;  %3388 = vmatpush1.bf16.msra.mxu0 %v6796_v9 }
  0xb7   :  { %v185_v13 = vld [vmem:[#allocation5 + $0x80] sm:$0xff]  ;;  %v6805_v14 = vcombine.high %v305_v11, %v309_v12  ;;  %3348 = vmatprep.subr.bf16.mxu1 %v6677_v10  ;;  %v6804_v19 = vcombine.low %v305_v11, %v309_v12 }
  0xb8   :  { %v189_v15 = vld [vmem:[#allocation5 + $0xa0] sm:$0xff]  ;;  %3349 = vmatpush1.bf16.msra.mxu1 %v6676_v18 }
  0xb9   :  { %v313_v16 = vld [vmem:[#allocation5 + $0x480] sm:$0xff]  ;;  %v6685_v20 = vcombine.high %v185_v13, %v189_v15  ;;  %3389 = vmatprep.subr.bf16.mxu0 %v6805_v14  ;;  %v6684_v26 = vcombine.low %v185_v13, %v189_v15 }
  0xba   :  { %v317_v17 = vld [vmem:[#allocation5 + $0x4a0] sm:$0xff]  ;;  %3390 = vmatpush1.bf16.msra.mxu0 %v6804_v19 }
  0xbb   :  { %v6813_v21 = vcombine.high %v313_v16, %v317_v17  ;;  %v193_v22 = vld [vmem:[#allocation5 + $0xc0] sm:$0xff]  ;;  %3350 = vmatprep.subr.bf16.mxu1 %v6685_v20  ;;  %v6812_v27 = vcombine.low %v313_v16, %v317_v17 }
  0xbc   :  { %v197_v23 = vld [vmem:[#allocation5 + $0xe0] sm:$0xff]  ;;  %3351 = vmatpush1.bf16.msra.mxu1 %v6684_v26 }
  0xbd   :  { %v321_v24 = vld [vmem:[#allocation5 + $0x4c0] sm:$0xff]  ;;  %v6693_v28 = vcombine.high %v193_v22, %v197_v23  ;;  %3391 = vmatprep.subr.bf16.mxu0 %v6813_v21  ;;  %v6692_v34 = vcombine.low %v193_v22, %v197_v23 }
  0xbe   :  { %v325_v25 = vld [vmem:[#allocation5 + $0x4e0] sm:$0xff]  ;;  %3392 = vmatpush1.bf16.msra.mxu0 %v6812_v27 }
  0xbf   :  { %v6821_v29 = vcombine.high %v321_v24, %v325_v25  ;;  %v201_v30 = vld [vmem:[#allocation5 + $0x100] sm:$0xff]  ;;  %3352 = vmatprep.subr.bf16.mxu1 %v6693_v28  ;;  %v6820_v35 = vcombine.low %v321_v24, %v325_v25 }
  0xc0   :  { %v205_v31 = vld [vmem:[#allocation5 + $0x120] sm:$0xff]  ;;  %3353 = vmatpush1.bf16.msra.mxu1 %v6692_v34 }
  0xc1   :  { %v329_v32 = vld [vmem:[#allocation5 + $0x500] sm:$0xff]  ;;  %v6701_v36 = vcombine.high %v201_v30, %v205_v31  ;;  %3393 = vmatprep.subr.bf16.mxu0 %v6821_v29  ;;  %v6700_v42 = vcombine.low %v201_v30, %v205_v31 }
  0xc2   :  { %v333_v33 = vld [vmem:[#allocation5 + $0x520] sm:$0xff]  ;;  %3394 = vmatpush1.bf16.msra.mxu0 %v6820_v35 }
  0xc3   :  { %v6829_v37 = vcombine.high %v329_v32, %v333_v33  ;;  %v209_v38 = vld [vmem:[#allocation5 + $0x140] sm:$0xff]  ;;  %3354 = vmatprep.subr.bf16.mxu1 %v6701_v36  ;;  %v6828_v43 = vcombine.low %v329_v32, %v333_v33 }
  0xc4   :  { %v213_v39 = vld [vmem:[#allocation5 + $0x160] sm:$0xff]  ;;  %3355 = vmatpush1.bf16.msra.mxu1 %v6700_v42 }
  0xc5   :  { %v337_v40 = vld [vmem:[#allocation5 + $0x540] sm:$0xff]  ;;  %v6709_v44 = vcombine.high %v209_v38, %v213_v39  ;;  %3395 = vmatprep.subr.bf16.mxu0 %v6829_v37  ;;  %v6708_v50 = vcombine.low %v209_v38, %v213_v39 }
  0xc6   :  { %v341_v41 = vld [vmem:[#allocation5 + $0x560] sm:$0xff]  ;;  %3396 = vmatpush1.bf16.msra.mxu0 %v6828_v43 }
  0xc7   :  { %v6837_v45 = vcombine.high %v337_v40, %v341_v41  ;;  %v217_v46 = vld [vmem:[#allocation5 + $0x180] sm:$0xff]  ;;  %3356 = vmatprep.subr.bf16.mxu1 %v6709_v44  ;;  %v6836_v51 = vcombine.low %v337_v40, %v341_v41 }
  0xc8   :  { %v221_v47 = vld [vmem:[#allocation5 + $0x1a0] sm:$0xff]  ;;  %3357 = vmatpush1.bf16.msra.mxu1 %v6708_v50 }
  0xc9   :  { %v345_v48 = vld [vmem:[#allocation5 + $0x580] sm:$0xff]  ;;  %v6717_v52 = vcombine.high %v217_v46, %v221_v47  ;;  %3397 = vmatprep.subr.bf16.mxu0 %v6837_v45  ;;  %v6716_v62 = vcombine.low %v217_v46, %v221_v47 }
  0xca   :  { %v349_v49 = vld [vmem:[#allocation5 + $0x5a0] sm:$0xff]  ;;  %3398 = vmatpush1.bf16.msra.mxu0 %v6836_v51 }
  0xcb   :  { %v8579_v53 = vld [vmem:[%s8780_s1] sm:$0xff]  ;;  %v6845_v55 = vcombine.high %v345_v48, %v349_v49  ;;  %3358 = vmatprep.subr.bf16.mxu1 %v6717_v52  ;;  %v6844_v63 = vcombine.low %v345_v48, %v349_v49 }
  0xcc   :  { %v225_v56 = vld [vmem:[#allocation5 + $0x1c0] sm:$0xff]  ;;  %v8588_v58 = vcombine.high %v8579_v53, %v8579_v53  ;;  %3359 = vmatpush1.bf16.msra.mxu1 %v6716_v62 }
  0xcd   :  { %v229_v57 = vld [vmem:[#allocation5 + $0x1e0] sm:$0xff]  ;;  %3399 = vmatprep.subr.bf16.mxu0 %v6845_v55 }
  0xce   :  { %v353_v59 = vld [vmem:[#allocation5 + $0x5c0] sm:$0xff]  ;;  %3378 = vmatprep.mubr.bf16.mxu1 %v8588_v58  ;;  %v6725_v0 = vcombine.high %v225_v56, %v229_v57  ;;  %v6724_v6 = vcombine.low %v225_v56, %v229_v57  ;;  %3400 = vmatpush1.bf16.msra.mxu0 %v6844_v63 }
  0xcf   :  { %v357_v60 = vld [vmem:[#allocation5 + $0x5e0] sm:$0xff] }
  0xd0   :  { %v6853_v1 = vcombine.high %v353_v59, %v357_v60  ;;  %v233_v2 = vld [vmem:[#allocation5 + $0x200] sm:$0xff]  ;;  %3360 = vmatprep.subr.bf16.mxu1 %v6725_v0  ;;  %v6852_v7 = vcombine.low %v353_v59, %v357_v60 }
  0xd1   :  { %v237_v3 = vld [vmem:[#allocation5 + $0x220] sm:$0xff]  ;;  %3361 = vmatpush1.bf16.msra.mxu1 %v6724_v6  ;;  %v170_v6 = vld [vmem:[#allocation5 + $0x8] sm:$0xff] }
  0xd2   :  { %v361_v4 = vld [vmem:[#allocation5 + $0x600] sm:$0xff]  ;;  %v6733_v8 = vcombine.high %v233_v2, %v237_v3  ;;  %3401 = vmatprep.subr.bf16.mxu0 %v6853_v1  ;;  %v6732_v14 = vcombine.low %v233_v2, %v237_v3 }
  0xd3   :  { %v365_v5 = vld [vmem:[#allocation5 + $0x620] sm:$0xff]  ;;  %3402 = vmatpush1.bf16.msra.mxu0 %v6852_v7  ;;  %v174_v7 = vld [vmem:[#allocation5 + $0x28] sm:$0xff] }
  0xd4   :  { %v6861_v9 = vcombine.high %v361_v4, %v365_v5  ;;  %v241_v10 = vld [vmem:[#allocation5 + $0x240] sm:$0xff]  ;;  %3362 = vmatprep.subr.bf16.mxu1 %v6733_v8  ;;  %v6860_v15 = vcombine.low %v361_v4, %v365_v5 }
  0xd5   :  { %v245_v11 = vld [vmem:[#allocation5 + $0x260] sm:$0xff]  ;;  %3363 = vmatpush1.bf16.msra.mxu1 %v6732_v14  ;;  %v178_v14 = vld [vmem:[#allocation5 + $0x48] sm:$0xff] }
  0xd6   :  { %v369_v12 = vld [vmem:[#allocation5 + $0x640] sm:$0xff]  ;;  %v6741_v16 = vcombine.high %v241_v10, %v245_v11  ;;  %3403 = vmatprep.subr.bf16.mxu0 %v6861_v9  ;;  %v6740_v22 = vcombine.low %v241_v10, %v245_v11 }
  0xd7   :  { %v373_v13 = vld [vmem:[#allocation5 + $0x660] sm:$0xff]  ;;  %3404 = vmatpush1.bf16.msra.mxu0 %v6860_v15  ;;  %v182_v15 = vld [vmem:[#allocation5 + $0x68] sm:$0xff] }
  0xd8   :  { %v6869_v17 = vcombine.high %v369_v12, %v373_v13  ;;  %v249_v18 = vld [vmem:[#allocation5 + $0x280] sm:$0xff]  ;;  %3364 = vmatprep.subr.bf16.mxu1 %v6741_v16  ;;  %v6868_v23 = vcombine.low %v369_v12, %v373_v13  ;;  %v6671_v12 = vcombine.high %v170_v6, %v174_v7  ;;  %v8598_v16 = vcombine.low %v8579_v53, %v8579_v53 }
  0xd9   :  { %v253_v19 = vld [vmem:[#allocation5 + $0x2a0] sm:$0xff]  ;;  %3365 = vmatpush1.bf16.msra.mxu1 %v6740_v22 }
  0xda   :  { %v377_v20 = vld [vmem:[#allocation5 + $0x680] sm:$0xff]  ;;  %v6749_v24 = vcombine.high %v249_v18, %v253_v19  ;;  %3405 = vmatprep.subr.bf16.mxu0 %v6869_v17  ;;  %v6748_v30 = vcombine.low %v249_v18, %v253_v19  ;;  %v8603_v19 = vld [vmem:[%s8780_s1 + $0x10] sm:$0xff] }
  0xdb   :  { %v381_v21 = vld [vmem:[#allocation5 + $0x6a0] sm:$0xff]  ;;  %3406 = vmatpush1.bf16.msra.mxu0 %v6868_v23  ;;  %v6679_v23 = vcombine.high %v178_v14, %v182_v15 }
  0xdc   :  { %v6877_v25 = vcombine.high %v377_v20, %v381_v21  ;;  %v257_v26 = vld [vmem:[#allocation5 + $0x2c0] sm:$0xff]  ;;  %3366 = vmatprep.subr.bf16.mxu1 %v6749_v24  ;;  %v6876_v31 = vcombine.low %v377_v20, %v381_v21  ;;  %v6670_v20 = vcombine.low %v170_v6, %v174_v7  ;;  %v8607_v21 = vcombine.low %v8584_v54, %v8584_v54  ;;  %v230_v7 = vld [vmem:[#allocation5 + $0x1e8] sm:$0xff] }
  0xdd   :  { %v261_v27 = vld [vmem:[#allocation5 + $0x2e0] sm:$0xff]  ;;  %3367 = vmatpush1.bf16.msra.mxu1 %v6748_v30  ;;  %v6678_v54 = vcombine.low %v178_v14, %v182_v15  ;;  %v238_v15 = vld [vmem:[#allocation5 + $0x228] sm:$0xff] }
  0xde   :  { %v385_v28 = vld [vmem:[#allocation5 + $0x6c0] sm:$0xff]  ;;  %v6757_v32 = vcombine.high %v257_v26, %v261_v27  ;;  %3407 = vmatprep.subr.bf16.mxu0 %v6877_v25  ;;  %v6756_v38 = vcombine.low %v257_v26, %v261_v27  ;;  %v186_v26 = vld [vmem:[#allocation5 + $0x88] sm:$0xff] }
  0xdf   :  { %v389_v29 = vld [vmem:[#allocation5 + $0x6e0] sm:$0xff]  ;;  %3408 = vmatpush1.bf16.msra.mxu0 %v6876_v31  ;;  %v190_v27 = vld [vmem:[#allocation5 + $0xa8] sm:$0xff] }
  0xe0   :  { %v6885_v33 = vcombine.high %v385_v28, %v389_v29  ;;  %v265_v34 = vld [vmem:[#allocation5 + $0x300] sm:$0xff]  ;;  %3368 = vmatprep.subr.bf16.mxu1 %v6757_v32  ;;  %v6884_v39 = vcombine.low %v385_v28, %v389_v29  ;;  %v8611_v28 = vcombine.high %v8603_v19, %v8603_v19  ;;  %v6687_v30 = vcombine.high %v186_v26, %v190_v27 }
  0xe1   :  { %v269_v35 = vld [vmem:[#allocation5 + $0x320] sm:$0xff]  ;;  %3369 = vmatpush1.bf16.msra.mxu1 %v6756_v38 }
  0xe2   :  { %v393_v36 = vld [vmem:[#allocation5 + $0x700] sm:$0xff]  ;;  %v6765_v40 = vcombine.high %v265_v34, %v269_v35  ;;  %3409 = vmatprep.subr.bf16.mxu0 %v6885_v33  ;;  %v6764_v46 = vcombine.low %v265_v34, %v269_v35  ;;  %v194_v33 = vld [vmem:[#allocation5 + $0xc8] sm:$0xff] }
  0xe3   :  { %v397_v37 = vld [vmem:[#allocation5 + $0x720] sm:$0xff]  ;;  %3410 = vmatpush1.bf16.msra.mxu0 %v6884_v39  ;;  %v198_v35 = vld [vmem:[#allocation5 + $0xe8] sm:$0xff] }
  0xe4   :  { %v6893_v41 = vcombine.high %v393_v36, %v397_v37  ;;  %v273_v42 = vld [vmem:[#allocation5 + $0x340] sm:$0xff]  ;;  %3370 = vmatprep.subr.bf16.mxu1 %v6765_v40  ;;  %v6892_v47 = vcombine.low %v393_v36, %v397_v37  ;;  %v6686_v36 = vcombine.low %v186_v26, %v190_v27  ;;  %v6695_v38 = vcombine.high %v194_v33, %v198_v35 }
  0xe5   :  { %v277_v43 = vld [vmem:[#allocation5 + $0x360] sm:$0xff]  ;;  %3371 = vmatpush1.bf16.msra.mxu1 %v6764_v46 }
  0xe6   :  { %v401_v44 = vld [vmem:[#allocation5 + $0x740] sm:$0xff]  ;;  %v6773_v48 = vcombine.high %v273_v42, %v277_v43  ;;  %3411 = vmatprep.subr.bf16.mxu0 %v6893_v41  ;;  %v6772_v56 = vcombine.low %v273_v42, %v277_v43  ;;  %v202_v41 = vld [vmem:[#allocation5 + $0x108] sm:$0xff] }
  0xe7   :  { %v405_v45 = vld [vmem:[#allocation5 + $0x760] sm:$0xff]  ;;  %3412 = vmatpush1.bf16.msra.mxu0 %v6892_v47  ;;  %v206_v43 = vld [vmem:[#allocation5 + $0x128] sm:$0xff] }
  0xe8   :  { %v6901_v49 = vcombine.high %v401_v44, %v405_v45  ;;  %v281_v50 = vld [vmem:[#allocation5 + $0x380] sm:$0xff]  ;;  %3372 = vmatprep.subr.bf16.mxu1 %v6773_v48  ;;  %v6900_v57 = vcombine.low %v401_v44, %v405_v45  ;;  %v6694_v44 = vcombine.low %v194_v33, %v198_v35  ;;  %v6703_v46 = vcombine.high %v202_v41, %v206_v43  ;;  %v254_v33 = vld [vmem:[#allocation5 + $0x2a8] sm:$0xff] }
  0xe9   :  { %v285_v51 = vld [vmem:[#allocation5 + $0x3a0] sm:$0xff]  ;;  %3373 = vmatpush1.bf16.msra.mxu1 %v6772_v56 }
  0xea   :  { %v409_v52 = vld [vmem:[#allocation5 + $0x780] sm:$0xff]  ;;  %v6781_v59 = vcombine.high %v281_v50, %v285_v51  ;;  %3413 = vmatprep.subr.bf16.mxu0 %v6901_v49  ;;  %v6780_v2 = vcombine.low %v281_v50, %v285_v51  ;;  %v210_v49 = vld [vmem:[#allocation5 + $0x148] sm:$0xff] }
  0xeb   :  { %v413_v55 = vld [vmem:[#allocation5 + $0x7a0] sm:$0xff]  ;;  %3414 = vmatpush1.bf16.msra.mxu0 %v6900_v57  ;;  %v214_v51 = vld [vmem:[#allocation5 + $0x168] sm:$0xff] }
  0xec   :  { %v6909_v60 = vcombine.high %v409_v52, %v413_v55  ;;  %v289_v62 = vld [vmem:[#allocation5 + $0x3c0] sm:$0xff]  ;;  %3374 = vmatprep.subr.bf16.mxu1 %v6781_v59  ;;  %v6908_v3 = vcombine.low %v409_v52, %v413_v55  ;;  %v6702_v52 = vcombine.low %v202_v41, %v206_v43  ;;  %v6711_v56 = vcombine.high %v210_v49, %v214_v51  ;;  %v262_v41 = vld [vmem:[#allocation5 + $0x2e8] sm:$0xff] }
  0xed   :  { %v293_v63 = vld [vmem:[#allocation5 + $0x3e0] sm:$0xff]  ;;  %3375 = vmatpush1.bf16.msra.mxu1 %v6780_v2 }
  0xee   :  { %v417_v0 = vld [vmem:[#allocation5 + $0x7c0] sm:$0xff]  ;;  %v6789_v4 = vcombine.high %v289_v62, %v293_v63  ;;  %3415 = vmatprep.subr.bf16.mxu0 %v6909_v60  ;;  %v6788_v10 = vcombine.low %v289_v62, %v293_v63  ;;  %v218_v60 = vld [vmem:[#allocation5 + $0x188] sm:$0xff] }
  0xef   :  { %v421_v1 = vld [vmem:[#allocation5 + $0x7e0] sm:$0xff]  ;;  %3416 = vmatpush1.bf16.msra.mxu0 %v6908_v3  ;;  %v222_v63 = vld [vmem:[#allocation5 + $0x1a8] sm:$0xff] }
  0xf0   :  { %v6917_v5 = vcombine.high %v417_v0, %v421_v1  ;;  %v425_v8 = vld [vmem:[#allocation5 + $0x800] sm:$0xff]  ;;  %3376 = vmatprep.subr.bf16.mxu1 %v6789_v4  ;;  %v6916_v11 = vcombine.low %v417_v0, %v421_v1  ;;  %v6710_v0 = vcombine.low %v210_v49, %v214_v51  ;;  %v6719_v2 = vcombine.high %v218_v60, %v222_v63  ;;  %v270_v49 = vld [vmem:[#allocation5 + $0x328] sm:$0xff] }
  0xf1   :  { %v429_v9 = vld [vmem:[#allocation5 + $0x820] sm:$0xff]  ;;  %3377 = vmatpush1.bf16.msra.mxu1 %v6788_v10 }
  0xf2   :  { %3417 = vmatprep.subr.bf16.mxu0 %v6917_v5  ;;  %v6925_v13 = vcombine.high %v425_v8, %v429_v9  ;;  %v433_v17 = vld [vmem:[#allocation5 + $0x840] sm:$0xff]  ;;  %v6924_v22 = vcombine.low %v425_v8, %v429_v9  ;;  %3510 = vmatprep.subr.bf16.mxu1 %v6671_v12  ;;  %v226_v5 = vld [vmem:[#allocation5 + $0x1c8] sm:$0xff]  ;;  %v6718_v8 = vcombine.low %v218_v60, %v222_v63 }
  0xf3   :  { %v437_v18 = vld [vmem:[#allocation5 + $0x860] sm:$0xff]  ;;  %3418 = vmatpush1.bf16.msra.mxu0 %v6916_v11  ;;  %v6727_v10 = vcombine.high %v226_v5, %v230_v7  ;;  %v278_v60 = vld [vmem:[#allocation5 + $0x368] sm:$0xff] }
  0xf4   :  { %v441_v24 = vld [vmem:[#allocation5 + $0x880] sm:$0xff]  ;;  %3428 = vmatprep.subr.bf16.mxu0 %v6925_v13  ;;  %v6933_v25 = vcombine.high %v433_v17, %v437_v18  ;;  %3379 = vmatmul.mubr.bf16.vlgmr.msra.gmra.mrb[0].mxu1 %v8598_v16  ;;  %v6932_v29 = vcombine.low %v433_v17, %v437_v18  ;;  %v234_v13 = vld [vmem:[#allocation5 + $0x208] sm:$0xff]  ;;  %v6726_v17 = vcombine.low %v226_v5, %v230_v7 }
  0xf5   :  { %v445_v53 = vld [vmem:[#allocation5 + $0x8a0] sm:$0xff]  ;;  %3511 = vmatpush1.bf16.msra.mxu1 %v6670_v20  ;;  %3542 = vmatprep.mubr.bf16.mxu1 %v8588_v58  ;;  %v6735_v20 = vcombine.high %v234_v13, %v238_v15  ;;  %v6734_v26 = vcombine.low %v234_v13, %v238_v15  ;;  %v286_v5 = vld [vmem:[#allocation5 + $0x3a8] sm:$0xff] }
  0xf6   :  { %3420 = vmatmul.mubr.bf16.vlgmr.msra.gmra.mrb[0].mxu0 %v8607_v21  ;;  %3512 = vmatprep.subr.bf16.mxu1 %v6679_v23  ;;  %v449_v31 = vld [vmem:[#allocation5 + $0x8c0] sm:$0xff]  ;;  %v6941_v34 = vcombine.high %v441_v24, %v445_v53  ;;  %v6940_v37 = vcombine.low %v441_v24, %v445_v53  ;;  %v242_v24 = vld [vmem:[#allocation5 + $0x248] sm:$0xff] }
  0xf7   :  { %3429 = vmatpush1.bf16.msra.mxu0 %v6924_v22  ;;  %v453_v32 = vld [vmem:[#allocation5 + $0x8e0] sm:$0xff]  ;;  %3460 = vmatprep.mubr.bf16.mxu0 %v8611_v28  ;;  %v294_v13 = vld [vmem:[#allocation5 + $0x3e8] sm:$0xff] }
  0xf8   :  { %3430 = vmatprep.subr.bf16.mxu0 %v6933_v25  ;;  %v457_v39 = vld [vmem:[#allocation5 + $0x900] sm:$0xff]  ;;  %v6949_v42 = vcombine.high %v449_v31, %v453_v32  ;;  %v6948_v45 = vcombine.low %v449_v31, %v453_v32  ;;  %v246_v25 = vld [vmem:[#allocation5 + $0x268] sm:$0xff] }
  0xf9   :  { %3513 = vmatpush1.bf16.msra.mxu1 %v6678_v54  ;;  %v461_v40 = vld [vmem:[#allocation5 + $0x920] sm:$0xff]  ;;  %v6743_v54 = vcombine.high %v242_v24, %v246_v25  ;;  %v250_v31 = vld [vmem:[#allocation5 + $0x288] sm:$0xff] }
  0xfa   :  { %3514 = vmatprep.subr.bf16.mxu1 %v6687_v30  ;;  %v465_v47 = vld [vmem:[#allocation5 + $0x940] sm:$0xff]  ;;  %v6957_v50 = vcombine.high %v457_v39, %v461_v40  ;;  %v6956_v55 = vcombine.low %v457_v39, %v461_v40  ;;  %v258_v39 = vld [vmem:[#allocation5 + $0x2c8] sm:$0xff] }
  0xfb   :  { %3431 = vmatpush1.bf16.msra.mxu0 %v6932_v29  ;;  %v469_v48 = vld [vmem:[#allocation5 + $0x960] sm:$0xff] }
  0xfc   :  { %3432 = vmatprep.subr.bf16.mxu0 %v6941_v34  ;;  %v473_v57 = vld [vmem:[#allocation5 + $0x980] sm:$0xff]  ;;  %v6965_v62 = vcombine.high %v465_v47, %v469_v48  ;;  %v6964_v1 = vcombine.low %v465_v47, %v469_v48  ;;  %v6742_v34 = vcombine.low %v242_v24, %v246_v25  ;;  %v266_v47 = vld [vmem:[#allocation5 + $0x308] sm:$0xff] }
  0xfd   :  { %3515 = vmatpush1.bf16.msra.mxu1 %v6686_v36  ;;  %v477_v59 = vld [vmem:[#allocation5 + $0x9a0] sm:$0xff]  ;;  %v6751_v36 = vcombine.high %v250_v31, %v254_v33  ;;  %v302_v24 = vld [vmem:[#allocation5 + $0x428] sm:$0xff] }
  0xfe   :  { %3516 = vmatprep.subr.bf16.mxu1 %v6695_v38  ;;  %v481_v3 = vld [vmem:[#allocation5 + $0x9c0] sm:$0xff]  ;;  %v6973_v6 = vcombine.high %v473_v57, %v477_v59  ;;  %v6972_v9 = vcombine.low %v473_v57, %v477_v59  ;;  %v274_v57 = vld [vmem:[#allocation5 + $0x348] sm:$0xff] }
  0xff   :  { %3433 = vmatpush1.bf16.msra.mxu0 %v6940_v37  ;;  %v485_v4 = vld [vmem:[#allocation5 + $0x9e0] sm:$0xff] }
 0x100   :  { %3434 = vmatprep.subr.bf16.mxu0 %v6949_v42  ;;  %v489_v11 = vld [vmem:[#allocation5 + $0xa00] sm:$0xff]  ;;  %v6981_v14 = vcombine.high %v481_v3, %v485_v4  ;;  %v6980_v18 = vcombine.low %v481_v3, %v485_v4  ;;  %v6750_v42 = vcombine.low %v250_v31, %v254_v33  ;;  %v282_v3 = vld [vmem:[#allocation5 + $0x388] sm:$0xff] }
 0x101   :  { %3517 = vmatpush1.bf16.msra.mxu1 %v6694_v44  ;;  %v493_v12 = vld [vmem:[#allocation5 + $0xa20] sm:$0xff]  ;;  %v6759_v44 = vcombine.high %v258_v39, %v262_v41 }
 0x102   :  { %3518 = vmatprep.subr.bf16.mxu1 %v6703_v46  ;;  %v497_v22 = vld [vmem:[#allocation5 + $0xa40] sm:$0xff]  ;;  %v6989_v53 = vcombine.high %v489_v11, %v493_v12  ;;  %v6988_v27 = vcombine.low %v489_v11, %v493_v12  ;;  %v290_v11 = vld [vmem:[#allocation5 + $0x3c8] sm:$0xff] }
 0x103   :  { %3435 = vmatpush1.bf16.msra.mxu0 %v6948_v45  ;;  %v501_v23 = vld [vmem:[#allocation5 + $0xa60] sm:$0xff] }
 0x104   :  { %3436 = vmatprep.subr.bf16.mxu0 %v6957_v50  ;;  %v505_v29 = vld [vmem:[#allocation5 + $0xa80] sm:$0xff]  ;;  %v6997_v32 = vcombine.high %v497_v22, %v501_v23  ;;  %v6996_v35 = vcombine.low %v497_v22, %v501_v23  ;;  %v6758_v50 = vcombine.low %v258_v39, %v262_v41  ;;  %v298_v22 = vld [vmem:[#allocation5 + $0x408] sm:$0xff] }
 0x105   :  { %3519 = vmatpush1.bf16.msra.mxu1 %v6702_v52  ;;  %v509_v30 = vld [vmem:[#allocation5 + $0xaa0] sm:$0xff]  ;;  %v6767_v52 = vcombine.high %v266_v47, %v270_v49  ;;  %v6798_v33 = vcombine.low %v298_v22, %v302_v24  ;;  %v314_v39 = vld [vmem:[#allocation5 + $0x488] sm:$0xff] }
 0x106   :  { %3520 = vmatprep.subr.bf16.mxu1 %v6711_v56  ;;  %v513_v37 = vld [vmem:[#allocation5 + $0xac0] sm:$0xff]  ;;  %v7005_v40 = vcombine.high %v505_v29, %v509_v30  ;;  %v7004_v43 = vcombine.low %v505_v29, %v509_v30  ;;  %v306_v29 = vld [vmem:[#allocation5 + $0x448] sm:$0xff] }
 0x107   :  { %3437 = vmatpush1.bf16.msra.mxu0 %v6956_v55  ;;  %v517_v38 = vld [vmem:[#allocation5 + $0xae0] sm:$0xff]  ;;  %v310_v30 = vld [vmem:[#allocation5 + $0x468] sm:$0xff] }
 0x108   :  { %3438 = vmatprep.subr.bf16.mxu0 %v6965_v62  ;;  %v521_v45 = vld [vmem:[#allocation5 + $0xb00] sm:$0xff]  ;;  %v7013_v48 = vcombine.high %v513_v37, %v517_v38  ;;  %v7012_v51 = vcombine.low %v513_v37, %v517_v38  ;;  %v6766_v62 = vcombine.low %v266_v47, %v270_v49  ;;  %v318_v41 = vld [vmem:[#allocation5 + $0x4a8] sm:$0xff] }
 0x109   :  { %3521 = vmatpush1.bf16.msra.mxu1 %v6710_v0  ;;  %v525_v46 = vld [vmem:[#allocation5 + $0xb20] sm:$0xff]  ;;  %v6775_v0 = vcombine.high %v274_v57, %v278_v60  ;;  %v322_v47 = vld [vmem:[#allocation5 + $0x4c8] sm:$0xff] }
 0x10a   :  { %3522 = vmatprep.subr.bf16.mxu1 %v6719_v2  ;;  %v529_v55 = vld [vmem:[#allocation5 + $0xb40] sm:$0xff]  ;;  %v7021_v59 = vcombine.high %v521_v45, %v525_v46  ;;  %v7020_v63 = vcombine.low %v521_v45, %v525_v46  ;;  %v326_v49 = vld [vmem:[#allocation5 + $0x4e8] sm:$0xff] }
 0x10b   :  { %3439 = vmatpush1.bf16.msra.mxu0 %v6964_v1  ;;  %v533_v56 = vld [vmem:[#allocation5 + $0xb60] sm:$0xff] }
 0x10c   :  { %3440 = vmatprep.subr.bf16.mxu0 %v6973_v6  ;;  %v537_v1 = vld [vmem:[#allocation5 + $0xb80] sm:$0xff]  ;;  %v7029_v4 = vcombine.high %v529_v55, %v533_v56  ;;  %v6774_v6 = vcombine.low %v274_v57, %v278_v60  ;;  %v7028_v7 = vcombine.low %v529_v55, %v533_v56  ;;  %v330_v57 = vld [vmem:[#allocation5 + $0x508] sm:$0xff] }
 0x10d   :  { %3523 = vmatpush1.bf16.msra.mxu1 %v6718_v8  ;;  %v541_v2 = vld [vmem:[#allocation5 + $0xba0] sm:$0xff]  ;;  %v6783_v8 = vcombine.high %v282_v3, %v286_v5  ;;  %v334_v60 = vld [vmem:[#allocation5 + $0x528] sm:$0xff] }
 0x10e   :  { %3524 = vmatprep.subr.bf16.mxu1 %v6727_v10  ;;  %v549_v10 = vld [vmem:[#allocation5 + $0xbe0] sm:$0xff]  ;;  %v7037_v12 = vcombine.high %v537_v1, %v541_v2  ;;  %v7036_v15 = vcombine.low %v537_v1, %v541_v2 }
 0x10f   :  { %3441 = vmatpush1.bf16.msra.mxu0 %v6972_v9  ;;  %v545_v9 = vld [vmem:[#allocation5 + $0xbc0] sm:$0xff] }
 0x110   :  { %3442 = vmatprep.subr.bf16.mxu0 %v6981_v14  ;;  %v6782_v14 = vcombine.low %v282_v3, %v286_v5  ;;  %v7045_v23 = vcombine.high %v545_v9, %v549_v10  ;;  %v7044_v25 = vcombine.low %v545_v9, %v549_v10  ;;  %v569_v37 = vld [vmem:[#allocation5 + $0xc80] sm:$0xff]  ;;  %v338_v3 = vld [vmem:[#allocation5 + $0x548] sm:$0xff] }
 0x111   :  { %3525 = vmatpush1.bf16.msra.mxu1 %v6726_v17  ;;  %v6791_v17 = vcombine.high %v290_v11, %v294_v13  ;;  %v573_v38 = vld [vmem:[#allocation5 + $0xca0] sm:$0xff]  ;;  %v342_v5 = vld [vmem:[#allocation5 + $0x568] sm:$0xff] }
 0x112   :  { %3526 = vmatprep.subr.bf16.mxu1 %v6735_v20  ;;  %v557_v20 = vld [vmem:[#allocation5 + $0xc20] sm:$0xff] }
 0x113   :  { %3443 = vmatpush1.bf16.msra.mxu0 %v6980_v18  ;;  %v553_v18 = vld [vmem:[#allocation5 + $0xc00] sm:$0xff] }
 0x114   :  { %3444 = vmatprep.subr.bf16.mxu0 %v6989_v53  ;;  %v6790_v53 = vcombine.low %v290_v11, %v294_v13  ;;  %v7053_v31 = vcombine.high %v553_v18, %v557_v20  ;;  %v577_v45 = vld [vmem:[#allocation5 + $0xcc0] sm:$0xff]  ;;  %v350_v13 = vld [vmem:[#allocation5 + $0x5a8] sm:$0xff] }
 0x115   :  { %3527 = vmatpush1.bf16.msra.mxu1 %v6734_v26  ;;  %v6799_v26 = vcombine.high %v298_v22, %v302_v24  ;;  %v581_v46 = vld [vmem:[#allocation5 + $0xce0] sm:$0xff]  ;;  %v354_v22 = vld [vmem:[#allocation5 + $0x5c8] sm:$0xff] }
 0x116   :  { %3528 = vmatprep.subr.bf16.mxu1 %v6743_v54  ;;  %v565_v54 = vld [vmem:[#allocation5 + $0xc60] sm:$0xff]  ;;  %v358_v24 = vld [vmem:[#allocation5 + $0x5e8] sm:$0xff] }
 0x117   :  { %3445 = vmatpush1.bf16.msra.mxu0 %v6988_v27  ;;  %v561_v27 = vld [vmem:[#allocation5 + $0xc40] sm:$0xff] }
 0x118   :  { %3446 = vmatprep.subr.bf16.mxu0 %v6997_v32  ;;  %v8620_v32 = vld [vmem:[%s8780_s1 + $0x18] sm:$0xff]  ;;  %v585_v55 = vld [vmem:[#allocation5 + $0xd00] sm:$0xff]  ;;  %s168_s1 = sld [smem:[#allocation2]] }
 0x119   :  { %3529 = vmatpush1.bf16.msra.mxu1 %v6742_v34  ;;  %v8624_v34 = vcombine.low %v8603_v19, %v8603_v19  ;;  %v6806_v19 = vcombine.low %v306_v29, %v310_v30  ;;  %v589_v56 = vld [vmem:[#allocation5 + $0xd20] sm:$0xff] }
 0x11a   :  { %3530 = vmatprep.subr.bf16.mxu1 %v6751_v36  ;;  %v6807_v36 = vcombine.high %v306_v29, %v310_v30  ;;  %v593_v1 = vld [vmem:[#allocation5 + $0xd40] sm:$0xff]  ;;  %v362_v29 = vld [vmem:[#allocation5 + $0x608] sm:$0xff] }
 0x11b   :  { %3447 = vmatpush1.bf16.msra.mxu0 %v6996_v35  ;;  %v7052_v35 = vcombine.low %v553_v18, %v557_v20  ;;  %v597_v2 = vld [vmem:[#allocation5 + $0xd60] sm:$0xff] }
 0x11c   :  { %3448 = vmatprep.subr.bf16.mxu0 %v7005_v40  ;;  %v7061_v40 = vcombine.high %v561_v27, %v565_v54  ;;  %v601_v9 = vld [vmem:[#allocation5 + $0xd80] sm:$0xff]  ;;  %v7093_v11 = vcombine.high %v593_v1, %v597_v2 }
 0x11d   :  { %3531 = vmatpush1.bf16.msra.mxu1 %v6750_v42  ;;  %v8628_v42 = vcombine.high %v8620_v32, %v8620_v32  ;;  %v605_v10 = vld [vmem:[#allocation5 + $0xda0] sm:$0xff] }
 0x11e   :  { %3532 = vmatprep.subr.bf16.mxu1 %v6759_v44  ;;  %v6815_v44 = vcombine.high %v314_v39, %v318_v41  ;;  %v609_v18 = vld [vmem:[#allocation5 + $0xdc0] sm:$0xff] }
 0x11f   :  { %3449 = vmatpush1.bf16.msra.mxu0 %v7004_v43  ;;  %v7060_v43 = vcombine.low %v561_v27, %v565_v54  ;;  %v613_v20 = vld [vmem:[#allocation5 + $0xde0] sm:$0xff] }
 0x120   :  { %3450 = vmatprep.subr.bf16.mxu0 %v7013_v48  ;;  %v7069_v48 = vcombine.high %v569_v37, %v573_v38  ;;  %v617_v27 = vld [vmem:[#allocation5 + $0xe00] sm:$0xff]  ;;  %v7109_v30 = vcombine.high %v609_v18, %v613_v20 }
 0x121   :  { %3533 = vmatpush1.bf16.msra.mxu1 %v6758_v50  ;;  %v6814_v50 = vcombine.low %v314_v39, %v318_v41  ;;  %v621_v54 = vld [vmem:[#allocation5 + $0xe20] sm:$0xff]  ;;  %v370_v39 = vld [vmem:[#allocation5 + $0x648] sm:$0xff] }
 0x122   :  { %3534 = vmatprep.subr.bf16.mxu1 %v6767_v52  ;;  %v6823_v52 = vcombine.high %v322_v47, %v326_v49  ;;  %v374_v41 = vld [vmem:[#allocation5 + $0x668] sm:$0xff] }
 0x123   :  { %3451 = vmatpush1.bf16.msra.mxu0 %v7012_v51  ;;  %v7068_v51 = vcombine.low %v569_v37, %v573_v38  ;;  %v625_v37 = vld [vmem:[#allocation5 + $0xe40] sm:$0xff] }
 0x124   :  { %3452 = vmatprep.subr.bf16.mxu0 %v7021_v59  ;;  %v7077_v59 = vcombine.high %v577_v45, %v581_v46  ;;  %v629_v38 = vld [vmem:[#allocation5 + $0xe60] sm:$0xff] }
 0x125   :  { %3535 = vmatpush1.bf16.msra.mxu1 %v6766_v62  ;;  %v6822_v62 = vcombine.low %v322_v47, %v326_v49  ;;  %v378_v47 = vld [vmem:[#allocation5 + $0x688] sm:$0xff] }
 0x126   :  { %3536 = vmatprep.subr.bf16.mxu1 %v6775_v0  ;;  %v6831_v0 = vcombine.high %v330_v57, %v334_v60  ;;  %v382_v49 = vld [vmem:[#allocation5 + $0x6a8] sm:$0xff] }
 0x127   :  { %3453 = vmatpush1.bf16.msra.mxu0 %v7020_v63  ;;  %v7076_v63 = vcombine.low %v577_v45, %v581_v46  ;;  %v633_v45 = vld [vmem:[#allocation5 + $0xe80] sm:$0xff] }
 0x128   :  { %3454 = vmatprep.subr.bf16.mxu0 %v7029_v4  ;;  %v7085_v4 = vcombine.high %v585_v55, %v589_v56  ;;  %v637_v46 = vld [vmem:[#allocation5 + $0xea0] sm:$0xff] }
 0x129   :  { %3537 = vmatpush1.bf16.msra.mxu1 %v6774_v6  ;;  %v6830_v6 = vcombine.low %v330_v57, %v334_v60  ;;  %v386_v57 = vld [vmem:[#allocation5 + $0x6c8] sm:$0xff] }
 0x12a   :  { %3538 = vmatprep.subr.bf16.mxu1 %v6783_v8  ;;  %v6839_v8 = vcombine.high %v338_v3, %v342_v5  ;;  %v390_v60 = vld [vmem:[#allocation5 + $0x6e8] sm:$0xff] }
 0x12b   :  { %3455 = vmatpush1.bf16.msra.mxu0 %v7028_v7  ;;  %v7084_v7 = vcombine.low %v585_v55, %v589_v56  ;;  %v641_v55 = vld [vmem:[#allocation5 + $0xec0] sm:$0xff] }
 0x12c   :  { %3456 = vmatprep.subr.bf16.mxu0 %v7037_v12  ;;  %v346_v12 = vld [vmem:[#allocation5 + $0x588] sm:$0xff]  ;;  %v645_v56 = vld [vmem:[#allocation5 + $0xee0] sm:$0xff] }
 0x12d   :  { %3539 = vmatpush1.bf16.msra.mxu1 %v6782_v14  ;;  %v6838_v14 = vcombine.low %v338_v3, %v342_v5  ;;  %v394_v3 = vld [vmem:[#allocation5 + $0x708] sm:$0xff] }
 0x12e   :  { %3540 = vmatprep.subr.bf16.mxu1 %v6791_v17  ;;  %v6847_v17 = vcombine.high %v346_v12, %v350_v13  ;;  %v398_v5 = vld [vmem:[#allocation5 + $0x728] sm:$0xff] }
 0x12f   :  { %3457 = vmatpush1.bf16.msra.mxu0 %v7036_v15  ;;  %v7092_v15 = vcombine.low %v593_v1, %v597_v2  ;;  %v649_v1 = vld [vmem:[#allocation5 + $0xf00] sm:$0xff] }
 0x130   :  { %3458 = vmatprep.subr.bf16.mxu0 %v7045_v23  ;;  %v7101_v23 = vcombine.high %v601_v9, %v605_v10  ;;  %v653_v2 = vld [vmem:[#allocation5 + $0xf20] sm:$0xff] }
 0x131   :  { %3541 = vmatpush1.bf16.msra.mxu1 %v6790_v53  ;;  %v6846_v53 = vcombine.low %v346_v12, %v350_v13  ;;  %v7149_v12 = vcombine.high %v649_v1, %v653_v2  ;;  %v406_v13 = vld [vmem:[#allocation5 + $0x768] sm:$0xff] }
 0x132   :  { %3551 = vmatprep.subr.bf16.mxu1 %v6799_v26  ;;  %v6855_v26 = vcombine.high %v354_v22, %v358_v24 }
 0x133   :  { %3459 = vmatpush1.bf16.msra.mxu0 %v7044_v25  ;;  %v7100_v25 = vcombine.low %v601_v9, %v605_v10  ;;  %v657_v9 = vld [vmem:[#allocation5 + $0xf40] sm:$0xff] }
 0x134   :  { %3469 = vmatprep.subr.bf16.mxu0 %v7053_v31  ;;  %3543 = vmatmul.mubr.bf16.vlgmr.msra.gmra.mrb[4].mxu1 %v8598_v16  ;;  %v366_v31 = vld [vmem:[#allocation5 + $0x628] sm:$0xff]  ;;  %v661_v10 = vld [vmem:[#allocation5 + $0xf60] sm:$0xff] }
 0x135   :  { %3552 = vmatpush1.bf16.msra.mxu1 %v6798_v33  ;;  %3583 = vmatprep.mubr.bf16.mxu1 %v8592_v61  ;;  %v6854_v33 = vcombine.low %v354_v22, %v358_v24  ;;  %v410_v22 = vld [vmem:[#allocation5 + $0x788] sm:$0xff] }
 0x136   :  { %3461 = vmatmul.mubr.bf16.vlgmr.msra.gmra.mrb[0].mxu0 %v8624_v34  ;;  %3553 = vmatprep.subr.bf16.mxu1 %v6807_v36  ;;  %v6863_v36 = vcombine.high %v362_v29, %v366_v31  ;;  %v414_v24 = vld [vmem:[#allocation5 + $0x7a8] sm:$0xff] }
 0x137   :  { %3470 = vmatpush1.bf16.msra.mxu0 %v7052_v35  ;;  %3501 = vmatprep.mubr.bf16.mxu0 %v8628_v42  ;;  %v7108_v35 = vcombine.low %v609_v18, %v613_v20  ;;  %v665_v18 = vld [vmem:[#allocation5 + $0xf80] sm:$0xff] }
 0x138   :  { %3471 = vmatprep.subr.bf16.mxu0 %v7061_v40  ;;  %v7117_v40 = vcombine.high %v617_v27, %v621_v54  ;;  %v669_v20 = vld [vmem:[#allocation5 + $0xfa0] sm:$0xff] }
 0x139   :  { %3554 = vmatpush1.bf16.msra.mxu1 %v6806_v19  ;;  %v6862_v19 = vcombine.low %v362_v29, %v366_v31  ;;  %v418_v29 = vld [vmem:[#allocation5 + $0x7c8] sm:$0xff] }
 0x13a   :  { %3555 = vmatprep.subr.bf16.mxu1 %v6815_v44  ;;  %v6871_v44 = vcombine.high %v370_v39, %v374_v41  ;;  %v422_v31 = vld [vmem:[#allocation5 + $0x7e8] sm:$0xff] }
 0x13b   :  { %3472 = vmatpush1.bf16.msra.mxu0 %v7060_v43  ;;  %v7116_v43 = vcombine.low %v617_v27, %v621_v54  ;;  %v673_v27 = vld [vmem:[#allocation5 + $0xfc0] sm:$0xff] }
 0x13c   :  { %3473 = vmatprep.subr.bf16.mxu0 %v7069_v48  ;;  %v7125_v48 = vcombine.high %v625_v37, %v629_v38  ;;  %v677_v54 = vld [vmem:[#allocation5 + $0xfe0] sm:$0xff] }
 0x13d   :  { %3556 = vmatpush1.bf16.msra.mxu1 %v6814_v50  ;;  %v6870_v50 = vcombine.low %v370_v39, %v374_v41  ;;  %v171_v39 = vld [vmem:[#allocation5 + $0x10] sm:$0xff] }
 0x13e   :  { %3557 = vmatprep.subr.bf16.mxu1 %v6823_v52  ;;  %v6879_v52 = vcombine.high %v378_v47, %v382_v49  ;;  %v175_v41 = vld [vmem:[#allocation5 + $0x30] sm:$0xff] }
 0x13f   :  { %3474 = vmatpush1.bf16.msra.mxu0 %v7068_v51  ;;  %v7124_v51 = vcombine.low %v625_v37, %v629_v38  ;;  %v426_v37 = vld [vmem:[#allocation5 + $0x808] sm:$0xff] }
 0x140   :  { %3475 = vmatprep.subr.bf16.mxu0 %v7077_v59  ;;  %v7133_v59 = vcombine.high %v633_v45, %v637_v46  ;;  %v430_v38 = vld [vmem:[#allocation5 + $0x828] sm:$0xff] }
 0x141   :  { %3558 = vmatpush1.bf16.msra.mxu1 %v6822_v62  ;;  %v6878_v62 = vcombine.low %v378_v47, %v382_v49  ;;  %v179_v47 = vld [vmem:[#allocation5 + $0x50] sm:$0xff] }
 0x142   :  { %3559 = vmatprep.subr.bf16.mxu1 %v6831_v0  ;;  %v6887_v0 = vcombine.high %v386_v57, %v390_v60  ;;  %v183_v49 = vld [vmem:[#allocation5 + $0x70] sm:$0xff] }
 0x143   :  { %3476 = vmatpush1.bf16.msra.mxu0 %v7076_v63  ;;  %v7132_v63 = vcombine.low %v633_v45, %v637_v46  ;;  %v434_v45 = vld [vmem:[#allocation5 + $0x848] sm:$0xff] }
 0x144   :  { %3477 = vmatprep.subr.bf16.mxu0 %v7085_v4  ;;  %v7141_v4 = vcombine.high %v641_v55, %v645_v56  ;;  %v438_v46 = vld [vmem:[#allocation5 + $0x868] sm:$0xff] }
 0x145   :  { %3560 = vmatpush1.bf16.msra.mxu1 %v6830_v6  ;;  %v6886_v6 = vcombine.low %v386_v57, %v390_v60  ;;  %v446_v57 = vld [vmem:[#allocation5 + $0x8a8] sm:$0xff]  ;;  %v6681_v60 = vcombine.high %v179_v47, %v183_v49 }
 0x146   :  { %3561 = vmatprep.subr.bf16.mxu1 %v6839_v8  ;;  %v6895_v8 = vcombine.high %v394_v3, %v398_v5 }
 0x147   :  { %3478 = vmatpush1.bf16.msra.mxu0 %v7084_v7  ;;  %v7140_v7 = vcombine.low %v641_v55, %v645_v56  ;;  %v6935_v55 = vcombine.high %v434_v45, %v438_v46  ;;  %v442_v56 = vld [vmem:[#allocation5 + $0x888] sm:$0xff] }
 0x148   :  { %3479 = vmatprep.subr.bf16.mxu0 %v7093_v11  ;;  %v402_v11 = vld [vmem:[#allocation5 + $0x748] sm:$0xff] }
 0x149   :  { %3562 = vmatpush1.bf16.msra.mxu1 %v6838_v14  ;;  %v6894_v14 = vcombine.low %v394_v3, %v398_v5  ;;  %v195_v3 = vld [vmem:[#allocation5 + $0xd0] sm:$0xff] }
 0x14a   :  { %3563 = vmatprep.subr.bf16.mxu1 %v6847_v17  ;;  %v6903_v17 = vcombine.high %v402_v11, %v406_v13  ;;  %v199_v5 = vld [vmem:[#allocation5 + $0xf0] sm:$0xff] }
 0x14b   :  { %3480 = vmatpush1.bf16.msra.mxu0 %v7092_v15  ;;  %v7148_v15 = vcombine.low %v649_v1, %v653_v2  ;;  %v450_v1 = vld [vmem:[#allocation5 + $0x8c8] sm:$0xff] }
 0x14c   :  { %3481 = vmatprep.subr.bf16.mxu0 %v7101_v23  ;;  %v7157_v23 = vcombine.high %v657_v9, %v661_v10  ;;  %v454_v2 = vld [vmem:[#allocation5 + $0x8e8] sm:$0xff] }
 0x14d   :  { %3564 = vmatpush1.bf16.msra.mxu1 %v6846_v53  ;;  %v6902_v53 = vcombine.low %v402_v11, %v406_v13  ;;  %v203_v11 = vld [vmem:[#allocation5 + $0x110] sm:$0xff] }
 0x14e   :  { %3565 = vmatprep.subr.bf16.mxu1 %v6855_v26  ;;  %v6911_v26 = vcombine.high %v410_v22, %v414_v24  ;;  %v207_v13 = vld [vmem:[#allocation5 + $0x130] sm:$0xff] }
 0x14f   :  { %3482 = vmatpush1.bf16.msra.mxu0 %v7100_v25  ;;  %v7156_v25 = vcombine.low %v657_v9, %v661_v10  ;;  %v458_v9 = vld [vmem:[#allocation5 + $0x908] sm:$0xff] }
 0x150   :  { %3483 = vmatprep.subr.bf16.mxu0 %v7109_v30  ;;  %v7165_v30 = vcombine.high %v665_v18, %v669_v20  ;;  %v462_v10 = vld [vmem:[#allocation5 + $0x928] sm:$0xff] }
 0x151   :  { %3566 = vmatpush1.bf16.msra.mxu1 %v6854_v33  ;;  %v6910_v33 = vcombine.low %v410_v22, %v414_v24  ;;  %v211_v22 = vld [vmem:[#allocation5 + $0x150] sm:$0xff] }
 0x152   :  { %3567 = vmatprep.subr.bf16.mxu1 %v6863_v36  ;;  %v6919_v36 = vcombine.high %v418_v29, %v422_v31  ;;  %v215_v24 = vld [vmem:[#allocation5 + $0x170] sm:$0xff] }
 0x153   :  { %3484 = vmatpush1.bf16.msra.mxu0 %v7108_v35  ;;  %v7164_v35 = vcombine.low %v665_v18, %v669_v20  ;;  %v466_v18 = vld [vmem:[#allocation5 + $0x948] sm:$0xff] }
 0x154   :  { %3485 = vmatprep.subr.bf16.mxu0 %v7117_v40  ;;  %v7173_v40 = vcombine.high %v673_v27, %v677_v54  ;;  %v470_v20 = vld [vmem:[#allocation5 + $0x968] sm:$0xff] }
 0x155   :  { %3568 = vmatpush1.bf16.msra.mxu1 %v6862_v19  ;;  %v6918_v19 = vcombine.low %v418_v29, %v422_v31  ;;  %v219_v29 = vld [vmem:[#allocation5 + $0x190] sm:$0xff] }
 0x156   :  { %3569 = vmatprep.subr.bf16.mxu1 %v6871_v44  ;;  %v6927_v44 = vcombine.high %v426_v37, %v430_v38  ;;  %v223_v31 = vld [vmem:[#allocation5 + $0x1b0] sm:$0xff] }
 0x157   :  { %3486 = vmatpush1.bf16.msra.mxu0 %v7116_v43  ;;  %v7172_v43 = vcombine.low %v673_v27, %v677_v54  ;;  %v474_v27 = vld [vmem:[#allocation5 + $0x988] sm:$0xff] }
 0x158   :  { %3487 = vmatprep.subr.bf16.mxu0 %v7125_v48  ;;  %v6673_v48 = vcombine.high %v171_v39, %v175_v41  ;;  %v478_v54 = vld [vmem:[#allocation5 + $0x9a8] sm:$0xff] }
 0x159   :  { %3570 = vmatpush1.bf16.msra.mxu1 %v6870_v50  ;;  %v8636_v50 = vcombine.low %v8620_v32, %v8620_v32  ;;  %v6680_v32 = vcombine.low %v179_v47, %v183_v49  ;;  %v235_v47 = vld [vmem:[#allocation5 + $0x210] sm:$0xff] }
 0x15a   :  { %3571 = vmatprep.subr.bf16.mxu1 %v6879_v52  ;;  %v6672_v52 = vcombine.low %v171_v39, %v175_v41  ;;  %v227_v39 = vld [vmem:[#allocation5 + $0x1d0] sm:$0xff] }
 0x15b   :  { %3488 = vmatpush1.bf16.msra.mxu0 %v7124_v51  ;;  %v6926_v51 = vcombine.low %v426_v37, %v430_v38  ;;  %v482_v37 = vld [vmem:[#allocation5 + $0x9c8] sm:$0xff]  ;;  %v231_v41 = vld [vmem:[#allocation5 + $0x1f0] sm:$0xff] }
 0x15c   :  { %3489 = vmatprep.subr.bf16.mxu0 %v7133_v59  ;;  %v187_v59 = vld [vmem:[#allocation5 + $0x90] sm:$0xff]  ;;  %v486_v38 = vld [vmem:[#allocation5 + $0x9e8] sm:$0xff] }
 0x15d   :  { %3572 = vmatpush1.bf16.msra.mxu1 %v6878_v62  ;;  %v191_v62 = vld [vmem:[#allocation5 + $0xb0] sm:$0xff] }
 0x15e   :  { %3573 = vmatprep.subr.bf16.mxu1 %v6887_v0  ;;  %v6943_v0 = vcombine.high %v442_v56, %v446_v57  ;;  %v239_v49 = vld [vmem:[#allocation5 + $0x230] sm:$0xff] }
 0x15f   :  { %3490 = vmatpush1.bf16.msra.mxu0 %v7132_v63  ;;  %v6934_v63 = vcombine.low %v434_v45, %v438_v46  ;;  %v490_v45 = vld [vmem:[#allocation5 + $0xa08] sm:$0xff] }
 0x160   :  { %3491 = vmatprep.subr.bf16.mxu0 %v7141_v4  ;;  %v6689_v4 = vcombine.high %v187_v59, %v191_v62  ;;  %v494_v46 = vld [vmem:[#allocation5 + $0xa28] sm:$0xff] }
 0x161   :  { %3574 = vmatpush1.bf16.msra.mxu1 %v6886_v6  ;;  %v6942_v6 = vcombine.low %v442_v56, %v446_v57  ;;  %v498_v56 = vld [vmem:[#allocation5 + $0xa48] sm:$0xff] }
 0x162   :  { %3575 = vmatprep.subr.bf16.mxu1 %v6895_v8  ;;  %v6951_v8 = vcombine.high %v450_v1, %v454_v2  ;;  %v502_v57 = vld [vmem:[#allocation5 + $0xa68] sm:$0xff] }
 0x163   :  { %3492 = vmatpush1.bf16.msra.mxu0 %v7140_v7  ;;  %v6688_v7 = vcombine.low %v187_v59, %v191_v62  ;;  %v243_v59 = vld [vmem:[#allocation5 + $0x250] sm:$0xff] }
 0x164   :  { %3493 = vmatprep.subr.bf16.mxu0 %v7149_v12  ;;  %v6697_v12 = vcombine.high %v195_v3, %v199_v5  ;;  %v247_v62 = vld [vmem:[#allocation5 + $0x270] sm:$0xff] }
 0x165   :  { %3576 = vmatpush1.bf16.msra.mxu1 %v6894_v14  ;;  %v6950_v14 = vcombine.low %v450_v1, %v454_v2  ;;  %v506_v1 = vld [vmem:[#allocation5 + $0xa88] sm:$0xff] }
 0x166   :  { %3577 = vmatprep.subr.bf16.mxu1 %v6903_v17  ;;  %v6959_v17 = vcombine.high %v458_v9, %v462_v10  ;;  %v510_v2 = vld [vmem:[#allocation5 + $0xaa8] sm:$0xff] }
 0x167   :  { %3494 = vmatpush1.bf16.msra.mxu0 %v7148_v15  ;;  %v6696_v15 = vcombine.low %v195_v3, %v199_v5  ;;  %v251_v3 = vld [vmem:[#allocation5 + $0x290] sm:$0xff] }
 0x168   :  { %3495 = vmatprep.subr.bf16.mxu0 %v7157_v23  ;;  %v6705_v23 = vcombine.high %v203_v11, %v207_v13  ;;  %v255_v5 = vld [vmem:[#allocation5 + $0x2b0] sm:$0xff] }
 0x169   :  { %3578 = vmatpush1.bf16.msra.mxu1 %v6902_v53  ;;  %v6958_v53 = vcombine.low %v458_v9, %v462_v10  ;;  %v514_v9 = vld [vmem:[#allocation5 + $0xac8] sm:$0xff] }
 0x16a   :  { %3579 = vmatprep.subr.bf16.mxu1 %v6911_v26  ;;  %v6967_v26 = vcombine.high %v466_v18, %v470_v20  ;;  %v518_v10 = vld [vmem:[#allocation5 + $0xae8] sm:$0xff] }
 0x16b   :  { %3496 = vmatpush1.bf16.msra.mxu0 %v7156_v25  ;;  %v6704_v25 = vcombine.low %v203_v11, %v207_v13  ;;  %v259_v11 = vld [vmem:[#allocation5 + $0x2d0] sm:$0xff] }
 0x16c   :  { %3497 = vmatprep.subr.bf16.mxu0 %v7165_v30  ;;  %v6713_v30 = vcombine.high %v211_v22, %v215_v24  ;;  %v263_v13 = vld [vmem:[#allocation5 + $0x2f0] sm:$0xff] }
 0x16d   :  { %3580 = vmatpush1.bf16.msra.mxu1 %v6910_v33  ;;  %v6966_v33 = vcombine.low %v466_v18, %v470_v20  ;;  %v522_v18 = vld [vmem:[#allocation5 + $0xb08] sm:$0xff] }
 0x16e   :  { %3581 = vmatprep.subr.bf16.mxu1 %v6919_v36  ;;  %v6975_v36 = vcombine.high %v474_v27, %v478_v54  ;;  %v526_v20 = vld [vmem:[#allocation5 + $0xb28] sm:$0xff] }
 0x16f   :  { %3498 = vmatpush1.bf16.msra.mxu0 %v7164_v35  ;;  %v6712_v35 = vcombine.low %v211_v22, %v215_v24  ;;  %v267_v22 = vld [vmem:[#allocation5 + $0x310] sm:$0xff] }
 0x170   :  { %3499 = vmatprep.subr.bf16.mxu0 %v7173_v40  ;;  %v6721_v40 = vcombine.high %v219_v29, %v223_v31  ;;  %v271_v24 = vld [vmem:[#allocation5 + $0x330] sm:$0xff] }
 0x171   :  { %3582 = vmatpush1.bf16.msra.mxu1 %v6918_v19  ;;  %v6974_v19 = vcombine.low %v474_v27, %v478_v54  ;;  %v530_v27 = vld [vmem:[#allocation5 + $0xb48] sm:$0xff] }
 0x172   :  { %3592 = vmatprep.subr.bf16.mxu1 %v6927_v44  ;;  %v6983_v44 = vcombine.high %v482_v37, %v486_v38  ;;  %v534_v54 = vld [vmem:[#allocation5 + $0xb68] sm:$0xff] }
 0x173   :  { %3500 = vmatpush1.bf16.msra.mxu0 %v7172_v43  ;;  %v6720_v43 = vcombine.low %v219_v29, %v223_v31  ;;  %v275_v29 = vld [vmem:[#allocation5 + $0x350] sm:$0xff] }
 0x174   :  { %3674 = vmatprep.subr.bf16.mxu0 %v6673_v48  ;;  %3584 = vmatmul.mubr.bf16.vlgmr.msra.gmra.mrb[4].mxu1 %v8607_v21  ;;  %v6729_v48 = vcombine.high %v227_v39, %v231_v41  ;;  %v279_v31 = vld [vmem:[#allocation5 + $0x370] sm:$0xff] }
 0x175   :  { %3593 = vmatpush1.bf16.msra.mxu1 %v6926_v51  ;;  %3624 = vmatprep.mubr.bf16.mxu1 %v8611_v28  ;;  %v6982_v51 = vcombine.low %v482_v37, %v486_v38  ;;  %v538_v37 = vld [vmem:[#allocation5 + $0xb88] sm:$0xff]  ;;  %v6777_v38 = vcombine.high %v275_v29, %v279_v31 }
 0x176   :  { %3502 = vmatmul.mubr.bf16.vlgmr.msra.gmra.mrb[0].mxu0 %v8636_v50  ;;  %3594 = vmatprep.subr.bf16.mxu1 %v6935_v55  ;;  %v6991_v55 = vcombine.high %v490_v45, %v494_v46 }
 0x177   :  { %3675 = vmatpush1.bf16.msra.mxu0 %v6672_v52  ;;  %3706 = vmatprep.mubr.bf16.mxu0 %v8588_v58  ;;  %v6728_v52 = vcombine.low %v227_v39, %v231_v41  ;;  %v542_v39 = vld [vmem:[#allocation5 + $0xba8] sm:$0xff]  ;;  %v287_v41 = vld [vmem:[#allocation5 + $0x3b0] sm:$0xff] }
 0x178   :  { %3676 = vmatprep.subr.bf16.mxu0 %v6681_v60  ;;  %v6737_v60 = vcombine.high %v235_v47, %v239_v49 }
 0x179   :  { %3595 = vmatpush1.bf16.msra.mxu1 %v6934_v63  ;;  %v6990_v63 = vcombine.low %v490_v45, %v494_v46  ;;  %v546_v46 = vld [vmem:[#allocation5 + $0xbc8] sm:$0xff] }
 0x17a   :  { %3596 = vmatprep.subr.bf16.mxu1 %v6943_v0  ;;  %v6999_v0 = vcombine.high %v498_v56, %v502_v57 }
 0x17b   :  { %3677 = vmatpush1.bf16.msra.mxu0 %v6680_v32  ;;  %v6736_v32 = vcombine.low %v235_v47, %v239_v49  ;;  %v550_v47 = vld [vmem:[#allocation5 + $0xbe8] sm:$0xff]  ;;  %v295_v49 = vld [vmem:[#allocation5 + $0x3f0] sm:$0xff] }
 0x17c   :  { %3678 = vmatprep.subr.bf16.mxu0 %v6689_v4  ;;  %v6745_v4 = vcombine.high %v243_v59, %v247_v62 }
 0x17d   :  { %3597 = vmatpush1.bf16.msra.mxu1 %v6942_v6  ;;  %v6998_v6 = vcombine.low %v498_v56, %v502_v57  ;;  %v554_v57 = vld [vmem:[#allocation5 + $0xc08] sm:$0xff] }
 0x17e   :  { %3598 = vmatprep.subr.bf16.mxu1 %v6951_v8  ;;  %v7007_v8 = vcombine.high %v506_v1, %v510_v2 }
 0x17f   :  { %3679 = vmatpush1.bf16.msra.mxu0 %v6688_v7  ;;  %v6744_v7 = vcombine.low %v243_v59, %v247_v62  ;;  %v558_v59 = vld [vmem:[#allocation5 + $0xc28] sm:$0xff]  ;;  %v303_v62 = vld [vmem:[#allocation5 + $0x430] sm:$0xff] }
 0x180   :  { %3680 = vmatprep.subr.bf16.mxu0 %v6697_v12  ;;  %v6753_v12 = vcombine.high %v251_v3, %v255_v5 }
 0x181   :  { %3599 = vmatpush1.bf16.msra.mxu1 %v6950_v14  ;;  %v7006_v14 = vcombine.low %v506_v1, %v510_v2  ;;  %v562_v2 = vld [vmem:[#allocation5 + $0xc48] sm:$0xff] }
 0x182   :  { %3600 = vmatprep.subr.bf16.mxu1 %v6959_v17  ;;  %v7015_v17 = vcombine.high %v514_v9, %v518_v10 }
 0x183   :  { %3681 = vmatpush1.bf16.msra.mxu0 %v6696_v15  ;;  %v6752_v15 = vcombine.low %v251_v3, %v255_v5  ;;  %v566_v3 = vld [vmem:[#allocation5 + $0xc68] sm:$0xff]  ;;  %v311_v5 = vld [vmem:[#allocation5 + $0x470] sm:$0xff] }
 0x184   :  { %3682 = vmatprep.subr.bf16.mxu0 %v6705_v23  ;;  %v6761_v23 = vcombine.high %v259_v11, %v263_v13 }
 0x185   :  { %3601 = vmatpush1.bf16.msra.mxu1 %v6958_v53  ;;  %v7014_v53 = vcombine.low %v514_v9, %v518_v10  ;;  %v570_v10 = vld [vmem:[#allocation5 + $0xc88] sm:$0xff] }
 0x186   :  { %3602 = vmatprep.subr.bf16.mxu1 %v6967_v26  ;;  %v7023_v26 = vcombine.high %v522_v18, %v526_v20 }
 0x187   :  { %3683 = vmatpush1.bf16.msra.mxu0 %v6704_v25  ;;  %v6760_v25 = vcombine.low %v259_v11, %v263_v13  ;;  %v574_v11 = vld [vmem:[#allocation5 + $0xca8] sm:$0xff]  ;;  %v319_v13 = vld [vmem:[#allocation5 + $0x4b0] sm:$0xff] }
 0x188   :  { %3684 = vmatprep.subr.bf16.mxu0 %v6713_v30  ;;  %v6769_v30 = vcombine.high %v267_v22, %v271_v24 }
 0x189   :  { %3603 = vmatpush1.bf16.msra.mxu1 %v6966_v33  ;;  %v7022_v33 = vcombine.low %v522_v18, %v526_v20  ;;  %v578_v20 = vld [vmem:[#allocation5 + $0xcc8] sm:$0xff] }
 0x18a   :  { %3604 = vmatprep.subr.bf16.mxu1 %v6975_v36  ;;  %v7031_v36 = vcombine.high %v530_v27, %v534_v54 }
 0x18b   :  { %3685 = vmatpush1.bf16.msra.mxu0 %v6712_v35  ;;  %v6768_v35 = vcombine.low %v267_v22, %v271_v24  ;;  %v582_v22 = vld [vmem:[#allocation5 + $0xce8] sm:$0xff]  ;;  %v327_v24 = vld [vmem:[#allocation5 + $0x4f0] sm:$0xff] }
 0x18c   :  { %3686 = vmatprep.subr.bf16.mxu0 %v6721_v40  ;;  %v283_v40 = vld [vmem:[#allocation5 + $0x390] sm:$0xff] }
 0x18d   :  { %3605 = vmatpush1.bf16.msra.mxu1 %v6974_v19  ;;  %v7030_v19 = vcombine.low %v530_v27, %v534_v54  ;;  %v6785_v45 = vcombine.high %v283_v40, %v287_v41  ;;  %v586_v54 = vld [vmem:[#allocation5 + $0xd08] sm:$0xff] }
 0x18e   :  { %3606 = vmatprep.subr.bf16.mxu1 %v6983_v44  ;;  %v7039_v44 = vcombine.high %v538_v37, %v542_v39 }
 0x18f   :  { %3687 = vmatpush1.bf16.msra.mxu0 %v6720_v43  ;;  %v6776_v43 = vcombine.low %v275_v29, %v279_v31  ;;  %v590_v29 = vld [vmem:[#allocation5 + $0xd28] sm:$0xff]  ;;  %v335_v31 = vld [vmem:[#allocation5 + $0x530] sm:$0xff] }
 0x190   :  { %3688 = vmatprep.subr.bf16.mxu0 %v6729_v48  ;;  %v291_v48 = vld [vmem:[#allocation5 + $0x3d0] sm:$0xff] }
 0x191   :  { %3607 = vmatpush1.bf16.msra.mxu1 %v6982_v51  ;;  %v7038_v51 = vcombine.low %v538_v37, %v542_v39  ;;  %v6793_v56 = vcombine.high %v291_v48, %v295_v49  ;;  %v598_v39 = vld [vmem:[#allocation5 + $0xd68] sm:$0xff] }
 0x192   :  { %3608 = vmatprep.subr.bf16.mxu1 %v6991_v55  ;;  %v7047_v55 = vcombine.high %v546_v46, %v550_v47 }
 0x193   :  { %3689 = vmatpush1.bf16.msra.mxu0 %v6728_v52  ;;  %v6784_v52 = vcombine.low %v283_v40, %v287_v41  ;;  %v339_v40 = vld [vmem:[#allocation5 + $0x550] sm:$0xff] }
 0x194   :  { %3690 = vmatprep.subr.bf16.mxu0 %v6737_v60  ;;  %v299_v60 = vld [vmem:[#allocation5 + $0x410] sm:$0xff] }
 0x195   :  { %3609 = vmatpush1.bf16.msra.mxu1 %v6990_v63  ;;  %v7046_v63 = vcombine.low %v546_v46, %v550_v47  ;;  %v6801_v1 = vcombine.high %v299_v60, %v303_v62  ;;  %v343_v41 = vld [vmem:[#allocation5 + $0x570] sm:$0xff]  ;;  %v602_v46 = vld [vmem:[#allocation5 + $0xd88] sm:$0xff] }
 0x196   :  { %3610 = vmatprep.subr.bf16.mxu1 %v6999_v0  ;;  %v7055_v0 = vcombine.high %v554_v57, %v558_v59  ;;  %v606_v47 = vld [vmem:[#allocation5 + $0xda8] sm:$0xff] }
 0x197   :  { %3691 = vmatpush1.bf16.msra.mxu0 %v6736_v32  ;;  %v6792_v32 = vcombine.low %v291_v48, %v295_v49  ;;  %v347_v48 = vld [vmem:[#allocation5 + $0x590] sm:$0xff] }
 0x198   :  { %3692 = vmatprep.subr.bf16.mxu0 %v6745_v4  ;;  %v307_v4 = vld [vmem:[#allocation5 + $0x450] sm:$0xff] }
 0x199   :  { %3611 = vmatpush1.bf16.msra.mxu1 %v6998_v6  ;;  %v7054_v6 = vcombine.low %v554_v57, %v558_v59  ;;  %v6809_v9 = vcombine.high %v307_v4, %v311_v5  ;;  %v351_v49 = vld [vmem:[#allocation5 + $0x5b0] sm:$0xff]  ;;  %v610_v59 = vld [vmem:[#allocation5 + $0xdc8] sm:$0xff] }
 0x19a   :  { %3612 = vmatprep.subr.bf16.mxu1 %v7007_v8  ;;  %v7063_v8 = vcombine.high %v562_v2, %v566_v3  ;;  %v6849_v57 = vcombine.high %v347_v48, %v351_v49 }
 0x19b   :  { %3693 = vmatpush1.bf16.msra.mxu0 %v6744_v7  ;;  %v6800_v7 = vcombine.low %v299_v60, %v303_v62  ;;  %v614_v60 = vld [vmem:[#allocation5 + $0xde8] sm:$0xff] }
 0x19c   :  { %3694 = vmatprep.subr.bf16.mxu0 %v6753_v12  ;;  %v315_v12 = vld [vmem:[#allocation5 + $0x490] sm:$0xff] }
 0x19d   :  { %3613 = vmatpush1.bf16.msra.mxu1 %v7006_v14  ;;  %v7062_v14 = vcombine.low %v562_v2, %v566_v3  ;;  %v6817_v18 = vcombine.high %v315_v12, %v319_v13  ;;  %v6848_v3 = vcombine.low %v347_v48, %v351_v49 }
 0x19e   :  { %3614 = vmatprep.subr.bf16.mxu1 %v7015_v17  ;;  %v7071_v17 = vcombine.high %v570_v10, %v574_v11 }
 0x19f   :  { %3695 = vmatpush1.bf16.msra.mxu0 %v6752_v15  ;;  %v6808_v15 = vcombine.low %v307_v4, %v311_v5  ;;  %v7111_v4 = vcombine.high %v610_v59, %v614_v60 }
 0x1a0   :  { %3696 = vmatprep.subr.bf16.mxu0 %v6761_v23  ;;  %v323_v23 = vld [vmem:[#allocation5 + $0x4d0] sm:$0xff] }
 0x1a1   :  { %3615 = vmatpush1.bf16.msra.mxu1 %v7014_v53  ;;  %v7070_v53 = vcombine.low %v570_v10, %v574_v11  ;;  %v6825_v27 = vcombine.high %v323_v23, %v327_v24  ;;  %v7110_v10 = vcombine.low %v610_v59, %v614_v60 }
 0x1a2   :  { %3616 = vmatprep.subr.bf16.mxu1 %v7023_v26  ;;  %v7079_v26 = vcombine.high %v578_v20, %v582_v22 }
 0x1a3   :  { %3697 = vmatpush1.bf16.msra.mxu0 %v6760_v25  ;;  %v6816_v25 = vcombine.low %v315_v12, %v319_v13 }
 0x1a4   :  { %3698 = vmatprep.subr.bf16.mxu0 %v6769_v30  ;;  %v331_v30 = vld [vmem:[#allocation5 + $0x510] sm:$0xff] }
 0x1a5   :  { %3617 = vmatpush1.bf16.msra.mxu1 %v7022_v33  ;;  %v7078_v33 = vcombine.low %v578_v20, %v582_v22  ;;  %v6833_v37 = vcombine.high %v331_v30, %v335_v31 }
 0x1a6   :  { %3618 = vmatprep.subr.bf16.mxu1 %v7031_v36  ;;  %v7087_v36 = vcombine.high %v586_v54, %v590_v29 }
 0x1a7   :  { %3699 = vmatpush1.bf16.msra.mxu0 %v6768_v35  ;;  %v6824_v35 = vcombine.low %v323_v23, %v327_v24 }
 0x1a8   :  { %3700 = vmatprep.subr.bf16.mxu0 %v6777_v38  ;;  %v594_v38 = vld [vmem:[#allocation5 + $0xd48] sm:$0xff] }
 0x1a9   :  { %3619 = vmatpush1.bf16.msra.mxu1 %v7030_v19  ;;  %v7086_v19 = vcombine.low %v586_v54, %v590_v29 }
 0x1aa   :  { %3620 = vmatprep.subr.bf16.mxu1 %v7039_v44  ;;  %v7095_v44 = vcombine.high %v594_v38, %v598_v39 }
 0x1ab   :  { %3701 = vmatpush1.bf16.msra.mxu0 %v6776_v43  ;;  %v6832_v43 = vcombine.low %v331_v30, %v335_v31 }
 0x1ac   :  { %3702 = vmatprep.subr.bf16.mxu0 %v6785_v45  ;;  %v6841_v45 = vcombine.high %v339_v40, %v343_v41 }
 0x1ad   :  { %3621 = vmatpush1.bf16.msra.mxu1 %v7038_v51  ;;  %v7094_v51 = vcombine.low %v594_v38, %v598_v39 }
 0x1ae   :  { %3622 = vmatprep.subr.bf16.mxu1 %v7047_v55  ;;  %v7103_v55 = vcombine.high %v602_v46, %v606_v47 }
 0x1af   :  { %3703 = vmatpush1.bf16.msra.mxu0 %v6784_v52  ;;  %v6840_v52 = vcombine.low %v339_v40, %v343_v41 }
 0x1b0   :  { %3704 = vmatprep.subr.bf16.mxu0 %v6793_v56 }
 0x1b1   :  { %3623 = vmatpush1.bf16.msra.mxu1 %v7046_v63  ;;  %v355_v63 = vld [vmem:[#allocation5 + $0x5d0] sm:$0xff] }
 0x1b2   :  { %3633 = vmatprep.subr.bf16.mxu1 %v7055_v0 }
 0x1b3   :  { %3705 = vmatpush1.bf16.msra.mxu0 %v6792_v32  ;;  %v359_v32 = vld [vmem:[#allocation5 + $0x5f0] sm:$0xff] }
 0x1b4   :  { %3715 = vmatprep.subr.bf16.mxu0 %v6801_v1  ;;  %3625 = vmatmul.mubr.bf16.vlgmr.msra.gmra.mrb[4].mxu1 %v8624_v34  ;;  %v7102_v1 = vcombine.low %v602_v46, %v606_v47  ;;  %v6857_v5 = vcombine.high %v355_v63, %v359_v32  ;;  %v6856_v11 = vcombine.low %v355_v63, %v359_v32 }
 0x1b5   :  { %3634 = vmatpush1.bf16.msra.mxu1 %v7054_v6  ;;  %3665 = vmatprep.mubr.bf16.mxu1 %v8628_v42  ;;  %v618_v6 = vld [vmem:[#allocation5 + $0xe08] sm:$0xff] }
 0x1b6   :  { %3707 = vmatmul.mubr.bf16.vlgmr.msra.gmra.mrb[4].mxu0 %v8598_v16  ;;  %3635 = vmatprep.subr.bf16.mxu1 %v7063_v8  ;;  %v363_v8 = vld [vmem:[#allocation5 + $0x610] sm:$0xff] }
 0x1b7   :  { %3716 = vmatpush1.bf16.msra.mxu0 %v6800_v7  ;;  %3747 = vmatprep.mubr.bf16.mxu0 %v8592_v61  ;;  %v622_v7 = vld [vmem:[#allocation5 + $0xe28] sm:$0xff] }
 0x1b8   :  { %3717 = vmatprep.subr.bf16.mxu0 %v6809_v9  ;;  %v367_v9 = vld [vmem:[#allocation5 + $0x630] sm:$0xff]  ;;  %v7119_v12 = vcombine.high %v618_v6, %v622_v7  ;;  %v7118_v20 = vcombine.low %v618_v6, %v622_v7 }
 0x1b9   :  { %3636 = vmatpush1.bf16.msra.mxu1 %v7062_v14  ;;  %v6865_v13 = vcombine.high %v363_v8, %v367_v9  ;;  %v626_v14 = vld [vmem:[#allocation5 + $0xe48] sm:$0xff]  ;;  %v6864_v22 = vcombine.low %v363_v8, %v367_v9 }
 0x1ba   :  { %3637 = vmatprep.subr.bf16.mxu1 %v7071_v17  ;;  %v371_v17 = vld [vmem:[#allocation5 + $0x650] sm:$0xff]  ;;  %v674_v8 = vld [vmem:[#allocation5 + $0xfc8] sm:$0xff] }
 0x1bb   :  { %3718 = vmatpush1.bf16.msra.mxu0 %v6808_v15  ;;  %v630_v15 = vld [vmem:[#allocation5 + $0xe68] sm:$0xff] }
 0x1bc   :  { %3719 = vmatprep.subr.bf16.mxu0 %v6817_v18  ;;  %v375_v18 = vld [vmem:[#allocation5 + $0x670] sm:$0xff]  ;;  %v7127_v23 = vcombine.high %v626_v14, %v630_v15  ;;  %v7126_v54 = vcombine.low %v626_v14, %v630_v15  ;;  %v678_v9 = vld [vmem:[#allocation5 + $0xfe8] sm:$0xff] }
 0x1bd   :  { %3638 = vmatpush1.bf16.msra.mxu1 %v7070_v53  ;;  %v6873_v24 = vcombine.high %v371_v17, %v375_v18  ;;  %v634_v53 = vld [vmem:[#allocation5 + $0xe88] sm:$0xff]  ;;  %v6872_v29 = vcombine.low %v371_v17, %v375_v18  ;;  %v7175_v14 = vcombine.high %v674_v8, %v678_v9  ;;  %v172_v17 = vld [vmem:[#allocation5 + $0x18] sm:$0xff] }
 0x1be   :  { %3639 = vmatprep.subr.bf16.mxu1 %v7079_v26  ;;  %v379_v26 = vld [vmem:[#allocation5 + $0x690] sm:$0xff]  ;;  %v176_v18 = vld [vmem:[#allocation5 + $0x38] sm:$0xff] }
 0x1bf   :  { %3720 = vmatpush1.bf16.msra.mxu0 %v6816_v25  ;;  %v638_v25 = vld [vmem:[#allocation5 + $0xea8] sm:$0xff] }
 0x1c0   :  { %3721 = vmatprep.subr.bf16.mxu0 %v6825_v27  ;;  %v383_v27 = vld [vmem:[#allocation5 + $0x6b0] sm:$0xff]  ;;  %v7135_v30 = vcombine.high %v634_v53, %v638_v25  ;;  %v7134_v38 = vcombine.low %v634_v53, %v638_v25  ;;  %v6675_v53 = vcombine.high %v172_v17, %v176_v18 }
 0x1c1   :  { %3640 = vmatpush1.bf16.msra.mxu1 %v7078_v33  ;;  %v6881_v31 = vcombine.high %v379_v26, %v383_v27  ;;  %v642_v33 = vld [vmem:[#allocation5 + $0xec8] sm:$0xff]  ;;  %v6880_v39 = vcombine.low %v379_v26, %v383_v27  ;;  %v180_v26 = vld [vmem:[#allocation5 + $0x58] sm:$0xff] }
 0x1c2   :  { %3641 = vmatprep.subr.bf16.mxu1 %v7087_v36  ;;  %v387_v36 = vld [vmem:[#allocation5 + $0x6d0] sm:$0xff]  ;;  %v184_v27 = vld [vmem:[#allocation5 + $0x78] sm:$0xff] }
 0x1c3   :  { %3722 = vmatpush1.bf16.msra.mxu0 %v6824_v35  ;;  %v646_v35 = vld [vmem:[#allocation5 + $0xee8] sm:$0xff] }
 0x1c4   :  { %3723 = vmatprep.subr.bf16.mxu0 %v6833_v37  ;;  %v391_v37 = vld [vmem:[#allocation5 + $0x6f0] sm:$0xff]  ;;  %v7143_v40 = vcombine.high %v642_v33, %v646_v35  ;;  %v7142_v46 = vcombine.low %v642_v33, %v646_v35  ;;  %v6683_v33 = vcombine.high %v180_v26, %v184_v27 }
 0x1c5   :  { %3642 = vmatpush1.bf16.msra.mxu1 %v7086_v19  ;;  %v6889_v41 = vcombine.high %v387_v36, %v391_v37  ;;  %v650_v19 = vld [vmem:[#allocation5 + $0xf08] sm:$0xff]  ;;  %v6888_v47 = vcombine.low %v387_v36, %v391_v37  ;;  %v188_v36 = vld [vmem:[#allocation5 + $0x98] sm:$0xff] }
 0x1c6   :  { %3643 = vmatprep.subr.bf16.mxu1 %v7095_v44  ;;  %v395_v44 = vld [vmem:[#allocation5 + $0x710] sm:$0xff]  ;;  %v192_v37 = vld [vmem:[#allocation5 + $0xb8] sm:$0xff] }
 0x1c7   :  { %3724 = vmatpush1.bf16.msra.mxu0 %v6832_v43  ;;  %v8646_v56 = vpop.f32.mrb[0].mxu1  ;;  %v654_v43 = vld [vmem:[#allocation5 + $0xf28] sm:$0xff] }
 0x1c8   :  { %3725 = vmatprep.subr.bf16.mxu0 %v6841_v45  ;;  %v8648_v62 = vpop.f32.mrb[1].mxu1  ;;  %v399_v45 = vld [vmem:[#allocation5 + $0x730] sm:$0xff]  ;;  %v7151_v48 = vcombine.high %v650_v19, %v654_v43  ;;  %v7150_v59 = vcombine.low %v650_v19, %v654_v43  ;;  %v6691_v19 = vcombine.high %v188_v36, %v192_v37 }
 0x1c9   :  { %v3384_v0 = vpop.f32.mrb[2].mxu1  ;;  %3644 = vmatpush1.bf16.msra.mxu1 %v7094_v51  ;;  %v6897_v49 = vcombine.high %v395_v44, %v399_v45  ;;  %v658_v51 = vld [vmem:[#allocation5 + $0xf48] sm:$0xff]  ;;  %v6896_v60 = vcombine.low %v395_v44, %v399_v45  ;;  %v196_v44 = vld [vmem:[#allocation5 + $0xd8] sm:$0xff] }
 0x1ca   :  { %v3385_v2 = vpop.f32.mrb[3].mxu1  ;;  %3645 = vmatprep.subr.bf16.mxu1 %v7103_v55  ;;  %v403_v55 = vld [vmem:[#allocation5 + $0x750] sm:$0xff]  ;;  %v666_v0 = vld [vmem:[#allocation5 + $0xf88] sm:$0xff]  ;;  %v200_v45 = vld [vmem:[#allocation5 + $0xf8] sm:$0xff] }
 0x1cb   :  { %3726 = vmatpush1.bf16.msra.mxu0 %v6840_v52  ;;  %v662_v52 = vld [vmem:[#allocation5 + $0xf68] sm:$0xff]  ;;  %v411_v2 = vld [vmem:[#allocation5 + $0x790] sm:$0xff] }
 0x1cc   :  { %3727 = vmatprep.subr.bf16.mxu0 %v6849_v57  ;;  %v407_v57 = vld [vmem:[#allocation5 + $0x770] sm:$0xff]  ;;  %v7159_v63 = vcombine.high %v658_v51, %v662_v52 }
 0x1cd   :  { %3646 = vmatpush1.bf16.msra.mxu1 %v7102_v1  ;;  %v6905_v32 = vcombine.high %v403_v55, %v407_v57  ;;  %v670_v1 = vld [vmem:[#allocation5 + $0xfa8] sm:$0xff] }
 0x1ce   :  { %3647 = vmatprep.subr.bf16.mxu1 %v7111_v4  ;;  %v7158_v4 = vcombine.low %v658_v51, %v662_v52  ;;  %v7167_v6 = vcombine.high %v666_v0, %v670_v1  ;;  %v6699_v51 = vcombine.high %v196_v44, %v200_v45 }
 0x1cf   :  { %3728 = vmatpush1.bf16.msra.mxu0 %v6848_v3  ;;  %v415_v3 = vld [vmem:[#allocation5 + $0x7b0] sm:$0xff] }
 0x1d0   :  { %3729 = vmatprep.subr.bf16.mxu0 %v6857_v5  ;;  %v6904_v5 = vcombine.low %v403_v55, %v407_v57  ;;  %v6913_v7 = vcombine.high %v411_v2, %v415_v3  ;;  %v204_v55 = vld [vmem:[#allocation5 + $0x118] sm:$0xff] }
 0x1d1   :  { %3648 = vmatpush1.bf16.msra.mxu1 %v7110_v10  ;;  %v419_v10 = vld [vmem:[#allocation5 + $0x7d0] sm:$0xff]  ;;  %v208_v57 = vld [vmem:[#allocation5 + $0x138] sm:$0xff] }
 0x1d2   :  { %3649 = vmatprep.subr.bf16.mxu1 %v7119_v12  ;;  %v7166_v12 = vcombine.low %v666_v0, %v670_v1  ;;  %v6707_v0 = vcombine.high %v204_v55, %v208_v57  ;;  %v212_v1 = vld [vmem:[#allocation5 + $0x158] sm:$0xff] }
 0x1d3   :  { %3730 = vmatpush1.bf16.msra.mxu0 %v6856_v11  ;;  %v423_v11 = vld [vmem:[#allocation5 + $0x7f0] sm:$0xff] }
 0x1d4   :  { %3731 = vmatprep.subr.bf16.mxu0 %v6865_v13  ;;  %v6912_v13 = vcombine.low %v411_v2, %v415_v3  ;;  %v6921_v15 = vcombine.high %v419_v10, %v423_v11  ;;  %v216_v2 = vld [vmem:[#allocation5 + $0x178] sm:$0xff]  ;;  %v467_v3 = vld [vmem:[#allocation5 + $0x950] sm:$0xff] }
 0x1d5   :  { %3650 = vmatpush1.bf16.msra.mxu1 %v7118_v20  ;;  %v427_v20 = vld [vmem:[#allocation5 + $0x810] sm:$0xff] }
 0x1d6   :  { %3651 = vmatprep.subr.bf16.mxu1 %v7127_v23  ;;  %v7174_v23 = vcombine.low %v674_v8, %v678_v9  ;;  %v220_v9 = vld [vmem:[#allocation5 + $0x198] sm:$0xff] }
 0x1d7   :  { %3732 = vmatpush1.bf16.msra.mxu0 %v6864_v22  ;;  %v431_v22 = vld [vmem:[#allocation5 + $0x830] sm:$0xff] }
 0x1d8   :  { %3733 = vmatprep.subr.bf16.mxu0 %v6873_v24  ;;  %v6920_v24 = vcombine.low %v419_v10, %v423_v11  ;;  %v6929_v25 = vcombine.high %v427_v20, %v431_v22  ;;  %v224_v10 = vld [vmem:[#allocation5 + $0x1b8] sm:$0xff]  ;;  %v475_v11 = vld [vmem:[#allocation5 + $0x990] sm:$0xff] }
 0x1d9   :  { %3652 = vmatpush1.bf16.msra.mxu1 %v7126_v54  ;;  %v435_v54 = vld [vmem:[#allocation5 + $0x850] sm:$0xff] }
 0x1da   :  { %3653 = vmatprep.subr.bf16.mxu1 %v7135_v30  ;;  %v6674_v30 = vcombine.low %v172_v17, %v176_v18  ;;  %v228_v18 = vld [vmem:[#allocation5 + $0x1d8] sm:$0xff] }
 0x1db   :  { %3734 = vmatpush1.bf16.msra.mxu0 %v6872_v29  ;;  %v439_v29 = vld [vmem:[#allocation5 + $0x870] sm:$0xff] }
 0x1dc   :  { %3735 = vmatprep.subr.bf16.mxu0 %v6881_v31  ;;  %v6928_v31 = vcombine.low %v427_v20, %v431_v22  ;;  %v6937_v35 = vcombine.high %v435_v54, %v439_v29  ;;  %v232_v20 = vld [vmem:[#allocation5 + $0x1f8] sm:$0xff]  ;;  %v483_v22 = vld [vmem:[#allocation5 + $0x9d0] sm:$0xff] }
 0x1dd   :  { %3654 = vmatpush1.bf16.msra.mxu1 %v7134_v38  ;;  %v443_v38 = vld [vmem:[#allocation5 + $0x890] sm:$0xff] }
 0x1de   :  { %3655 = vmatprep.subr.bf16.mxu1 %v7143_v40  ;;  %v6682_v40 = vcombine.low %v180_v26, %v184_v27  ;;  %v236_v27 = vld [vmem:[#allocation5 + $0x218] sm:$0xff] }
 0x1df   :  { %3736 = vmatpush1.bf16.msra.mxu0 %v6880_v39  ;;  %v447_v39 = vld [vmem:[#allocation5 + $0x8b0] sm:$0xff] }
 0x1e0   :  { %3737 = vmatprep.subr.bf16.mxu0 %v6889_v41  ;;  %v6936_v41 = vcombine.low %v435_v54, %v439_v29  ;;  %v6945_v43 = vcombine.high %v443_v38, %v447_v39  ;;  %v240_v54 = vld [vmem:[#allocation5 + $0x238] sm:$0xff]  ;;  %v491_v29 = vld [vmem:[#allocation5 + $0xa10] sm:$0xff] }
 0x1e1   :  { %3656 = vmatpush1.bf16.msra.mxu1 %v7142_v46  ;;  %v451_v46 = vld [vmem:[#allocation5 + $0x8d0] sm:$0xff] }
 0x1e2   :  { %3657 = vmatprep.subr.bf16.mxu1 %v7151_v48  ;;  %v6690_v48 = vcombine.low %v188_v36, %v192_v37  ;;  %v244_v37 = vld [vmem:[#allocation5 + $0x258] sm:$0xff] }
 0x1e3   :  { %3738 = vmatpush1.bf16.msra.mxu0 %v6888_v47  ;;  %v455_v47 = vld [vmem:[#allocation5 + $0x8f0] sm:$0xff] }
 0x1e4   :  { %3739 = vmatprep.subr.bf16.mxu0 %v6897_v49  ;;  %v6944_v49 = vcombine.low %v443_v38, %v447_v39  ;;  %v6953_v52 = vcombine.high %v451_v46, %v455_v47  ;;  %v248_v38 = vld [vmem:[#allocation5 + $0x278] sm:$0xff]  ;;  %v499_v39 = vld [vmem:[#allocation5 + $0xa50] sm:$0xff] }
 0x1e5   :  { %3658 = vmatpush1.bf16.msra.mxu1 %v7150_v59  ;;  %v459_v59 = vld [vmem:[#allocation5 + $0x910] sm:$0xff] }
 0x1e6   :  { %3659 = vmatprep.subr.bf16.mxu1 %v7159_v63  ;;  %v6698_v63 = vcombine.low %v196_v44, %v200_v45  ;;  %v252_v45 = vld [vmem:[#allocation5 + $0x298] sm:$0xff] }
 0x1e7   :  { %3740 = vmatpush1.bf16.msra.mxu0 %v6896_v60  ;;  %v463_v60 = vld [vmem:[#allocation5 + $0x930] sm:$0xff] }
 0x1e8   :  { %3741 = vmatprep.subr.bf16.mxu0 %v6905_v32  ;;  %v6952_v32 = vcombine.low %v451_v46, %v455_v47  ;;  %v256_v46 = vld [vmem:[#allocation5 + $0x2b8] sm:$0xff]  ;;  %v507_v47 = vld [vmem:[#allocation5 + $0xa90] sm:$0xff] }
 0x1e9   :  { %3660 = vmatpush1.bf16.msra.mxu1 %v7158_v4  ;;  %v471_v4 = vld [vmem:[#allocation5 + $0x970] sm:$0xff] }
 0x1ea   :  { %3661 = vmatprep.subr.bf16.mxu1 %v7167_v6  ;;  %v6960_v6 = vcombine.low %v459_v59, %v463_v60  ;;  %v6969_v8 = vcombine.high %v467_v3, %v471_v4 }
 0x1eb   :  { %3742 = vmatpush1.bf16.msra.mxu0 %v6904_v5  ;;  %v6706_v5 = vcombine.low %v204_v55, %v208_v57  ;;  %v260_v57 = vld [vmem:[#allocation5 + $0x2d8] sm:$0xff] }
 0x1ec   :  { %3743 = vmatprep.subr.bf16.mxu0 %v6913_v7  ;;  %v6715_v7 = vcombine.high %v212_v1, %v216_v2 }
 0x1ed   :  { %3662 = vmatpush1.bf16.msra.mxu1 %v7166_v12  ;;  %v479_v12 = vld [vmem:[#allocation5 + $0x9b0] sm:$0xff] }
 0x1ee   :  { %3663 = vmatprep.subr.bf16.mxu1 %v7175_v14  ;;  %v6968_v14 = vcombine.low %v467_v3, %v471_v4  ;;  %v6977_v17 = vcombine.high %v475_v11, %v479_v12  ;;  %v272_v3 = vld [vmem:[#allocation5 + $0x338] sm:$0xff]  ;;  %v523_v4 = vld [vmem:[#allocation5 + $0xb10] sm:$0xff] }
 0x1ef   :  { %3744 = vmatpush1.bf16.msra.mxu0 %v6912_v13  ;;  %v6714_v13 = vcombine.low %v212_v1, %v216_v2  ;;  %v268_v2 = vld [vmem:[#allocation5 + $0x318] sm:$0xff] }
 0x1f0   :  { %3745 = vmatprep.subr.bf16.mxu0 %v6921_v15  ;;  %v6723_v15 = vcombine.high %v220_v9, %v224_v10 }
 0x1f1   :  { %3664 = vmatpush1.bf16.msra.mxu1 %v7174_v23  ;;  %v487_v23 = vld [vmem:[#allocation5 + $0x9f0] sm:$0xff] }
 0x1f2   :  { %3838 = vmatprep.subr.bf16.mxu1 %v6675_v53  ;;  %v6976_v53 = vcombine.low %v475_v11, %v479_v12  ;;  %v6985_v26 = vcombine.high %v483_v22, %v487_v23  ;;  %v280_v11 = vld [vmem:[#allocation5 + $0x378] sm:$0xff]  ;;  %v531_v12 = vld [vmem:[#allocation5 + $0xb50] sm:$0xff] }
 0x1f3   :  { %3746 = vmatpush1.bf16.msra.mxu0 %v6920_v24  ;;  %v6722_v24 = vcombine.low %v220_v9, %v224_v10  ;;  %v276_v10 = vld [vmem:[#allocation5 + $0x358] sm:$0xff] }
 0x1f4   :  { %3756 = vmatprep.subr.bf16.mxu0 %v6929_v25  ;;  %3666 = vmatmul.mubr.bf16.vlgmr.msra.gmra.mrb[4].mxu1 %v8636_v50  ;;  %v6731_v25 = vcombine.high %v228_v18, %v232_v20 }
 0x1f5   :  { %3839 = vmatpush1.bf16.msra.mxu1 %v6674_v30  ;;  %3870 = vmatprep.mubr.bf16.mxu1 %v8588_v58  ;;  %v6961_v58 = vcombine.high %v459_v59, %v463_v60  ;;  %v495_v30 = vld [vmem:[#allocation5 + $0xa30] sm:$0xff]  ;;  %v264_v59 = vld [vmem:[#allocation5 + $0x2f8] sm:$0xff] }
 0x1f6   :  { %3748 = vmatmul.mubr.bf16.vlgmr.msra.gmra.mrb[4].mxu0 %v8607_v21  ;;  %3840 = vmatprep.subr.bf16.mxu1 %v6683_v33  ;;  %v6984_v33 = vcombine.low %v483_v22, %v487_v23  ;;  %v6993_v36 = vcombine.high %v491_v29, %v495_v30  ;;  %v515_v60 = vld [vmem:[#allocation5 + $0xad0] sm:$0xff]  ;;  %v288_v22 = vld [vmem:[#allocation5 + $0x3b8] sm:$0xff] }
 0x1f7   :  { %3757 = vmatpush1.bf16.msra.mxu0 %v6928_v31  ;;  %3788 = vmatprep.mubr.bf16.mxu0 %v8611_v28  ;;  %v6730_v31 = vcombine.low %v228_v18, %v232_v20  ;;  %v284_v20 = vld [vmem:[#allocation5 + $0x398] sm:$0xff]  ;;  %v539_v23 = vld [vmem:[#allocation5 + $0xb90] sm:$0xff] }
 0x1f8   :  { %3758 = vmatprep.subr.bf16.mxu0 %v6937_v35  ;;  %v6739_v35 = vcombine.high %v236_v27, %v240_v54 }
 0x1f9   :  { %3841 = vmatpush1.bf16.msra.mxu1 %v6682_v40  ;;  %v503_v40 = vld [vmem:[#allocation5 + $0xa70] sm:$0xff] }
 0x1fa   :  { %3842 = vmatprep.subr.bf16.mxu1 %v6691_v19  ;;  %v6992_v19 = vcombine.low %v491_v29, %v495_v30  ;;  %v7001_v44 = vcombine.high %v499_v39, %v503_v40  ;;  %v296_v29 = vld [vmem:[#allocation5 + $0x3f8] sm:$0xff]  ;;  %v547_v30 = vld [vmem:[#allocation5 + $0xbd0] sm:$0xff] }
 0x1fb   :  { %3759 = vmatpush1.bf16.msra.mxu0 %v6936_v41  ;;  %v6738_v41 = vcombine.low %v236_v27, %v240_v54  ;;  %v292_v54 = vld [vmem:[#allocation5 + $0x3d8] sm:$0xff] }
 0x1fc   :  { %3760 = vmatprep.subr.bf16.mxu0 %v6945_v43  ;;  %v6747_v43 = vcombine.high %v244_v37, %v248_v38 }
 0x1fd   :  { %3843 = vmatpush1.bf16.msra.mxu1 %v6690_v48  ;;  %v511_v48 = vld [vmem:[#allocation5 + $0xab0] sm:$0xff] }
 0x1fe   :  { %3844 = vmatprep.subr.bf16.mxu1 %v6699_v51  ;;  %v7000_v51 = vcombine.low %v499_v39, %v503_v40  ;;  %v7009_v55 = vcombine.high %v507_v47, %v511_v48  ;;  %v304_v39 = vld [vmem:[#allocation5 + $0x438] sm:$0xff]  ;;  %v555_v40 = vld [vmem:[#allocation5 + $0xc10] sm:$0xff] }
 0x1ff   :  { %3761 = vmatpush1.bf16.msra.mxu0 %v6944_v49  ;;  %v6746_v49 = vcombine.low %v244_v37, %v248_v38  ;;  %v300_v38 = vld [vmem:[#allocation5 + $0x418] sm:$0xff] }
 0x200   :  { %3762 = vmatprep.subr.bf16.mxu0 %v6953_v52  ;;  %v6755_v52 = vcombine.high %v252_v45, %v256_v46 }
 0x201   :  { %3845 = vmatpush1.bf16.msra.mxu1 %v6698_v63  ;;  %v519_v63 = vld [vmem:[#allocation5 + $0xaf0] sm:$0xff] }
 0x202   :  { %3846 = vmatprep.subr.bf16.mxu1 %v6707_v0  ;;  %v7008_v0 = vcombine.low %v507_v47, %v511_v48  ;;  %v7017_v1 = vcombine.high %v515_v60, %v519_v63  ;;  %v312_v47 = vld [vmem:[#allocation5 + $0x478] sm:$0xff]  ;;  %v563_v48 = vld [vmem:[#allocation5 + $0xc50] sm:$0xff] }
 0x203   :  { %3763 = vmatpush1.bf16.msra.mxu0 %v6952_v32  ;;  %v6754_v32 = vcombine.low %v252_v45, %v256_v46  ;;  %v308_v46 = vld [vmem:[#allocation5 + $0x458] sm:$0xff] }
 0x204   :  { %3764 = vmatprep.subr.bf16.mxu0 %v6961_v58  ;;  %v6763_v58 = vcombine.high %v260_v57, %v264_v59 }
 0x205   :  { %3847 = vmatpush1.bf16.msra.mxu1 %v6706_v5  ;;  %v527_v5 = vld [vmem:[#allocation5 + $0xb30] sm:$0xff] }
 0x206   :  { %3848 = vmatprep.subr.bf16.mxu1 %v6715_v7  ;;  %v7016_v7 = vcombine.low %v515_v60, %v519_v63  ;;  %v7025_v9 = vcombine.high %v523_v4, %v527_v5  ;;  %v316_v60 = vld [vmem:[#allocation5 + $0x498] sm:$0xff] }
 0x207   :  { %3765 = vmatpush1.bf16.msra.mxu0 %v6960_v6  ;;  %v6762_v6 = vcombine.low %v260_v57, %v264_v59  ;;  %v686_v57 = vlaneseq  ;;  %v320_v63 = vld [vmem:[#allocation5 + $0x4b8] sm:$0xff] }
 0x208   :  { %3766 = vmatprep.subr.bf16.mxu0 %v6969_v8  ;;  %v6771_v8 = vcombine.high %v268_v2, %v272_v3 }
 0x209   :  { %3849 = vmatpush1.bf16.msra.mxu1 %v6714_v13  ;;  %v535_v13 = vld [vmem:[#allocation5 + $0xb70] sm:$0xff] }
 0x20a   :  { %3850 = vmatprep.subr.bf16.mxu1 %v6723_v15  ;;  %v7024_v15 = vcombine.low %v523_v4, %v527_v5  ;;  %v7033_v18 = vcombine.high %v531_v12, %v535_v13  ;;  %v324_v5 = vld [vmem:[#allocation5 + $0x4d8] sm:$0xff] }
 0x20b   :  { %3767 = vmatpush1.bf16.msra.mxu0 %v6968_v14  ;;  %v6770_v14 = vcombine.low %v268_v2, %v272_v3  ;;  %v6819_v2 = vcombine.high %v316_v60, %v320_v63  ;;  %v8656_v3 = vshrl.u32 %v686_v57, 7  ;;  %v615_v57 = vld [vmem:[#allocation5 + $0xdf0] sm:$0xff] }
 0x20c   :  { %3768 = vmatprep.subr.bf16.mxu0 %v6977_v17  ;;  %v6779_v17 = vcombine.high %v276_v10, %v280_v11 }
 0x20d   :  { %3851 = vmatpush1.bf16.msra.mxu1 %v6722_v24  ;;  %v543_v24 = vld [vmem:[#allocation5 + $0xbb0] sm:$0xff] }
 0x20e   :  { %3852 = vmatprep.subr.bf16.mxu1 %v6731_v25  ;;  %v7032_v25 = vcombine.low %v531_v12, %v535_v13  ;;  %v7041_v27 = vcombine.high %v539_v23, %v543_v24  ;;  %v8663_v13 = vsub.s32 0, %v8656_v3 }
 0x20f   :  { %3769 = vmatpush1.bf16.msra.mxu0 %v6976_v53  ;;  %v6778_v53 = vcombine.low %v276_v10, %v280_v11 }
 0x210   :  { %3770 = vmatprep.subr.bf16.mxu0 %v6985_v26  ;;  %v6787_v26 = vcombine.high %v284_v20, %v288_v22 }
 0x211   :  { %3853 = vmatpush1.bf16.msra.mxu1 %v6730_v31  ;;  %v551_v31 = vld [vmem:[#allocation5 + $0xbf0] sm:$0xff] }
 0x212   :  { %3854 = vmatprep.subr.bf16.mxu1 %v6739_v35  ;;  %v7040_v35 = vcombine.low %v539_v23, %v543_v24  ;;  %v7049_v37 = vcombine.high %v547_v30, %v551_v31 }
 0x213   :  { %3771 = vmatpush1.bf16.msra.mxu0 %v6984_v33  ;;  %v6786_v33 = vcombine.low %v284_v20, %v288_v22  ;;  %v587_v20 = vld [vmem:[#allocation5 + $0xd10] sm:$0xff] }
 0x214   :  { %3772 = vmatprep.subr.bf16.mxu0 %v6993_v36  ;;  %v6795_v36 = vcombine.high %v292_v54, %v296_v29 }
 0x215   :  { %3855 = vmatpush1.bf16.msra.mxu1 %v6738_v41  ;;  %v559_v41 = vld [vmem:[#allocation5 + $0xc30] sm:$0xff] }
 0x216   :  { %3856 = vmatprep.subr.bf16.mxu1 %v6747_v43  ;;  %v7048_v43 = vcombine.low %v547_v30, %v551_v31  ;;  %v7057_v45 = vcombine.high %v555_v40, %v559_v41  ;;  %v599_v30 = vld [vmem:[#allocation5 + $0xd70] sm:$0xff] }
 0x217   :  { %3773 = vmatpush1.bf16.msra.mxu0 %v6992_v19  ;;  %v6794_v19 = vcombine.low %v292_v54, %v296_v29  ;;  %v595_v29 = vld [vmem:[#allocation5 + $0xd50] sm:$0xff] }
 0x218   :  { %3774 = vmatprep.subr.bf16.mxu0 %v7001_v44  ;;  %v6803_v44 = vcombine.high %v300_v38, %v304_v39 }
 0x219   :  { %3857 = vmatpush1.bf16.msra.mxu1 %v6746_v49  ;;  %v567_v49 = vld [vmem:[#allocation5 + $0xc70] sm:$0xff] }
 0x21a   :  { %3858 = vmatprep.subr.bf16.mxu1 %v6755_v52  ;;  %v7056_v52 = vcombine.low %v555_v40, %v559_v41  ;;  %v7065_v59 = vcombine.high %v563_v48, %v567_v49  ;;  %v603_v41 = vld [vmem:[#allocation5 + $0xd90] sm:$0xff] }
 0x21b   :  { %3775 = vmatpush1.bf16.msra.mxu0 %v7000_v51  ;;  %v6802_v51 = vcombine.low %v300_v38, %v304_v39  ;;  %v348_v38 = vld [vmem:[#allocation5 + $0x598] sm:$0xff] }
 0x21c   :  { %3776 = vmatprep.subr.bf16.mxu0 %v7009_v55  ;;  %v6811_v55 = vcombine.high %v308_v46, %v312_v47  ;;  %v352_v39 = vld [vmem:[#allocation5 + $0x5b8] sm:$0xff] }
 0x21d   :  { %3859 = vmatpush1.bf16.msra.mxu1 %v6754_v32  ;;  %v571_v32 = vld [vmem:[#allocation5 + $0xc90] sm:$0xff] }
 0x21e   :  { %3860 = vmatprep.subr.bf16.mxu1 %v6763_v58  ;;  %v6810_v58 = vcombine.low %v308_v46, %v312_v47 }
 0x21f   :  { %3777 = vmatpush1.bf16.msra.mxu0 %v7008_v0  ;;  %v575_v0 = vld [vmem:[#allocation5 + $0xcb0] sm:$0xff] }
 0x220   :  { %3778 = vmatprep.subr.bf16.mxu0 %v7017_v1  ;;  %v7064_v1 = vcombine.low %v563_v48, %v567_v49  ;;  %v7073_v4 = vcombine.high %v571_v32, %v575_v0  ;;  %v7072_v10 = vcombine.low %v571_v32, %v575_v0  ;;  %v356_v48 = vld [vmem:[#allocation5 + $0x5d8] sm:$0xff] }
 0x221   :  { %3861 = vmatpush1.bf16.msra.mxu1 %v6762_v6  ;;  %v328_v6 = vld [vmem:[#allocation5 + $0x4f8] sm:$0xff] }
 0x222   :  { %3862 = vmatprep.subr.bf16.mxu1 %v6771_v8  ;;  %v583_v8 = vld [vmem:[#allocation5 + $0xcf0] sm:$0xff]  ;;  %v6827_v11 = vcombine.high %v324_v5, %v328_v6  ;;  %v6826_v22 = vcombine.low %v324_v5, %v328_v6  ;;  %v360_v49 = vld [vmem:[#allocation5 + $0x5f8] sm:$0xff] }
 0x223   :  { %3779 = vmatpush1.bf16.msra.mxu0 %v7016_v7  ;;  %v681_v7 = vld [vmem:[#allocation6] sm:$0xff]  ;;  %v619_v5 = vld [vmem:[#allocation5 + $0xe10] sm:$0xff] }
 0x224   :  { %3780 = vmatprep.subr.bf16.mxu0 %v7025_v9  ;;  %v6818_v9 = vcombine.low %v316_v60, %v320_v63  ;;  %v8660_v12 = vunpack.c.l.bf16 %v681_v7  ;;  %v6850_v63 = vcombine.low %v348_v38, %v352_v39  ;;  %v623_v6 = vld [vmem:[#allocation5 + $0xe30] sm:$0xff]  ;;  %v6858_v7 = vcombine.low %v356_v48, %v360_v49 }
 0x225   :  { %3863 = vmatpush1.bf16.msra.mxu1 %v6770_v14 }
 0x226   :  { %3864 = vmatprep.subr.bf16.mxu1 %v6779_v17  ;;  %v336_v17 = vld [vmem:[#allocation5 + $0x538] sm:$0xff] }
 0x227   :  { %3781 = vmatpush1.bf16.msra.mxu0 %v7024_v15  ;;  %v332_v15 = vld [vmem:[#allocation5 + $0x518] sm:$0xff] }
 0x228   :  { %3782 = vmatprep.subr.bf16.mxu0 %v7033_v18  ;;  %v8666_v18 = vsub.s32 2, %v8656_v3  ;;  %v6835_v24 = vcombine.high %v332_v15, %v336_v17  ;;  %v6834_v31 = vcombine.low %v332_v15, %v336_v17  ;;  %v631_v15 = vld [vmem:[#allocation5 + $0xe70] sm:$0xff] }
 0x229   :  { %3865 = vmatpush1.bf16.msra.mxu1 %v6778_v53  ;;  %v689_v53 = vrot.slane %v8660_v12, %v8663_v13 }
 0x22a   :  { %3866 = vmatprep.subr.bf16.mxu1 %v6787_v26  ;;  %v340_v26 = vld [vmem:[#allocation5 + $0x558] sm:$0xff]  ;;  %v693_v54 = vrot.slane %v8660_v12, %v8666_v18 }
 0x22b   :  { %3783 = vmatpush1.bf16.msra.mxu0 %v7032_v25 }
 0x22c   :  { %3784 = vmatprep.subr.bf16.mxu0 %v7041_v27  ;;  %v344_v27 = vld [vmem:[#allocation5 + $0x578] sm:$0xff]  ;;  %v733_v40 = vrot.slane %v693_v54, %v8663_v13 }
 0x22d   :  { %3867 = vmatpush1.bf16.msra.mxu1 %v6786_v33 }
 0x22e   :  { %3868 = vmatprep.subr.bf16.mxu1 %v6795_v36  ;;  %v729_v36 = vrot.slane %v689_v53, %v8663_v13  ;;  %v635_v53 = vld [vmem:[#allocation5 + $0xe90] sm:$0xff] }
 0x22f   :  { %3785 = vmatpush1.bf16.msra.mxu0 %v7040_v35  ;;  %v6843_v35 = vcombine.high %v340_v26, %v344_v27 }
 0x230   :  { %3786 = vmatprep.subr.bf16.mxu0 %v7049_v37  ;;  %v7097_v37 = vcombine.high %v595_v29, %v599_v30  ;;  %v3381_v46 = vadd.f32 %v8646_v56, %v729_v36  ;;  %v6859_v56 = vcombine.high %v356_v48, %v360_v49  ;;  %v404_v48 = vld [vmem:[#allocation5 + $0x758] sm:$0xff] }
 0x231   :  { %3869 = vmatpush1.bf16.msra.mxu1 %v6794_v19  ;;  %v607_v19 = vld [vmem:[#allocation5 + $0xdb0] sm:$0xff]  ;;  %v408_v49 = vld [vmem:[#allocation5 + $0x778] sm:$0xff] }
 0x232   :  { %3879 = vmatprep.subr.bf16.mxu1 %v6803_v44  ;;  %v7096_v44 = vcombine.low %v595_v29, %v599_v30  ;;  %v7105_v47 = vcombine.high %v603_v41, %v607_v19  ;;  %v388_v30 = vld [vmem:[#allocation5 + $0x6d8] sm:$0xff] }
 0x233   :  { %3787 = vmatpush1.bf16.msra.mxu0 %v7048_v43  ;;  %v6842_v43 = vcombine.low %v340_v26, %v344_v27 }
 0x234   :  { %3797 = vmatprep.subr.bf16.mxu0 %v7057_v45  ;;  %3871 = vmatmul.mubr.bf16.vlgmr.msra.gmra.mrb[8].mxu1 %v8598_v16  ;;  %v579_v16 = vld [vmem:[#allocation5 + $0xcd0] sm:$0xff]  ;;  %v6851_v45 = vcombine.high %v348_v38, %v352_v39 }
 0x235   :  { %3880 = vmatpush1.bf16.msra.mxu1 %v6802_v51  ;;  %3911 = vmatprep.mubr.bf16.mxu1 %v8592_v61  ;;  %v7081_v14 = vcombine.high %v579_v16, %v583_v8  ;;  %v591_v61 = vld [vmem:[#allocation5 + $0xd30] sm:$0xff]  ;;  %v7080_v23 = vcombine.low %v579_v16, %v583_v8  ;;  %v3383_v51 = vadd.f32 %v8648_v62, %v733_v40  ;;  %v368_v62 = vld [vmem:[#allocation5 + $0x638] sm:$0xff] }
 0x236   :  { %3789 = vmatmul.mubr.bf16.vlgmr.msra.gmra.mrb[4].mxu0 %v8624_v34  ;;  %3881 = vmatprep.subr.bf16.mxu1 %v6811_v55  ;;  %v7089_v25 = vcombine.high %v587_v20, %v591_v61  ;;  %v7088_v33 = vcombine.low %v587_v20, %v591_v61  ;;  %v611_v55 = vld [vmem:[#allocation5 + $0xdd0] sm:$0xff]  ;;  %v7120_v20 = vcombine.low %v619_v5, %v623_v6  ;;  %v396_v40 = vld [vmem:[#allocation5 + $0x718] sm:$0xff] }
 0x237   :  { %3798 = vmatpush1.bf16.msra.mxu0 %v7056_v52  ;;  %3829 = vmatprep.mubr.bf16.mxu0 %v8628_v42  ;;  %v7112_v16 = vcombine.low %v611_v55, %v615_v57 }
 0x238   :  { %3799 = vmatprep.subr.bf16.mxu0 %v7065_v59 }
 0x239   :  { %3882 = vmatpush1.bf16.msra.mxu1 %v6810_v58  ;;  %v7104_v58 = vcombine.low %v603_v41, %v607_v19  ;;  %v400_v41 = vld [vmem:[#allocation5 + $0x738] sm:$0xff]  ;;  %v651_v19 = vld [vmem:[#allocation5 + $0xf10] sm:$0xff] }
 0x23a   :  { %3883 = vmatprep.subr.bf16.mxu1 %v6819_v2  ;;  %v7113_v2 = vcombine.high %v611_v55, %v615_v57  ;;  %v6898_v55 = vcombine.low %v396_v40, %v400_v41 }
 0x23b   :  { %3800 = vmatpush1.bf16.msra.mxu0 %v7064_v1 }
 0x23c   :  { %3801 = vmatprep.subr.bf16.mxu0 %v7073_v4  ;;  %v364_v4 = vld [vmem:[#allocation5 + $0x618] sm:$0xff] }
 0x23d   :  { %3884 = vmatpush1.bf16.msra.mxu1 %v6818_v9  ;;  %v6867_v8 = vcombine.high %v364_v4, %v368_v62  ;;  %v7121_v9 = vcombine.high %v619_v5, %v623_v6  ;;  %v6866_v17 = vcombine.low %v364_v4, %v368_v62  ;;  %v420_v6 = vld [vmem:[#allocation5 + $0x7d8] sm:$0xff] }
 0x23e   :  { %3885 = vmatprep.subr.bf16.mxu1 %v6827_v11  ;;  %v376_v11 = vld [vmem:[#allocation5 + $0x678] sm:$0xff] }
 0x23f   :  { %3802 = vmatpush1.bf16.msra.mxu0 %v7072_v10  ;;  %v372_v10 = vld [vmem:[#allocation5 + $0x658] sm:$0xff] }
 0x240   :  { %3803 = vmatprep.subr.bf16.mxu0 %v7081_v14  ;;  %v627_v14 = vld [vmem:[#allocation5 + $0xe50] sm:$0xff]  ;;  %v6875_v61 = vcombine.high %v372_v10, %v376_v11  ;;  %v6874_v26 = vcombine.low %v372_v10, %v376_v11  ;;  %v8680_v10 = vstv %s168_s1 }
 0x241   :  { %3886 = vmatpush1.bf16.msra.mxu1 %v6826_v22  ;;  %v7129_v22 = vcombine.high %v627_v14, %v631_v15  ;;  %v7128_v27 = vcombine.low %v627_v14, %v631_v15 }
 0x242   :  { %3887 = vmatprep.subr.bf16.mxu1 %v6835_v24  ;;  %v384_v24 = vld [vmem:[#allocation5 + $0x6b8] sm:$0xff] }
 0x243   :  { %3804 = vmatpush1.bf16.msra.mxu0 %v7080_v23  ;;  %v380_v23 = vld [vmem:[#allocation5 + $0x698] sm:$0xff] }
 0x244   :  { %3805 = vmatprep.subr.bf16.mxu0 %v7089_v25  ;;  %v639_v25 = vld [vmem:[#allocation5 + $0xeb0] sm:$0xff]  ;;  %v6883_v54 = vcombine.high %v380_v23, %v384_v24  ;;  %v6882_v36 = vcombine.low %v380_v23, %v384_v24 }
 0x245   :  { %3888 = vmatpush1.bf16.msra.mxu1 %v6834_v31  ;;  %v7137_v29 = vcombine.high %v635_v53, %v639_v25  ;;  %v392_v31 = vld [vmem:[#allocation5 + $0x6f8] sm:$0xff] }
 0x246   :  { %3889 = vmatprep.subr.bf16.mxu1 %v6843_v35  ;;  %v647_v35 = vld [vmem:[#allocation5 + $0xef0] sm:$0xff]  ;;  %v6891_v38 = vcombine.high %v388_v30, %v392_v31 }
 0x247   :  { %3806 = vmatpush1.bf16.msra.mxu0 %v7088_v33  ;;  %v643_v33 = vld [vmem:[#allocation5 + $0xed0] sm:$0xff] }
 0x248   :  { %3807 = vmatprep.subr.bf16.mxu0 %v7097_v37  ;;  %v7136_v37 = vcombine.low %v635_v53, %v639_v25  ;;  %v7145_v39 = vcombine.high %v643_v33, %v647_v35  ;;  %v7658_v53 = vld [vmem:[#allocation8 + $0x4] ss:$16 sps:$4 sm:$0xff]  }
 0x249   :  { %v3503_v52 = vpop.f32.mrb[0].mxu0  ;;  %3890 = vmatpush1.bf16.msra.mxu1 %v6842_v43  ;;  %v655_v43 = vld [vmem:[#allocation5 + $0xf30] sm:$0xff]  ;;  %v436_v25 = vld [vmem:[#allocation5 + $0x858] sm:$0xff] }
 0x24a   :  { %v8676_v59 = vadd.f32 %v3503_v52, %v3381_v46  ;;  %v3505_v60 = vpop.f32.mrb[1].mxu0  ;;  %3891 = vmatprep.subr.bf16.mxu1 %v6851_v45  ;;  %v7144_v45 = vcombine.low %v643_v33, %v647_v35  ;;  %v6899_v46 = vcombine.high %v396_v40, %v400_v41  ;;  %v663_v52 = vld [vmem:[#allocation5 + $0xf70] sm:$0xff]  ;;  %v7152_v57 = vcombine.low %v651_v19, %v655_v43  ;;  %v444_v33 = vld [vmem:[#allocation5 + $0x898] sm:$0xff] }
 0x24b   :  { %v8678_v32 = vadd.f32 %v3505_v60, %v3383_v51  ;;  %v3507_v0 = vpop.f32.mrb[2].mxu0  ;;  %3808 = vmatpush1.bf16.msra.mxu0 %v7096_v44  ;;  %v6890_v44 = vcombine.low %v388_v30, %v392_v31  ;;  %v659_v51 = vld [vmem:[#allocation5 + $0xf50] sm:$0xff]  ;;  %v6907_v60 = vcombine.high %v404_v48, %v408_v49  ;;  %v7661_v31 = vld [vmem:[#allocation8 + $0x24] ss:$16 sps:$4 sm:$0xff]  }
 0x24c   :  { %v3508_v1 = vpop.f32.mrb[3].mxu0  ;;  %3809 = vmatprep.subr.bf16.mxu0 %v7105_v47  ;;  %v7153_v47 = vcombine.high %v651_v19, %v655_v43  ;;  %v412_v0 = vld [vmem:[#allocation5 + $0x798] sm:$0xff]  ;;  %v7160_v4 = vcombine.low %v659_v51, %v663_v52  ;;  %vm4002_vm1 = vcmp.gt.f32.partialorder %v8676_v59, 0.0 }
 0x24d   :  { %3892 = vmatpush1.bf16.msra.mxu1 %v6850_v63  ;;  %v7161_v63 = vcombine.high %v659_v51, %v663_v52  ;;  %v671_v1 = vld [vmem:[#allocation5 + $0xfb0] sm:$0xff]  ;;  %vm4003_vm0 = vcmp.gt.f32.partialorder %v8678_v32, 0.0  ;;  %v448_v35 = vld [vmem:[#allocation5 + $0x8b8] sm:$0xff] }
 0x24e   :  { %3893 = vmatprep.subr.bf16.mxu1 %v6859_v56  ;;  %v667_v56 = vld [vmem:[#allocation5 + $0xf90] sm:$0xff]  ;;  %v452_v40 = vld [vmem:[#allocation5 + $0x8d8] sm:$0xff] }
 0x24f   :  { %3810 = vmatpush1.bf16.msra.mxu0 %v7104_v58  ;;  %v416_v58 = vld [vmem:[#allocation5 + $0x7b8] sm:$0xff]  ;;  %v7169_v5 = vcombine.high %v667_v56, %v671_v1  ;;  %v7168_v11 = vcombine.low %v667_v56, %v671_v1 }
 0x250   :  { %3811 = vmatprep.subr.bf16.mxu0 %v7113_v2  ;;  %v6906_v2 = vcombine.low %v404_v48, %v408_v49  ;;  %v6915_v62 = vcombine.high %v412_v0, %v416_v58  ;;  %v456_v41 = vld [vmem:[#allocation5 + $0x8f8] sm:$0xff] }
 0x251   :  { %3894 = vmatpush1.bf16.msra.mxu1 %v6858_v7  ;;  %v424_v7 = vld [vmem:[#allocation5 + $0x7f8] sm:$0xff]  ;;  %v6955_v43 = vcombine.high %v452_v40, %v456_v41 }
 0x252   :  { %3895 = vmatprep.subr.bf16.mxu1 %v6867_v8  ;;  %v679_v8 = vld [vmem:[#allocation5 + $0xff0] sm:$0xff]  ;;  %v6923_v14 = vcombine.high %v420_v6, %v424_v7  ;;  %v7662_v19 = vld [vmem:[#allocation8 + $0x40] ss:$16 sps:$4 sm:$0xff]   ;;  %v7670_v51 = vld [vmem:[#allocation8 + $0x84] ss:$16 sps:$4 sm:$0xff]  }
 0x253   :  { %3812 = vmatpush1.bf16.msra.mxu0 %v7112_v16  ;;  %v675_v16 = vld [vmem:[#allocation5 + $0xfd0] sm:$0xff]  ;;  %v7665_v48 = vld [vmem:[#allocation8 + $0x60] ss:$16 sps:$4 sm:$0xff]  }
 0x254   :  { %3813 = vmatprep.subr.bf16.mxu0 %v7121_v9  ;;  %v6914_v9 = vcombine.low %v412_v0, %v416_v58  ;;  %v7177_v15 = vcombine.high %v675_v16, %v679_v8  ;;  %v7176_v23 = vcombine.low %v675_v16, %v679_v8  ;;  %v468_v52 = vld [vmem:[#allocation5 + $0x958] sm:$0xff] }
 0x255   :  { %3896 = vmatpush1.bf16.msra.mxu1 %v6866_v17  ;;  %v428_v17 = vld [vmem:[#allocation5 + $0x818] sm:$0xff] }
 0x256   :  { %3897 = vmatprep.subr.bf16.mxu1 %v6875_v61  ;;  %v4012_v61 = vmul.f32 %v8678_v32, %v8680_v10  ;;  %v476_v0 = vld [vmem:[#allocation5 + $0x998] sm:$0xff] }
 0x257   :  { %3814 = vmatpush1.bf16.msra.mxu0 %v7120_v20  ;;  %v432_v20 = vld [vmem:[#allocation5 + $0x838] sm:$0xff] }
 0x258   :  { %3815 = vmatprep.subr.bf16.mxu0 %v7129_v22  ;;  %v6922_v22 = vcombine.low %v420_v6, %v424_v7  ;;  %v6931_v24 = vcombine.high %v428_v17, %v432_v20  ;;  %v480_v58 = vld [vmem:[#allocation5 + $0x9b8] sm:$0xff] }
 0x259   :  { %3898 = vmatpush1.bf16.msra.mxu1 %v6874_v26  ;;  %v440_v26 = vld [vmem:[#allocation5 + $0x878] sm:$0xff]  ;;  %v6978_v6 = vcombine.low %v476_v0, %v480_v58 }
 0x25a   :  { %3899 = vmatprep.subr.bf16.mxu1 %v6883_v54  ;;  %v4020_v54 = vsel %vm4003_vm0, %v8678_v32, %v4012_v61  ;;  %v6939_v30 = vcombine.high %v436_v25, %v440_v26  ;;  %v7659_v32 = vld [vmem:[#allocation8 + $0x20] ss:$16 sps:$4 sm:$0xff]   ;;  %v7679_v8 = vld [vmem:[#allocation8 + $0xe4] ss:$16 sps:$4 sm:$0xff]  }
 0x25b   :  { %3816 = vmatpush1.bf16.msra.mxu0 %v7128_v27  ;;  %v6930_v27 = vcombine.low %v428_v17, %v432_v20  ;;  %v7671_v1 = vld [vmem:[#allocation8 + $0xa0] ss:$16 sps:$4 sm:$0xff]   ;;  %v7682_v20 = vld [vmem:[#allocation8 + $0x104] ss:$16 sps:$4 sm:$0xff]  }
 0x25c   :  { %3817 = vmatprep.subr.bf16.mxu0 %v7137_v29  ;;  %v7656_v29 = vld [vmem:[#allocation8] ss:$16 sps:$4 sm:$0xff]  }
 0x25d   :  { %3900 = vmatpush1.bf16.msra.mxu1 %v6882_v36  ;;  %v8687_v36 = vpack.c.bf16 %v4020_v54, %v4020_v54  ;;  %v7674_v7 = vld [vmem:[#allocation8 + $0xc0] ss:$16 sps:$4 sm:$0xff]  }
 0x25e   :  { %3901 = vmatprep.subr.bf16.mxu1 %v6891_v38  ;;  %v6947_v38 = vcombine.high %v444_v33, %v448_v35  ;;  %v500_v61 = vld [vmem:[#allocation5 + $0xa58] sm:$0xff] }
 0x25f   :  { %3818 = vmatpush1.bf16.msra.mxu0 %v7136_v37  ;;  %v6938_v37 = vcombine.low %v436_v25, %v440_v26  ;;  %v7685_v25 = vld [vmem:[#allocation8 + $0x124] ss:$16 sps:$4 sm:$0xff]  }
 0x260   :  { %3819 = vmatprep.subr.bf16.mxu0 %v7145_v39  ;;  %v7664_v39 = vld [vmem:[#allocation8 + $0x44] ss:$16 sps:$4 sm:$0xff]  }
 0x261   :  { %3902 = vmatpush1.bf16.msra.mxu1 %v6890_v44  ;;  %v7667_v44 = vld [vmem:[#allocation8 + $0x64] ss:$16 sps:$4 sm:$0xff]  }
 0x262   :  { %3903 = vmatprep.subr.bf16.mxu1 %v6899_v46  ;;  %v464_v46 = vld [vmem:[#allocation5 + $0x938] sm:$0xff] }
 0x263   :  { %3820 = vmatpush1.bf16.msra.mxu0 %v7144_v45  ;;  %v460_v45 = vld [vmem:[#allocation5 + $0x918] sm:$0xff] }
 0x264   :  { %3821 = vmatprep.subr.bf16.mxu0 %v7153_v47  ;;  %v6954_v47 = vcombine.low %v452_v40, %v456_v41  ;;  %v6963_v49 = vcombine.high %v460_v45, %v464_v46  ;;  %v508_v26 = vld [vmem:[#allocation5 + $0xa98] sm:$0xff] }
 0x265   :  { %3904 = vmatpush1.bf16.msra.mxu1 %v6898_v55  ;;  %v6962_v55 = vcombine.low %v460_v45, %v464_v46  ;;  %v524_v40 = vld [vmem:[#allocation5 + $0xb18] sm:$0xff] }
 0x266   :  { %3905 = vmatprep.subr.bf16.mxu1 %v6907_v60  ;;  %v528_v41 = vld [vmem:[#allocation5 + $0xb38] sm:$0xff] }
 0x267   :  { %3822 = vmatpush1.bf16.msra.mxu0 %v7152_v57  ;;  %v7668_v57 = vld [vmem:[#allocation8 + $0x80] ss:$16 sps:$4 sm:$0xff]  }
 0x268   :  { %3823 = vmatprep.subr.bf16.mxu0 %v7161_v63  ;;  %v7673_v63 = vld [vmem:[#allocation8 + $0xa4] ss:$16 sps:$4 sm:$0xff]  }
 0x269   :  { %3906 = vmatpush1.bf16.msra.mxu1 %v6906_v2  ;;  %v6979_v2 = vcombine.high %v476_v0, %v480_v58  ;;  %v532_v45 = vld [vmem:[#allocation5 + $0xb58] sm:$0xff] }
 0x26a   :  { %3907 = vmatprep.subr.bf16.mxu1 %v6915_v62  ;;  %v484_v62 = vld [vmem:[#allocation5 + $0x9d8] sm:$0xff] }
 0x26b   :  { %3824 = vmatpush1.bf16.msra.mxu0 %v7160_v4  ;;  %v7676_v4 = vld [vmem:[#allocation8 + $0xc4] ss:$16 sps:$4 sm:$0xff]  }
 0x26c   :  { %3825 = vmatprep.subr.bf16.mxu0 %v7169_v5  ;;  %v488_v5 = vld [vmem:[#allocation5 + $0x9f8] sm:$0xff] }
 0x26d   :  { %3908 = vmatpush1.bf16.msra.mxu1 %v6914_v9  ;;  %v6987_v16 = vcombine.high %v484_v62, %v488_v5  ;;  %v492_v9 = vld [vmem:[#allocation5 + $0xa18] sm:$0xff] }
 0x26e   :  { %3909 = vmatprep.subr.bf16.mxu1 %v6923_v14  ;;  %v6986_v14 = vcombine.low %v484_v62, %v488_v5  ;;  %v536_v46 = vld [vmem:[#allocation5 + $0xb78] sm:$0xff] }
 0x26f   :  { %3826 = vmatpush1.bf16.msra.mxu0 %v7168_v11  ;;  %v496_v11 = vld [vmem:[#allocation5 + $0xa38] sm:$0xff] }
 0x270   :  { %3827 = vmatprep.subr.bf16.mxu0 %v7177_v15  ;;  %v7677_v15 = vld [vmem:[#allocation8 + $0xe0] ss:$16 sps:$4 sm:$0xff]   ;;  %v6995_v17 = vcombine.high %v492_v9, %v496_v11 }
 0x271   :  { %3910 = vmatpush1.bf16.msra.mxu1 %v6922_v22  ;;  %v504_v22 = vld [vmem:[#allocation5 + $0xa78] sm:$0xff] }
 0x272   :  { %3920 = vmatprep.subr.bf16.mxu1 %v6931_v24  ;;  %v7680_v24 = vld [vmem:[#allocation8 + $0x100] ss:$16 sps:$4 sm:$0xff]   ;;  %v7002_v54 = vcombine.low %v500_v61, %v504_v22 }
 0x273   :  { %3828 = vmatpush1.bf16.msra.mxu0 %v7176_v23  ;;  %v6994_v23 = vcombine.low %v492_v9, %v496_v11  ;;  %v548_v0 = vld [vmem:[#allocation5 + $0xbd8] sm:$0xff] }
 0x274   :  { %5611 = vmatprep.subr.bf16.mxu0 %v7658_v53  ;;  %3912 = vmatmul.mubr.bf16.vlgmr.msra.gmra.mrb[8].mxu1 %v8607_v21  ;;  %v6946_v21 = vcombine.low %v444_v33, %v448_v35  ;;  %v7003_v53 = vcombine.high %v500_v61, %v504_v22  ;;  %v516_v33 = vld [vmem:[#allocation5 + $0xad8] sm:$0xff] }
 0x275   :  { %3921 = vmatpush1.bf16.msra.mxu1 %v6930_v27  ;;  %3952 = vmatprep.mubr.bf16.mxu1 %v8611_v28  ;;  %v472_v28 = vld [vmem:[#allocation5 + $0x978] sm:$0xff] }
 0x276   :  { %3830 = vmatmul.mubr.bf16.vlgmr.msra.gmra.mrb[4].mxu0 %v8636_v50  ;;  %3922 = vmatprep.subr.bf16.mxu1 %v6939_v30  ;;  %v6971_v60 = vcombine.high %v468_v52, %v472_v28  ;;  %v6970_v56 = vcombine.low %v468_v52, %v472_v28  ;;  %v512_v27 = vld [vmem:[#allocation5 + $0xab8] sm:$0xff] }
 0x277   :  { %5612 = vmatpush1.bf16.msra.mxu0 %v7656_v29  ;;  %5643 = vmatprep.mubr.bf16.mxu0 %v8687_v36  ;;  %v7683_v29 = vld [vmem:[#allocation8 + $0x120] ss:$16 sps:$4 sm:$0xff]   ;;  %v7011_v30 = vcombine.high %v508_v26, %v512_v27  ;;  %v7706_v9 = vld [vmem:[#allocation8 + $0x204] ss:$16 sps:$4 sm:$0xff]  }
 0x278   :  { %5613 = vmatprep.subr.bf16.mxu0 %v7661_v31  ;;  %v7688_v31 = vld [vmem:[#allocation8 + $0x144] ss:$16 sps:$4 sm:$0xff]  }
 0x279   :  { %3923 = vmatpush1.bf16.msra.mxu1 %v6938_v37  ;;  %v520_v35 = vld [vmem:[#allocation5 + $0xaf8] sm:$0xff]  ;;  %v7010_v37 = vcombine.low %v508_v26, %v512_v27 }
 0x27a   :  { %3924 = vmatprep.subr.bf16.mxu1 %v6947_v38  ;;  %v7019_v38 = vcombine.high %v516_v33, %v520_v35  ;;  %v540_v52 = vld [vmem:[#allocation5 + $0xb98] sm:$0xff] }
 0x27b   :  { %5614 = vmatpush1.bf16.msra.mxu0 %v7659_v32  ;;  %v7686_v32 = vld [vmem:[#allocation8 + $0x140] ss:$16 sps:$4 sm:$0xff]   ;;  %v7712_v27 = vld [vmem:[#allocation8 + $0x244] ss:$16 sps:$4 sm:$0xff]  }
 0x27c   :  { %5615 = vmatprep.subr.bf16.mxu0 %v7664_v39  ;;  %v7691_v39 = vld [vmem:[#allocation8 + $0x164] ss:$16 sps:$4 sm:$0xff]  }
 0x27d   :  { %3925 = vmatpush1.bf16.msra.mxu1 %v6946_v21  ;;  %v7018_v21 = vcombine.low %v516_v33, %v520_v35  ;;  %v544_v28 = vld [vmem:[#allocation5 + $0xbb8] sm:$0xff] }
 0x27e   :  { %3926 = vmatprep.subr.bf16.mxu1 %v6955_v43  ;;  %v7027_v43 = vcombine.high %v524_v40, %v528_v41  ;;  %v552_v58 = vld [vmem:[#allocation5 + $0xbf8] sm:$0xff] }
 0x27f   :  { %5616 = vmatpush1.bf16.msra.mxu0 %v7662_v19  ;;  %v7689_v19 = vld [vmem:[#allocation8 + $0x160] ss:$16 sps:$4 sm:$0xff]   ;;  %v7715_v33 = vld [vmem:[#allocation8 + $0x264] ss:$16 sps:$4 sm:$0xff]  }
 0x280   :  { %5617 = vmatprep.subr.bf16.mxu0 %v7667_v44  ;;  %v7694_v44 = vld [vmem:[#allocation8 + $0x184] ss:$16 sps:$4 sm:$0xff]  }
 0x281   :  { %3927 = vmatpush1.bf16.msra.mxu1 %v6954_v47  ;;  %v7026_v47 = vcombine.low %v524_v40, %v528_v41  ;;  %v556_v62 = vld [vmem:[#allocation5 + $0xc18] sm:$0xff] }
 0x282   :  { %3928 = vmatprep.subr.bf16.mxu1 %v6963_v49  ;;  %v7035_v49 = vcombine.high %v532_v45, %v536_v46  ;;  %v560_v5 = vld [vmem:[#allocation5 + $0xc38] sm:$0xff] }
 0x283   :  { %5618 = vmatpush1.bf16.msra.mxu0 %v7665_v48  ;;  %v7692_v48 = vld [vmem:[#allocation8 + $0x180] ss:$16 sps:$4 sm:$0xff]  }
 0x284   :  { %5619 = vmatprep.subr.bf16.mxu0 %v7670_v51  ;;  %v7697_v51 = vld [vmem:[#allocation8 + $0x1a4] ss:$16 sps:$4 sm:$0xff]  }
 0x285   :  { %3929 = vmatpush1.bf16.msra.mxu1 %v6962_v55  ;;  %v7034_v55 = vcombine.low %v532_v45, %v536_v46  ;;  %v564_v11 = vld [vmem:[#allocation5 + $0xc58] sm:$0xff] }
 0x286   :  { %3930 = vmatprep.subr.bf16.mxu1 %v6971_v60  ;;  %v7043_v60 = vcombine.high %v540_v52, %v544_v28  ;;  %v588_v35 = vld [vmem:[#allocation5 + $0xd18] sm:$0xff] }
 0x287   :  { %5620 = vmatpush1.bf16.msra.mxu0 %v7668_v57  ;;  %v7695_v57 = vld [vmem:[#allocation8 + $0x1a0] ss:$16 sps:$4 sm:$0xff]   ;;  %v7721_v46 = vld [vmem:[#allocation8 + $0x2a4] ss:$16 sps:$4 sm:$0xff]  }
 0x288   :  { %5621 = vmatprep.subr.bf16.mxu0 %v7673_v63  ;;  %v7700_v63 = vld [vmem:[#allocation8 + $0x1c4] ss:$16 sps:$4 sm:$0xff]  }
 0x289   :  { %3931 = vmatpush1.bf16.msra.mxu1 %v6970_v56  ;;  %v7042_v56 = vcombine.low %v540_v52, %v544_v28  ;;  %v596_v41 = vld [vmem:[#allocation5 + $0xd58] sm:$0xff] }
 0x28a   :  { %3932 = vmatprep.subr.bf16.mxu1 %v6979_v2  ;;  %v7051_v2 = vcombine.high %v548_v0, %v552_v58  ;;  %v7719_v52 = vld [vmem:[#allocation8 + $0x2a0] ss:$16 sps:$4 sm:$0xff]  }
 0x28b   :  { %5622 = vmatpush1.bf16.msra.mxu0 %v7671_v1  ;;  %v7698_v1 = vld [vmem:[#allocation8 + $0x1c0] ss:$16 sps:$4 sm:$0xff]  }
 0x28c   :  { %5623 = vmatprep.subr.bf16.mxu0 %v7676_v4  ;;  %v7703_v4 = vld [vmem:[#allocation8 + $0x1e4] ss:$16 sps:$4 sm:$0xff]  }
 0x28d   :  { %3933 = vmatpush1.bf16.msra.mxu1 %v6978_v6  ;;  %v4011_v6 = vmul.f32 %v8676_v59, %v8680_v10 }
 0x28e   :  { %3934 = vmatprep.subr.bf16.mxu1 %v6987_v16  ;;  %v7701_v16 = vld [vmem:[#allocation8 + $0x1e0] ss:$16 sps:$4 sm:$0xff]  }
 0x28f   :  { %5624 = vmatpush1.bf16.msra.mxu0 %v7674_v7  ;;  %v7050_v7 = vcombine.low %v548_v0, %v552_v58 }
 0x290   :  { %5625 = vmatprep.subr.bf16.mxu0 %v7679_v8  ;;  %v7059_v8 = vcombine.high %v556_v62, %v560_v5 }
 0x291   :  { %3935 = vmatpush1.bf16.msra.mxu1 %v6986_v14  ;;  %v568_v14 = vld [vmem:[#allocation5 + $0xc78] sm:$0xff] }
 0x292   :  { %3936 = vmatprep.subr.bf16.mxu1 %v6995_v17  ;;  %v7058_v17 = vcombine.low %v556_v62, %v560_v5  ;;  %v7067_v61 = vcombine.high %v564_v11, %v568_v14 }
 0x293   :  { %5626 = vmatpush1.bf16.msra.mxu0 %v7677_v15  ;;  %v4019_v15 = vsel %vm4002_vm1, %v8676_v59, %v4011_v6  ;;  %v7707_v59 = vld [vmem:[#allocation8 + $0x220] ss:$16 sps:$4 sm:$0xff]   ;;  %v7727_v6 = vld [vmem:[#allocation8 + $0x2e4] ss:$16 sps:$4 sm:$0xff]  }
 0x294   :  { %5627 = vmatprep.subr.bf16.mxu0 %v7682_v20  ;;  %v7704_v20 = vld [vmem:[#allocation8 + $0x200] ss:$16 sps:$4 sm:$0xff]   ;;  %v8696_v22 = vpack.c.bf16 %v4019_v15, %v4019_v15 }
 0x295   :  { %3937 = vmatpush1.bf16.msra.mxu1 %v6994_v23  ;;  %v7709_v23 = vld [vmem:[#allocation8 + $0x224] ss:$16 sps:$4 sm:$0xff]  }
 0x296   :  { %3938 = vmatprep.subr.bf16.mxu1 %v7003_v53  ;;  %v576_v53 = vld [vmem:[#allocation5 + $0xcb8] sm:$0xff] }
 0x297   :  { %5628 = vmatpush1.bf16.msra.mxu0 %v7680_v24  ;;  %v572_v24 = vld [vmem:[#allocation5 + $0xc98] sm:$0xff] }
 0x298   :  { %5629 = vmatprep.subr.bf16.mxu0 %v7685_v25  ;;  %v7066_v25 = vcombine.low %v564_v11, %v568_v14  ;;  %v7075_v26 = vcombine.high %v572_v24, %v576_v53  ;;  %v7725_v11 = vld [vmem:[#allocation8 + $0x2e0] ss:$16 sps:$4 sm:$0xff]  }
 0x299   :  { %3939 = vmatpush1.bf16.msra.mxu1 %v7002_v54  ;;  %v580_v54 = vld [vmem:[#allocation5 + $0xcd8] sm:$0xff] }
 0x29a   :  { %3940 = vmatprep.subr.bf16.mxu1 %v7011_v30  ;;  %v7074_v30 = vcombine.low %v572_v24, %v576_v53  ;;  %v7728_v24 = vld [vmem:[#allocation8 + $0x300] ss:$16 sps:$4 sm:$0xff]  }
 0x29b   :  { %5630 = vmatpush1.bf16.msra.mxu0 %v7683_v29  ;;  %v584_v29 = vld [vmem:[#allocation5 + $0xcf8] sm:$0xff] }
 0x29c   :  { %5631 = vmatprep.subr.bf16.mxu0 %v7688_v31  ;;  %v7710_v31 = vld [vmem:[#allocation8 + $0x240] ss:$16 sps:$4 sm:$0xff]  }
 0x29d   :  { %3941 = vmatpush1.bf16.msra.mxu1 %v7010_v37  ;;  %v592_v37 = vld [vmem:[#allocation5 + $0xd38] sm:$0xff] }
 0x29e   :  { %3942 = vmatprep.subr.bf16.mxu1 %v7019_v38  ;;  %v8702_v38 = vsub.s32 6, %v8656_v3  ;;  %v7091_v40 = vcombine.high %v588_v35, %v592_v37 }
 0x29f   :  { %5632 = vmatpush1.bf16.msra.mxu0 %v7686_v32  ;;  %v7082_v32 = vcombine.low %v580_v54, %v584_v29 }
 0x2a0   :  { %5633 = vmatprep.subr.bf16.mxu0 %v7691_v39  ;;  %v7713_v39 = vld [vmem:[#allocation8 + $0x260] ss:$16 sps:$4 sm:$0xff]  }
 0x2a1   :  { %3943 = vmatpush1.bf16.msra.mxu1 %v7018_v21  ;;  %v600_v21 = vld [vmem:[#allocation5 + $0xd78] sm:$0xff] }
 0x2a2   :  { %3944 = vmatprep.subr.bf16.mxu1 %v7027_v43  ;;  %v701_v43 = vrot.slane %v8660_v12, %v8702_v38  ;;  %v7099_v45 = vcombine.high %v596_v41, %v600_v21 }
 0x2a3   :  { %5634 = vmatpush1.bf16.msra.mxu0 %v7689_v19  ;;  %v7090_v19 = vcombine.low %v588_v35, %v592_v37  ;;  %v7734_v35 = vld [vmem:[#allocation8 + $0x340] ss:$16 sps:$4 sm:$0xff]  }
 0x2a4   :  { %5635 = vmatprep.subr.bf16.mxu0 %v7694_v44  ;;  %v7716_v44 = vld [vmem:[#allocation8 + $0x280] ss:$16 sps:$4 sm:$0xff]  }
 0x2a5   :  { %3945 = vmatpush1.bf16.msra.mxu1 %v7026_v47  ;;  %v604_v47 = vld [vmem:[#allocation5 + $0xd98] sm:$0xff] }
 0x2a6   :  { %3946 = vmatprep.subr.bf16.mxu1 %v7035_v49  ;;  %v741_v49 = vrot.slane %v701_v43, %v8663_v13  ;;  %v7742_v43 = vld [vmem:[#allocation8 + $0x384] ss:$16 sps:$4 sm:$0xff]  }
 0x2a7   :  { %5636 = vmatpush1.bf16.msra.mxu0 %v7692_v48  ;;  %v608_v48 = vld [vmem:[#allocation5 + $0xdb8] sm:$0xff] }
 0x2a8   :  { %5637 = vmatprep.subr.bf16.mxu0 %v7697_v51  ;;  %v7098_v51 = vcombine.low %v596_v41, %v600_v21  ;;  %v7107_v28 = vcombine.high %v604_v47, %v608_v48  ;;  %v7737_v21 = vld [vmem:[#allocation8 + $0x360] ss:$16 sps:$4 sm:$0xff]  }
 0x2a9   :  { %3947 = vmatpush1.bf16.msra.mxu1 %v7034_v55 }
 0x2aa   :  { %3948 = vmatprep.subr.bf16.mxu1 %v7043_v60  ;;  %v612_v60 = vld [vmem:[#allocation5 + $0xdd8] sm:$0xff] }
 0x2ab   :  { %5638 = vmatpush1.bf16.msra.mxu0 %v7695_v57  ;;  %v7724_v57 = vld [vmem:[#allocation8 + $0x2c4] ss:$16 sps:$4 sm:$0xff]  }
 0x2ac   :  { %5639 = vmatprep.subr.bf16.mxu0 %v7700_v63  ;;  %v616_v63 = vld [vmem:[#allocation5 + $0xdf8] sm:$0xff] }
 0x2ad   :  { %3949 = vmatpush1.bf16.msra.mxu1 %v7042_v56  ;;  %v7115_v62 = vcombine.high %v612_v60, %v616_v63 }
 0x2ae   :  { %3950 = vmatprep.subr.bf16.mxu1 %v7051_v2 }
 0x2af   :  { %5640 = vmatpush1.bf16.msra.mxu0 %v7698_v1  ;;  %v7106_v1 = vcombine.low %v604_v47, %v608_v48  ;;  %v7740_v48 = vld [vmem:[#allocation8 + $0x380] ss:$16 sps:$4 sm:$0xff]  }
 0x2b0   :  { %5641 = vmatprep.subr.bf16.mxu0 %v7703_v4  ;;  %v7722_v4 = vld [vmem:[#allocation8 + $0x2c0] ss:$16 sps:$4 sm:$0xff]  }
 0x2b1   :  { %3951 = vmatpush1.bf16.msra.mxu1 %v7050_v7  ;;  %v620_v7 = vld [vmem:[#allocation5 + $0xe18] sm:$0xff] }
 0x2b2   :  { %3961 = vmatprep.subr.bf16.mxu1 %v7059_v8  ;;  %v7114_v8 = vcombine.low %v612_v60, %v616_v63  ;;  %v7743_v60 = vld [vmem:[#allocation8 + $0x3a0] ss:$16 sps:$4 sm:$0xff]  }
 0x2b3   :  { %5642 = vmatpush1.bf16.msra.mxu0 %v7701_v16  ;;  %v624_v16 = vld [vmem:[#allocation5 + $0xe38] sm:$0xff] }
 0x2b4   :  { %5652 = vmatprep.subr.bf16.mxu0 %v7706_v9  ;;  %3953 = vmatmul.mubr.bf16.vlgmr.msra.gmra.mrb[8].mxu1 %v8624_v34  ;;  %v7083_v34 = vcombine.high %v580_v54, %v584_v29  ;;  %v7123_v15 = vcombine.high %v620_v7, %v624_v16  ;;  %v7731_v54 = vld [vmem:[#allocation8 + $0x320] ss:$16 sps:$4 sm:$0xff]  }
 0x2b5   :  { %3962 = vmatpush1.bf16.msra.mxu1 %v7058_v17  ;;  %3993 = vmatprep.mubr.bf16.mxu1 %v8628_v42  ;;  %v7718_v42 = vld [vmem:[#allocation8 + $0x284] ss:$16 sps:$4 sm:$0xff]  }
 0x2b6   :  { %5644 = vmatmul.mubr.bf16.vlgmr.msra.gmra.mrb[8].mxu0 %v8696_v22  ;;  %3963 = vmatprep.subr.bf16.mxu1 %v7067_v61  ;;  %v7730_v17 = vld [vmem:[#allocation8 + $0x304] ss:$16 sps:$4 sm:$0xff]  }
 0x2b7   :  { %5653 = vmatpush1.bf16.msra.mxu0 %v7704_v20  ;;  %v628_v20 = vld [vmem:[#allocation5 + $0xe58] sm:$0xff] }
 0x2b8   :  { %5654 = vmatprep.subr.bf16.mxu0 %v7709_v23  ;;  %v632_v61 = vld [vmem:[#allocation5 + $0xe78] sm:$0xff]  ;;  %v7122_v23 = vcombine.low %v620_v7, %v624_v16  ;;  %v7754_v16 = vld [vmem:[#allocation8 + $0xc] ss:$16 sps:$4 sm:$0xff]  }
 0x2b9   :  { %3964 = vmatpush1.bf16.msra.mxu1 %v7066_v25  ;;  %v7131_v53 = vcombine.high %v628_v20, %v632_v61  ;;  %v7733_v25 = vld [vmem:[#allocation8 + $0x324] ss:$16 sps:$4 sm:$0xff]   ;;  %v7749_v7 = vld [vmem:[#allocation8 + $0x3e0] ss:$16 sps:$4 sm:$0xff]  }
 0x2ba   :  { %3965 = vmatprep.subr.bf16.mxu1 %v7075_v26  ;;  %v640_v26 = vld [vmem:[#allocation5 + $0xeb8] sm:$0xff] }
 0x2bb   :  { %5655 = vmatpush1.bf16.msra.mxu0 %v7707_v59  ;;  %v636_v59 = vld [vmem:[#allocation5 + $0xe98] sm:$0xff] }
 0x2bc   :  { %5656 = vmatprep.subr.bf16.mxu0 %v7712_v27  ;;  %v7130_v27 = vcombine.low %v628_v20, %v632_v61  ;;  %v7139_v29 = vcombine.high %v636_v59, %v640_v26  ;;  %v7784_v20 = vld [vmem:[#allocation8 + $0x424] ss:$16 sps:$4 sm:$0xff]   ;;  %v7755_v61 = vld [vmem:[#allocation8 + $0x28] ss:$16 sps:$4 sm:$0xff]  }
 0x2bd   :  { %3966 = vmatpush1.bf16.msra.mxu1 %v7074_v30  ;;  %v7736_v30 = vld [vmem:[#allocation8 + $0x344] ss:$16 sps:$4 sm:$0xff]  }
 0x2be   :  { %3967 = vmatprep.subr.bf16.mxu1 %v7083_v34  ;;  %v648_v34 = vld [vmem:[#allocation5 + $0xef8] sm:$0xff] }
 0x2bf   :  { %5657 = vmatpush1.bf16.msra.mxu0 %v7710_v31  ;;  %v644_v31 = vld [vmem:[#allocation5 + $0xed8] sm:$0xff] }
 0x2c0   :  { %5658 = vmatprep.subr.bf16.mxu0 %v7715_v33  ;;  %v7138_v33 = vcombine.low %v636_v59, %v640_v26  ;;  %v7147_v37 = vcombine.high %v644_v31, %v648_v34  ;;  %v7146_v41 = vcombine.low %v644_v31, %v648_v34  ;;  %v7763_v59 = vld [vmem:[#allocation8 + $0x6c] ss:$16 sps:$4 sm:$0xff]   ;;  %v7788_v26 = vld [vmem:[#allocation8 + $0x440] ss:$16 sps:$4 sm:$0xff]  }
 0x2c1   :  { %3968 = vmatpush1.bf16.msra.mxu1 %v7082_v32  ;;  %v7739_v32 = vld [vmem:[#allocation8 + $0x364] ss:$16 sps:$4 sm:$0xff]   ;;  %v7769_v31 = vld [vmem:[#allocation8 + $0xac] ss:$16 sps:$4 sm:$0xff]   ;;  %v7800_v34 = vld [vmem:[#allocation8 + $0x480] ss:$16 sps:$4 sm:$0xff]  }
 0x2c2   :  { %3969 = vmatprep.subr.bf16.mxu1 %v7091_v40  ;;  %v656_v40 = vld [vmem:[#allocation5 + $0xf38] sm:$0xff] }
 0x2c3   :  { %5659 = vmatpush1.bf16.msra.mxu0 %v7713_v39  ;;  %v652_v39 = vld [vmem:[#allocation5 + $0xf18] sm:$0xff] }
 0x2c4   :  { %5660 = vmatprep.subr.bf16.mxu0 %v7718_v42  ;;  %v8714_v42 = vsub.s32 4, %v8656_v3  ;;  %v7154_v47 = vcombine.low %v652_v39, %v656_v40 }
 0x2c5   :  { %3970 = vmatpush1.bf16.msra.mxu1 %v7090_v19  ;;  %v7155_v19 = vcombine.high %v652_v39, %v656_v40  ;;  %v7814_v39 = vld [vmem:[#allocation8 + $0x4c4] ss:$16 sps:$4 sm:$0xff]   ;;  %v7770_v40 = vld [vmem:[#allocation8 + $0xc8] ss:$16 sps:$4 sm:$0xff]  }
 0x2c6   :  { %3971 = vmatprep.subr.bf16.mxu1 %v7099_v45  ;;  %v664_v45 = vld [vmem:[#allocation5 + $0xf78] sm:$0xff] }
 0x2c7   :  { %5661 = vmatpush1.bf16.msra.mxu0 %v7716_v44  ;;  %v8707_v55 = vpop.f32.mrb[4].mxu1  ;;  %v660_v44 = vld [vmem:[#allocation5 + $0xf58] sm:$0xff] }
 0x2c8   :  { %5662 = vmatprep.subr.bf16.mxu0 %v7721_v46  ;;  %v3669_v0 = vpop.f32.mrb[5].mxu1  ;;  %v697_v46 = vrot.slane %v8660_v12, %v8714_v42  ;;  %v7163_v3 = vcombine.high %v660_v44, %v664_v45  ;;  %v7748_v12 = vld [vmem:[#allocation8 + $0x3c4] ss:$16 sps:$4 sm:$0xff]  }
 0x2c9   :  { %v7547_v58 = vadd.f32 %v3669_v0, %v741_v49  ;;  %v3671_v56 = vpop.f32.mrb[6].mxu1  ;;  %3972 = vmatpush1.bf16.msra.mxu1 %v7098_v51  ;;  %v7745_v49 = vld [vmem:[#allocation8 + $0x3a4] ss:$16 sps:$4 sm:$0xff]  }
 0x2ca   :  { %v3672_v2 = vpop.f32.mrb[7].mxu1  ;;  %3973 = vmatprep.subr.bf16.mxu1 %v7107_v28  ;;  %v668_v51 = vld [vmem:[#allocation5 + $0xf98] sm:$0xff]  ;;  %v737_v28 = vrot.slane %v697_v46, %v8663_v13 }
 0x2cb   :  { %5663 = vmatpush1.bf16.msra.mxu0 %v7719_v52  ;;  %vm4005_vm2 = vcmp.gt.f32.partialorder %v7547_v58, 0.0  ;;  %v4014_v5 = vmul.f32 %v7547_v58, %v8680_v10  ;;  %v672_v52 = vld [vmem:[#allocation5 + $0xfb8] sm:$0xff] }
 0x2cc   :  { %5664 = vmatprep.subr.bf16.mxu0 %v7724_v57  ;;  %v7162_v57 = vcombine.low %v660_v44, %v664_v45  ;;  %v7171_v63 = vcombine.high %v668_v51, %v672_v52  ;;  %v676_v0 = vld [vmem:[#allocation5 + $0xfd8] sm:$0xff]  ;;  %v7546_v56 = vadd.f32 %v8707_v55, %v737_v28  ;;  %v7781_v44 = vld [vmem:[#allocation8 + $0x10c] ss:$16 sps:$4 sm:$0xff]  }
 0x2cd   :  { %3974 = vmatpush1.bf16.msra.mxu1 %v7106_v1  ;;  %v4022_v9 = vsel %vm4005_vm2, %v7547_v58, %v4014_v5  ;;  %v680_v58 = vld [vmem:[#allocation5 + $0xff8] sm:$0xff]  ;;  %v7170_v1 = vcombine.low %v668_v51, %v672_v52  ;;  %v7785_v51 = vld [vmem:[#allocation8 + $0x128] ss:$16 sps:$4 sm:$0xff]   ;;  %v7793_v52 = vld [vmem:[#allocation8 + $0x14c] ss:$16 sps:$4 sm:$0xff]  }
 0x2ce   :  { %3975 = vmatprep.subr.bf16.mxu1 %v7115_v62  ;;  %v8710_v14 = vpack.c.bf16 %v4022_v9, %v4022_v9  ;;  %v7746_v2 = vld [vmem:[#allocation8 + $0x3c0] ss:$16 sps:$4 sm:$0xff]   ;;  %v7751_v62 = vld [vmem:[#allocation8 + $0x3e4] ss:$16 sps:$4 sm:$0xff]   ;;  %v4013_v5 = vmul.f32 %v7546_v56, %v8680_v10  ;;  %vm4004_vm3 = vcmp.gt.f32.partialorder %v7546_v56, 0.0 }
 0x2cf   :  { %5665 = vmatpush1.bf16.msra.mxu0 %v7722_v4  ;;  %v7179_v4 = vcombine.high %v676_v0, %v680_v58  ;;  %v7752_v9 = vld [vmem:[#allocation8 + $0x8] ss:$16 sps:$4 sm:$0xff]   ;;  %v7818_v45 = vld [vmem:[#allocation8 + $0x4e0] ss:$16 sps:$4 sm:$0xff]   ;;  %v7826_v46 = vld [vmem:[#allocation8 + $0x504] ss:$16 sps:$4 sm:$0xff]  }
 0x2d0   :  { %5666 = vmatprep.subr.bf16.mxu0 %v7727_v6  ;;  %5684 = vmatprep.mubr.bf16.mxu0 %v8710_v14  ;;  %v7178_v6 = vcombine.low %v676_v0, %v680_v58  ;;  %v4021_v55 = vsel %vm4004_vm3, %v7546_v56, %v4013_v5  ;;  %v7830_v28 = vld [vmem:[#allocation8 + $0x520] ss:$16 sps:$4 sm:$0xff]   ;;  %v7844_v0 = vld [vmem:[#allocation8 + $0x564] ss:$16 sps:$4 sm:$0xff]   ;;  %v7797_v58 = vld [vmem:[#allocation8 + $0x168] ss:$16 sps:$4 sm:$0xff]  }
 0x2d1   :  { %3976 = vmatpush1.bf16.msra.mxu1 %v7114_v8  ;;  %v7778_v8 = vld [vmem:[#allocation8 + $0x404] ss:$16 sps:$4 sm:$0xff]   ;;  %v7805_v56 = vld [vmem:[#allocation8 + $0x18c] ss:$16 sps:$4 sm:$0xff]   ;;  %v7848_v5 = vld [vmem:[#allocation8 + $0x580] ss:$16 sps:$4 sm:$0xff]  }
 0x2d2   :  { %3977 = vmatprep.subr.bf16.mxu1 %v7123_v15  ;;  %v8721_v15 = vpack.c.bf16 %v4021_v55, %v4021_v55  ;;  %v7862_v55 = vld [vmem:[#allocation8 + $0x5c4] ss:$16 sps:$4 sm:$0xff]  }
 0x2d3   :  { %5667 = vmatpush1.bf16.msra.mxu0 %v7725_v11  ;;  %v7757_v11 = vld [vmem:[#allocation8 + $0x2c] ss:$16 sps:$4 sm:$0xff]  }
 0x2d4   :  { %5668 = vmatprep.subr.bf16.mxu0 %v7730_v17  ;;  %v7776_v17 = vld [vmem:[#allocation8 + $0x400] ss:$16 sps:$4 sm:$0xff]  }
 0x2d5   :  { %3978 = vmatpush1.bf16.msra.mxu1 %v7122_v23  ;;  %v7760_v23 = vld [vmem:[#allocation8 + $0x4c] ss:$16 sps:$4 sm:$0xff]  }
 0x2d6   :  { %3979 = vmatprep.subr.bf16.mxu1 %v7131_v53  ;;  %v7790_v53 = vld [vmem:[#allocation8 + $0x444] ss:$16 sps:$4 sm:$0xff]  }
 0x2d7   :  { %5669 = vmatpush1.bf16.msra.mxu0 %v7728_v24  ;;  %v7782_v24 = vld [vmem:[#allocation8 + $0x420] ss:$16 sps:$4 sm:$0xff]  }
 0x2d8   :  { %5670 = vmatprep.subr.bf16.mxu0 %v7733_v25  ;;  %v7758_v25 = vld [vmem:[#allocation8 + $0x48] ss:$16 sps:$4 sm:$0xff]  }
 0x2d9   :  { %3980 = vmatpush1.bf16.msra.mxu1 %v7130_v27  ;;  %v7761_v27 = vld [vmem:[#allocation8 + $0x68] ss:$16 sps:$4 sm:$0xff]  }
 0x2da   :  { %3981 = vmatprep.subr.bf16.mxu1 %v7139_v29  ;;  %v7802_v29 = vld [vmem:[#allocation8 + $0x484] ss:$16 sps:$4 sm:$0xff]  }
 0x2db   :  { %5671 = vmatpush1.bf16.msra.mxu0 %v7731_v54  ;;  %v7766_v54 = vld [vmem:[#allocation8 + $0x8c] ss:$16 sps:$4 sm:$0xff]  }
 0x2dc   :  { %5672 = vmatprep.subr.bf16.mxu0 %v7736_v30  ;;  %v7764_v30 = vld [vmem:[#allocation8 + $0x88] ss:$16 sps:$4 sm:$0xff]  }
 0x2dd   :  { %3982 = vmatpush1.bf16.msra.mxu1 %v7138_v33  ;;  %v7808_v33 = vld [vmem:[#allocation8 + $0x4a4] ss:$16 sps:$4 sm:$0xff]  }
 0x2de   :  { %3983 = vmatprep.subr.bf16.mxu1 %v7147_v37  ;;  %v7772_v37 = vld [vmem:[#allocation8 + $0xcc] ss:$16 sps:$4 sm:$0xff]  }
 0x2df   :  { %5673 = vmatpush1.bf16.msra.mxu0 %v7734_v35  ;;  %v7767_v35 = vld [vmem:[#allocation8 + $0xa8] ss:$16 sps:$4 sm:$0xff]  }
 0x2e0   :  { %5674 = vmatprep.subr.bf16.mxu0 %v7739_v32  ;;  %v7806_v32 = vld [vmem:[#allocation8 + $0x4a0] ss:$16 sps:$4 sm:$0xff]  }
 0x2e1   :  { %3984 = vmatpush1.bf16.msra.mxu1 %v7146_v41  ;;  %v7775_v41 = vld [vmem:[#allocation8 + $0xec] ss:$16 sps:$4 sm:$0xff]  }
 0x2e2   :  { %3985 = vmatprep.subr.bf16.mxu1 %v7155_v19  ;;  %v7820_v19 = vld [vmem:[#allocation8 + $0x4e4] ss:$16 sps:$4 sm:$0xff]  }
 0x2e3   :  { %5675 = vmatpush1.bf16.msra.mxu0 %v7737_v21  ;;  %v7812_v21 = vld [vmem:[#allocation8 + $0x4c0] ss:$16 sps:$4 sm:$0xff]  }
 0x2e4   :  { %5676 = vmatprep.subr.bf16.mxu0 %v7742_v43  ;;  %v7773_v43 = vld [vmem:[#allocation8 + $0xe8] ss:$16 sps:$4 sm:$0xff]  }
 0x2e5   :  { %3986 = vmatpush1.bf16.msra.mxu1 %v7154_v47  ;;  %v7779_v47 = vld [vmem:[#allocation8 + $0x108] ss:$16 sps:$4 sm:$0xff]  }
 0x2e6   :  { %3987 = vmatprep.subr.bf16.mxu1 %v7163_v3  ;;  %v7824_v3 = vld [vmem:[#allocation8 + $0x500] ss:$16 sps:$4 sm:$0xff]  }
 0x2e7   :  { %5677 = vmatpush1.bf16.msra.mxu0 %v7740_v48  ;;  %v7787_v48 = vld [vmem:[#allocation8 + $0x12c] ss:$16 sps:$4 sm:$0xff]  }
 0x2e8   :  { %5678 = vmatprep.subr.bf16.mxu0 %v7745_v49  ;;  %v7832_v49 = vld [vmem:[#allocation8 + $0x524] ss:$16 sps:$4 sm:$0xff]  }
 0x2e9   :  { %3988 = vmatpush1.bf16.msra.mxu1 %v7162_v57  ;;  %v7838_v57 = vld [vmem:[#allocation8 + $0x544] ss:$16 sps:$4 sm:$0xff]  }
 0x2ea   :  { %3989 = vmatprep.subr.bf16.mxu1 %v7171_v63  ;;  %v7799_v63 = vld [vmem:[#allocation8 + $0x16c] ss:$16 sps:$4 sm:$0xff]  }
 0x2eb   :  { %5679 = vmatpush1.bf16.msra.mxu0 %v7743_v60  ;;  %v7791_v60 = vld [vmem:[#allocation8 + $0x148] ss:$16 sps:$4 sm:$0xff]  }
 0x2ec   :  { %5680 = vmatprep.subr.bf16.mxu0 %v7748_v12  ;;  %v7836_v12 = vld [vmem:[#allocation8 + $0x540] ss:$16 sps:$4 sm:$0xff]  }
 0x2ed   :  { %3990 = vmatpush1.bf16.msra.mxu1 %v7170_v1  ;;  %v7842_v1 = vld [vmem:[#allocation8 + $0x560] ss:$16 sps:$4 sm:$0xff]  }
 0x2ee   :  { %3991 = vmatprep.subr.bf16.mxu1 %v7179_v4  ;;  %v7803_v4 = vld [vmem:[#allocation8 + $0x188] ss:$16 sps:$4 sm:$0xff]  }
 0x2ef   :  { %5681 = vmatpush1.bf16.msra.mxu0 %v7746_v2  ;;  %v7850_v2 = vld [vmem:[#allocation8 + $0x584] ss:$16 sps:$4 sm:$0xff]  }
 0x2f0   :  { %5682 = vmatprep.subr.bf16.mxu0 %v7751_v62  ;;  %v7811_v62 = vld [vmem:[#allocation8 + $0x1ac] ss:$16 sps:$4 sm:$0xff]  }
 0x2f1   :  { %3992 = vmatpush1.bf16.msra.mxu1 %v7178_v6  ;;  %v7856_v6 = vld [vmem:[#allocation8 + $0x5a4] ss:$16 sps:$4 sm:$0xff]  }
 0x2f2   :  { %5775 = vmatprep.subr.bf16.mxu1 %v7754_v16  ;;  %v7817_v16 = vld [vmem:[#allocation8 + $0x1cc] ss:$16 sps:$4 sm:$0xff]  }
 0x2f3   :  { %5683 = vmatpush1.bf16.msra.mxu0 %v7749_v7  ;;  %v7809_v7 = vld [vmem:[#allocation8 + $0x1a8] ss:$16 sps:$4 sm:$0xff]  }
 0x2f4   :  { %5693 = vmatprep.subr.bf16.mxu0 %v7778_v8  ;;  %3994 = vmatmul.mubr.bf16.vlgmr.msra.gmra.mrb[8].mxu1 %v8636_v50  ;;  %v7796_v50 = vld [vmem:[#allocation8 + $0x464] ss:$16 sps:$4 sm:$0xff]   ;;  %v7854_v8 = vld [vmem:[#allocation8 + $0x5a0] ss:$16 sps:$4 sm:$0xff]  }
 0x2f5   :  { %5776 = vmatpush1.bf16.msra.mxu1 %v7752_v9  ;;  %5807 = vmatprep.mubr.bf16.mxu1 %v8687_v36  ;;  %v7794_v36 = vld [vmem:[#allocation8 + $0x460] ss:$16 sps:$4 sm:$0xff]   ;;  %v7815_v9 = vld [vmem:[#allocation8 + $0x1c8] ss:$16 sps:$4 sm:$0xff]  }
 0x2f6   :  { %5685 = vmatmul.mubr.bf16.vlgmr.msra.gmra.mrb[8].mxu0 %v8721_v15  ;;  %5777 = vmatprep.subr.bf16.mxu1 %v7757_v11  ;;  %v7823_v11 = vld [vmem:[#allocation8 + $0x1ec] ss:$16 sps:$4 sm:$0xff]  }
 0x2f7   :  { %5694 = vmatpush1.bf16.msra.mxu0 %v7776_v17  ;;  %v7860_v17 = vld [vmem:[#allocation8 + $0x5c0] ss:$16 sps:$4 sm:$0xff]  }
 0x2f8   :  { %5695 = vmatprep.subr.bf16.mxu0 %v7784_v20  ;;  %v7868_v20 = vld [vmem:[#allocation8 + $0x5e4] ss:$16 sps:$4 sm:$0xff]  }
 0x2f9   :  { %5778 = vmatpush1.bf16.msra.mxu1 %v7755_v61  ;;  %v7821_v61 = vld [vmem:[#allocation8 + $0x1e8] ss:$16 sps:$4 sm:$0xff]  }
 0x2fa   :  { %5779 = vmatprep.subr.bf16.mxu1 %v7760_v23  ;;  %v7829_v23 = vld [vmem:[#allocation8 + $0x20c] ss:$16 sps:$4 sm:$0xff]  }
 0x2fb   :  { %5696 = vmatpush1.bf16.msra.mxu0 %v7782_v24  ;;  %v7866_v24 = vld [vmem:[#allocation8 + $0x5e0] ss:$16 sps:$4 sm:$0xff]  }
 0x2fc   :  { %5697 = vmatprep.subr.bf16.mxu0 %v7790_v53  ;;  %v7922_v53 = vld [vmem:[#allocation8 + $0x604] ss:$16 sps:$4 sm:$0xff]  }
 0x2fd   :  { %5780 = vmatpush1.bf16.msra.mxu1 %v7758_v25  ;;  %v7827_v25 = vld [vmem:[#allocation8 + $0x208] ss:$16 sps:$4 sm:$0xff]  }
 0x2fe   :  { %5781 = vmatprep.subr.bf16.mxu1 %v7763_v59  ;;  %v7835_v59 = vld [vmem:[#allocation8 + $0x22c] ss:$16 sps:$4 sm:$0xff]  }
 0x2ff   :  { %5698 = vmatpush1.bf16.msra.mxu0 %v7788_v26  ;;  %v7833_v26 = vld [vmem:[#allocation8 + $0x228] ss:$16 sps:$4 sm:$0xff]  }
 0x300   :  { %5699 = vmatprep.subr.bf16.mxu0 %v7796_v50  ;;  %v7841_v50 = vld [vmem:[#allocation8 + $0x24c] ss:$16 sps:$4 sm:$0xff]  }
 0x301   :  { %5782 = vmatpush1.bf16.msra.mxu1 %v7761_v27  ;;  %v7839_v27 = vld [vmem:[#allocation8 + $0x248] ss:$16 sps:$4 sm:$0xff]  }
 0x302   :  { %5783 = vmatprep.subr.bf16.mxu1 %v7766_v54  ;;  %v7847_v54 = vld [vmem:[#allocation8 + $0x26c] ss:$16 sps:$4 sm:$0xff]  }
 0x303   :  { %5700 = vmatpush1.bf16.msra.mxu0 %v7794_v36  ;;  %v7845_v36 = vld [vmem:[#allocation8 + $0x268] ss:$16 sps:$4 sm:$0xff]  }
 0x304   :  { %5701 = vmatprep.subr.bf16.mxu0 %v7802_v29  ;;  %v8152_v29 = vld [vmem:[#allocation6] sm:$0xff] }
 0x305   :  { %5784 = vmatpush1.bf16.msra.mxu1 %v7764_v30  ;;  %v8728_v30 = vunpack.c.h.bf16 %v8152_v29  ;;  %v7898_v29 = vld [vmem:[#allocation8 + $0x40c] ss:$16 sps:$4 sm:$0xff]  }
 0x306   :  { %5785 = vmatprep.subr.bf16.mxu1 %v7769_v31  ;;  %v7853_v31 = vld [vmem:[#allocation8 + $0x28c] ss:$16 sps:$4 sm:$0xff]  }
 0x307   :  { %5702 = vmatpush1.bf16.msra.mxu0 %v7800_v34  ;;  %v705_v34 = vrot.slane %v8728_v30, %v8663_v13 }
 0x308   :  { %5703 = vmatprep.subr.bf16.mxu0 %v7808_v33  ;;  %v7859_v33 = vld [vmem:[#allocation8 + $0x2ac] ss:$16 sps:$4 sm:$0xff]  }
 0x309   :  { %5786 = vmatpush1.bf16.msra.mxu1 %v7767_v35  ;;  %v745_v35 = vrot.slane %v705_v34, %v8663_v13  ;;  %v7896_v34 = vld [vmem:[#allocation8 + $0x408] ss:$16 sps:$4 sm:$0xff]  }
 0x30a   :  { %5787 = vmatprep.subr.bf16.mxu1 %v7772_v37  ;;  %v7857_v37 = vld [vmem:[#allocation8 + $0x2a8] ss:$16 sps:$4 sm:$0xff]  }
 0x30b   :  { %5704 = vmatpush1.bf16.msra.mxu0 %v7806_v32 }
 0x30c   :  { %5705 = vmatprep.subr.bf16.mxu0 %v7814_v39  ;;  %v7865_v39 = vld [vmem:[#allocation8 + $0x2cc] ss:$16 sps:$4 sm:$0xff]  }
 0x30d   :  { %5788 = vmatpush1.bf16.msra.mxu1 %v7770_v40 }
 0x30e   :  { %5789 = vmatprep.subr.bf16.mxu1 %v7775_v41 }
 0x30f   :  { %5706 = vmatpush1.bf16.msra.mxu0 %v7812_v21 }
 0x310   :  { %5707 = vmatprep.subr.bf16.mxu0 %v7820_v19  ;;  %v7863_v19 = vld [vmem:[#allocation8 + $0x2c8] ss:$16 sps:$4 sm:$0xff]  }
 0x311   :  { %5790 = vmatpush1.bf16.msra.mxu1 %v7773_v43 }
 0x312   :  { %5791 = vmatprep.subr.bf16.mxu1 %v7781_v44 }
 0x313   :  { %5708 = vmatpush1.bf16.msra.mxu0 %v7818_v45  ;;  %v7871_v45 = vld [vmem:[#allocation8 + $0x2ec] ss:$16 sps:$4 sm:$0xff]  }
 0x314   :  { %5709 = vmatprep.subr.bf16.mxu0 %v7826_v46 }
 0x315   :  { %5792 = vmatpush1.bf16.msra.mxu1 %v7779_v47 }
 0x316   :  { %5793 = vmatprep.subr.bf16.mxu1 %v7787_v48 }
 0x317   :  { %5710 = vmatpush1.bf16.msra.mxu0 %v7824_v3 }
 0x318   :  { %5711 = vmatprep.subr.bf16.mxu0 %v7832_v49  ;;  %v7869_v49 = vld [vmem:[#allocation8 + $0x2e8] ss:$16 sps:$4 sm:$0xff]  }
 0x319   :  { %5794 = vmatpush1.bf16.msra.mxu1 %v7785_v51 }
 0x31a   :  { %5795 = vmatprep.subr.bf16.mxu1 %v7793_v52  ;;  %v7874_v52 = vld [vmem:[#allocation8 + $0x30c] ss:$16 sps:$4 sm:$0xff]  }
 0x31b   :  { %5712 = vmatpush1.bf16.msra.mxu0 %v7830_v28 }
 0x31c   :  { %5713 = vmatprep.subr.bf16.mxu0 %v7838_v57  ;;  %v7920_v57 = vld [vmem:[#allocation8 + $0x600] ss:$16 sps:$4 sm:$0xff]  }
 0x31d   :  { %5796 = vmatpush1.bf16.msra.mxu1 %v7791_v60 }
 0x31e   :  { %5797 = vmatprep.subr.bf16.mxu1 %v7799_v63  ;;  %v7928_v63 = vld [vmem:[#allocation8 + $0x624] ss:$16 sps:$4 sm:$0xff]  }
 0x31f   :  { %5714 = vmatpush1.bf16.msra.mxu0 %v7836_v12  ;;  %v7872_v12 = vld [vmem:[#allocation8 + $0x308] ss:$16 sps:$4 sm:$0xff]  }
 0x320   :  { %5715 = vmatprep.subr.bf16.mxu0 %v7844_v0  ;;  %v7877_v0 = vld [vmem:[#allocation8 + $0x32c] ss:$16 sps:$4 sm:$0xff]  }
 0x321   :  { %5798 = vmatpush1.bf16.msra.mxu1 %v7797_v58  ;;  %v7926_v58 = vld [vmem:[#allocation8 + $0x620] ss:$16 sps:$4 sm:$0xff]  }
 0x322   :  { %5799 = vmatprep.subr.bf16.mxu1 %v7805_v56  ;;  %v7934_v56 = vld [vmem:[#allocation8 + $0x644] ss:$16 sps:$4 sm:$0xff]  }
 0x323   :  { %5716 = vmatpush1.bf16.msra.mxu0 %v7842_v1  ;;  %v7875_v1 = vld [vmem:[#allocation8 + $0x328] ss:$16 sps:$4 sm:$0xff]  }
 0x324   :  { %5717 = vmatprep.subr.bf16.mxu0 %v7850_v2  ;;  %v7880_v2 = vld [vmem:[#allocation8 + $0x34c] ss:$16 sps:$4 sm:$0xff]  }
 0x325   :  { %5800 = vmatpush1.bf16.msra.mxu1 %v7803_v4  ;;  %v7932_v4 = vld [vmem:[#allocation8 + $0x640] ss:$16 sps:$4 sm:$0xff]  }
 0x326   :  { %5801 = vmatprep.subr.bf16.mxu1 %v7811_v62  ;;  %v7940_v62 = vld [vmem:[#allocation8 + $0x664] ss:$16 sps:$4 sm:$0xff]  }
 0x327   :  { %5718 = vmatpush1.bf16.msra.mxu0 %v7848_v5  ;;  %v7878_v5 = vld [vmem:[#allocation8 + $0x348] ss:$16 sps:$4 sm:$0xff]  }
 0x328   :  { %5719 = vmatprep.subr.bf16.mxu0 %v7856_v6  ;;  %v7883_v6 = vld [vmem:[#allocation8 + $0x36c] ss:$16 sps:$4 sm:$0xff]  }
 0x329   :  { %5802 = vmatpush1.bf16.msra.mxu1 %v7809_v7  ;;  %v7938_v7 = vld [vmem:[#allocation8 + $0x660] ss:$16 sps:$4 sm:$0xff]  }
 0x32a   :  { %5803 = vmatprep.subr.bf16.mxu1 %v7817_v16  ;;  %v7946_v16 = vld [vmem:[#allocation8 + $0x684] ss:$16 sps:$4 sm:$0xff]  }
 0x32b   :  { %5720 = vmatpush1.bf16.msra.mxu0 %v7854_v8  ;;  %v7881_v8 = vld [vmem:[#allocation8 + $0x368] ss:$16 sps:$4 sm:$0xff]  }
 0x32c   :  { %5721 = vmatprep.subr.bf16.mxu0 %v7862_v55  ;;  %v7886_v55 = vld [vmem:[#allocation8 + $0x38c] ss:$16 sps:$4 sm:$0xff]  }
 0x32d   :  { %5804 = vmatpush1.bf16.msra.mxu1 %v7815_v9  ;;  %v7944_v9 = vld [vmem:[#allocation8 + $0x680] ss:$16 sps:$4 sm:$0xff]  }
 0x32e   :  { %5805 = vmatprep.subr.bf16.mxu1 %v7823_v11  ;;  %v7952_v11 = vld [vmem:[#allocation8 + $0x6a4] ss:$16 sps:$4 sm:$0xff]  }
 0x32f   :  { %5722 = vmatpush1.bf16.msra.mxu0 %v7860_v17  ;;  %v7884_v17 = vld [vmem:[#allocation8 + $0x388] ss:$16 sps:$4 sm:$0xff]  }
 0x330   :  { %5723 = vmatprep.subr.bf16.mxu0 %v7868_v20  ;;  %v7889_v20 = vld [vmem:[#allocation8 + $0x3ac] ss:$16 sps:$4 sm:$0xff]  }
 0x331   :  { %5806 = vmatpush1.bf16.msra.mxu1 %v7821_v61  ;;  %v7950_v61 = vld [vmem:[#allocation8 + $0x6a0] ss:$16 sps:$4 sm:$0xff]  }
 0x332   :  { %5816 = vmatprep.subr.bf16.mxu1 %v7829_v23  ;;  %v7958_v23 = vld [vmem:[#allocation8 + $0x6c4] ss:$16 sps:$4 sm:$0xff]  }
 0x333   :  { %5724 = vmatpush1.bf16.msra.mxu0 %v7866_v24  ;;  %v7887_v24 = vld [vmem:[#allocation8 + $0x3a8] ss:$16 sps:$4 sm:$0xff]  }
 0x334   :  { %5808 = vmatmul.mubr.bf16.vlgmr.msra.gmra.mrb[12].mxu1 %v8696_v22  ;;  %5734 = vmatprep.subr.bf16.mxu0 %v7922_v53  ;;  %v7851_v22 = vld [vmem:[#allocation8 + $0x288] ss:$16 sps:$4 sm:$0xff]   ;;  %v7892_v53 = vld [vmem:[#allocation8 + $0x3cc] ss:$16 sps:$4 sm:$0xff]  }
 0x335   :  { %5817 = vmatpush1.bf16.msra.mxu1 %v7827_v25  ;;  %5848 = vmatprep.mubr.bf16.mxu1 %v8710_v14  ;;  %v709_v14 = vrot.slane %v8728_v30, %v8666_v18  ;;  %v7956_v25 = vld [vmem:[#allocation8 + $0x6c0] ss:$16 sps:$4 sm:$0xff]  }
 0x336   :  { %5818 = vmatprep.subr.bf16.mxu1 %v7835_v59  ;;  %v7964_v59 = vld [vmem:[#allocation8 + $0x6e4] ss:$16 sps:$4 sm:$0xff]  }
 0x337   :  { %v749_v32 = vrot.slane %v709_v14, %v8663_v13  ;;  %v7901_v14 = vld [vmem:[#allocation8 + $0x42c] ss:$16 sps:$4 sm:$0xff]  }
 0x339   :  { %5819 = vmatpush1.bf16.msra.mxu1 %v7833_v26  ;;  %v7890_v26 = vld [vmem:[#allocation8 + $0x3c8] ss:$16 sps:$4 sm:$0xff]  }
 0x33a   :  { %5820 = vmatprep.subr.bf16.mxu1 %v7841_v50  ;;  %v7895_v50 = vld [vmem:[#allocation8 + $0x3ec] ss:$16 sps:$4 sm:$0xff]  }
 0x33d   :  { %5821 = vmatpush1.bf16.msra.mxu1 %v7839_v27  ;;  %v7962_v27 = vld [vmem:[#allocation8 + $0x6e0] ss:$16 sps:$4 sm:$0xff]  }
 0x33e   :  { %5822 = vmatprep.subr.bf16.mxu1 %v7847_v54  ;;  %v7970_v54 = vld [vmem:[#allocation8 + $0x704] ss:$16 sps:$4 sm:$0xff]  }
 0x341   :  { %5823 = vmatpush1.bf16.msra.mxu1 %v7845_v36  ;;  %v7893_v36 = vld [vmem:[#allocation8 + $0x3e8] ss:$16 sps:$4 sm:$0xff]  }
 0x342   :  { %5824 = vmatprep.subr.bf16.mxu1 %v7853_v31  ;;  %v7968_v31 = vld [vmem:[#allocation8 + $0x700] ss:$16 sps:$4 sm:$0xff]  }
 0x345   :  { %5825 = vmatpush1.bf16.msra.mxu1 %v7851_v22  ;;  %v7976_v22 = vld [vmem:[#allocation8 + $0x724] ss:$16 sps:$4 sm:$0xff]  }
 0x346   :  { %5826 = vmatprep.subr.bf16.mxu1 %v7859_v33  ;;  %v7974_v33 = vld [vmem:[#allocation8 + $0x720] ss:$16 sps:$4 sm:$0xff]  }
 0x349   :  { %v3831_v40 = vpop.f32.mrb[4].mxu0  ;;  %5827 = vmatpush1.bf16.msra.mxu1 %v7857_v37  ;;  %v7899_v37 = vld [vmem:[#allocation8 + $0x428] ss:$16 sps:$4 sm:$0xff]  }
 0x34a   :  { %v7548_v41 = vadd.f32 %v3831_v40, %v745_v35  ;;  %v3833_v21 = vpop.f32.mrb[5].mxu0  ;;  %5828 = vmatprep.subr.bf16.mxu1 %v7865_v39  ;;  %v7982_v35 = vld [vmem:[#allocation8 + $0x744] ss:$16 sps:$4 sm:$0xff]   ;;  %v7980_v39 = vld [vmem:[#allocation8 + $0x740] ss:$16 sps:$4 sm:$0xff]  }
 0x34b   :  { %v7549_v43 = vadd.f32 %v3833_v21, %v749_v32  ;;  %v3835_v44 = vpop.f32.mrb[6].mxu0  ;;  %v7904_v32 = vld [vmem:[#allocation8 + $0x44c] ss:$16 sps:$4 sm:$0xff]   ;;  %v7988_v40 = vld [vmem:[#allocation8 + $0x764] ss:$16 sps:$4 sm:$0xff]  }
 0x34c   :  { %vm4006_vm4 = vcmp.gt.f32.partialorder %v7548_v41, 0.0  ;;  %v4015_v46 = vmul.f32 %v7548_v41, %v8680_v10  ;;  %v3836_v47 = vpop.f32.mrb[7].mxu0  ;;  %v7907_v21 = vld [vmem:[#allocation8 + $0x46c] ss:$16 sps:$4 sm:$0xff]  }
 0x34d   :  { %vm4007_vm5 = vcmp.gt.f32.partialorder %v7549_v43, 0.0  ;;  %v4016_v48 = vmul.f32 %v7549_v43, %v8680_v10  ;;  %5829 = vmatpush1.bf16.msra.mxu1 %v7863_v19  ;;  %v7986_v19 = vld [vmem:[#allocation8 + $0x760] ss:$16 sps:$4 sm:$0xff]   ;;  %v7910_v44 = vld [vmem:[#allocation8 + $0x48c] ss:$16 sps:$4 sm:$0xff]  }
 0x34e   :  { %v4023_v3 = vsel %vm4006_vm4, %v7548_v41, %v4015_v46  ;;  %5830 = vmatprep.subr.bf16.mxu1 %v7871_v45  ;;  %v7902_v41 = vld [vmem:[#allocation8 + $0x448] ss:$16 sps:$4 sm:$0xff]   ;;  %v7992_v45 = vld [vmem:[#allocation8 + $0x780] ss:$16 sps:$4 sm:$0xff]   ;;  %v8000_v46 = vld [vmem:[#allocation8 + $0x7a4] ss:$16 sps:$4 sm:$0xff]  }
 0x34f   :  { %v4024_v51 = vsel %vm4007_vm5, %v7549_v43, %v4016_v48  ;;  %v8740_v60 = vpack.c.bf16 %v4023_v3, %v4023_v3  ;;  %v7905_v43 = vld [vmem:[#allocation8 + $0x468] ss:$16 sps:$4 sm:$0xff]   ;;  %v7913_v48 = vld [vmem:[#allocation8 + $0x4ac] ss:$16 sps:$4 sm:$0xff]   ;;  %v7998_v3 = vld [vmem:[#allocation8 + $0x7a0] ss:$16 sps:$4 sm:$0xff]  }
 0x350   :  { %v8738_v28 = vpack.c.bf16 %v4024_v51, %v4024_v51  ;;  %v7908_v47 = vld [vmem:[#allocation8 + $0x488] ss:$16 sps:$4 sm:$0xff]  }
 0x351   :  { %5831 = vmatpush1.bf16.msra.mxu1 %v7869_v49  ;;  %v8006_v49 = vld [vmem:[#allocation8 + $0x7c4] ss:$16 sps:$4 sm:$0xff]   ;;  %v7911_v51 = vld [vmem:[#allocation8 + $0x4a8] ss:$16 sps:$4 sm:$0xff]  }
 0x352   :  { %5725 = vmatprep.mubr.bf16.mxu0 %v8738_v28  ;;  %5832 = vmatprep.subr.bf16.mxu1 %v7874_v52  ;;  %v7916_v52 = vld [vmem:[#allocation8 + $0x4cc] ss:$16 sps:$4 sm:$0xff]  }
 0x353   :  { %5726 = vmatmul.mubr.bf16.vlgmr.msra.gmra.mrb[8].mxu0 %v8740_v60 }
 0x354   :  { %5735 = vmatpush1.bf16.msra.mxu0 %v7920_v57  ;;  %v8012_v57 = vld [vmem:[#allocation8 + $0x7e4] ss:$16 sps:$4 sm:$0xff]  }
 0x355   :  { %5736 = vmatprep.subr.bf16.mxu0 %v7928_v63  ;;  %5833 = vmatpush1.bf16.msra.mxu1 %v7872_v12  ;;  %v7914_v63 = vld [vmem:[#allocation8 + $0x4c8] ss:$16 sps:$4 sm:$0xff]   ;;  %v7919_v12 = vld [vmem:[#allocation8 + $0x4ec] ss:$16 sps:$4 sm:$0xff]  }
 0x356   :  { %5834 = vmatprep.subr.bf16.mxu1 %v7877_v0  ;;  %v8010_v0 = vld [vmem:[#allocation8 + $0x7e0] ss:$16 sps:$4 sm:$0xff]  }
 0x358   :  { %5737 = vmatpush1.bf16.msra.mxu0 %v7926_v58  ;;  %v8042_v58 = vld [vmem:[#allocation11 + $0x4] ss:$8 sps:$4 sm:$0xff]  }
 0x359   :  { %5738 = vmatprep.subr.bf16.mxu0 %v7934_v56  ;;  %5835 = vmatpush1.bf16.msra.mxu1 %v7875_v1  ;;  %v7917_v56 = vld [vmem:[#allocation8 + $0x4e8] ss:$16 sps:$4 sm:$0xff]   ;;  %v7925_v1 = vld [vmem:[#allocation8 + $0x50c] ss:$16 sps:$4 sm:$0xff]  }
 0x35a   :  { %5836 = vmatprep.subr.bf16.mxu1 %v7880_v2  ;;  %v7923_v2 = vld [vmem:[#allocation8 + $0x508] ss:$16 sps:$4 sm:$0xff]  }
 0x35c   :  { %5739 = vmatpush1.bf16.msra.mxu0 %v7932_v4  ;;  %v7931_v4 = vld [vmem:[#allocation8 + $0x52c] ss:$16 sps:$4 sm:$0xff]  }
 0x35d   :  { %5740 = vmatprep.subr.bf16.mxu0 %v7940_v62  ;;  %5837 = vmatpush1.bf16.msra.mxu1 %v7878_v5  ;;  %v7929_v62 = vld [vmem:[#allocation8 + $0x528] ss:$16 sps:$4 sm:$0xff]   ;;  %v7937_v5 = vld [vmem:[#allocation8 + $0x54c] ss:$16 sps:$4 sm:$0xff]  }
 0x35e   :  { %5838 = vmatprep.subr.bf16.mxu1 %v7883_v6  ;;  %v7935_v6 = vld [vmem:[#allocation8 + $0x548] ss:$16 sps:$4 sm:$0xff]  }
 0x360   :  { %5741 = vmatpush1.bf16.msra.mxu0 %v7938_v7  ;;  %v7943_v7 = vld [vmem:[#allocation8 + $0x56c] ss:$16 sps:$4 sm:$0xff]  }
 0x361   :  { %5742 = vmatprep.subr.bf16.mxu0 %v7946_v16  ;;  %5839 = vmatpush1.bf16.msra.mxu1 %v7881_v8  ;;  %v7941_v16 = vld [vmem:[#allocation8 + $0x568] ss:$16 sps:$4 sm:$0xff]   ;;  %v7949_v8 = vld [vmem:[#allocation8 + $0x58c] ss:$16 sps:$4 sm:$0xff]  }
 0x362   :  { %5840 = vmatprep.subr.bf16.mxu1 %v7886_v55  ;;  %v7947_v55 = vld [vmem:[#allocation8 + $0x588] ss:$16 sps:$4 sm:$0xff]  }
 0x364   :  { %5743 = vmatpush1.bf16.msra.mxu0 %v7944_v9  ;;  %v7955_v9 = vld [vmem:[#allocation8 + $0x5ac] ss:$16 sps:$4 sm:$0xff]  }
 0x365   :  { %5744 = vmatprep.subr.bf16.mxu0 %v7952_v11  ;;  %5841 = vmatpush1.bf16.msra.mxu1 %v7884_v17  ;;  %v7953_v11 = vld [vmem:[#allocation8 + $0x5a8] ss:$16 sps:$4 sm:$0xff]   ;;  %v7961_v17 = vld [vmem:[#allocation8 + $0x5cc] ss:$16 sps:$4 sm:$0xff]  }
 0x366   :  { %5842 = vmatprep.subr.bf16.mxu1 %v7889_v20  ;;  %v7959_v20 = vld [vmem:[#allocation8 + $0x5c8] ss:$16 sps:$4 sm:$0xff]  }
 0x368   :  { %5745 = vmatpush1.bf16.msra.mxu0 %v7950_v61  ;;  %v7967_v61 = vld [vmem:[#allocation8 + $0x5ec] ss:$16 sps:$4 sm:$0xff]  }
 0x369   :  { %5746 = vmatprep.subr.bf16.mxu0 %v7958_v23  ;;  %5843 = vmatpush1.bf16.msra.mxu1 %v7887_v24  ;;  %v7965_v23 = vld [vmem:[#allocation8 + $0x5e8] ss:$16 sps:$4 sm:$0xff]   ;;  %v7973_v24 = vld [vmem:[#allocation8 + $0x60c] ss:$16 sps:$4 sm:$0xff]  }
 0x36a   :  { %5844 = vmatprep.subr.bf16.mxu1 %v7892_v53  ;;  %v7971_v53 = vld [vmem:[#allocation8 + $0x608] ss:$16 sps:$4 sm:$0xff]  }
 0x36c   :  { %5747 = vmatpush1.bf16.msra.mxu0 %v7956_v25  ;;  %v7979_v25 = vld [vmem:[#allocation8 + $0x62c] ss:$16 sps:$4 sm:$0xff]  }
 0x36d   :  { %5748 = vmatprep.subr.bf16.mxu0 %v7964_v59  ;;  %5845 = vmatpush1.bf16.msra.mxu1 %v7890_v26  ;;  %v7977_v59 = vld [vmem:[#allocation8 + $0x628] ss:$16 sps:$4 sm:$0xff]   ;;  %v7985_v26 = vld [vmem:[#allocation8 + $0x64c] ss:$16 sps:$4 sm:$0xff]  }
 0x36e   :  { %5846 = vmatprep.subr.bf16.mxu1 %v7895_v50  ;;  %v7983_v50 = vld [vmem:[#allocation8 + $0x648] ss:$16 sps:$4 sm:$0xff]  }
 0x370   :  { %5749 = vmatpush1.bf16.msra.mxu0 %v7962_v27  ;;  %v7991_v27 = vld [vmem:[#allocation8 + $0x66c] ss:$16 sps:$4 sm:$0xff]  }
 0x371   :  { %5750 = vmatprep.subr.bf16.mxu0 %v7970_v54  ;;  %5847 = vmatpush1.bf16.msra.mxu1 %v7893_v36  ;;  %v7989_v54 = vld [vmem:[#allocation8 + $0x668] ss:$16 sps:$4 sm:$0xff]   ;;  %v7997_v36 = vld [vmem:[#allocation8 + $0x68c] ss:$16 sps:$4 sm:$0xff]  }
 0x372   :  { %5857 = vmatprep.subr.bf16.mxu1 %v7898_v29  ;;  %v713_v29 = vrot.slane %v8728_v30, %v8714_v42 }
 0x374   :  { %5751 = vmatpush1.bf16.msra.mxu0 %v7968_v31  ;;  %5849 = vmatmul.mubr.bf16.vlgmr.msra.gmra.mrb[12].mxu1 %v8721_v15  ;;  %v7994_v15 = vld [vmem:[#allocation8 + $0x784] ss:$16 sps:$4 sm:$0xff]   ;;  %v7995_v31 = vld [vmem:[#allocation8 + $0x688] ss:$16 sps:$4 sm:$0xff]  }
 0x375   :  { %5752 = vmatprep.subr.bf16.mxu0 %v7976_v22  ;;  %5858 = vmatpush1.bf16.msra.mxu1 %v7896_v34  ;;  %v8003_v22 = vld [vmem:[#allocation8 + $0x6ac] ss:$16 sps:$4 sm:$0xff]   ;;  %v753_v34 = vrot.slane %v713_v29, %v8663_v13  ;;  %v8075_v29 = vld [vmem:[#allocation11 + $0xb4] ss:$8 sps:$4 sm:$0xff]  }
 0x376   :  { %5889 = vmatprep.mubr.bf16.mxu1 %v8738_v28  ;;  %5859 = vmatprep.subr.bf16.mxu1 %v7901_v14  ;;  %v8004_v28 = vld [vmem:[#allocation8 + $0x7c0] ss:$16 sps:$4 sm:$0xff]  }
 0x378   :  { %5753 = vmatpush1.bf16.msra.mxu0 %v7974_v33  ;;  %v8001_v33 = vld [vmem:[#allocation8 + $0x6a8] ss:$16 sps:$4 sm:$0xff]  }
 0x379   :  { %5754 = vmatprep.subr.bf16.mxu0 %v7982_v35  ;;  %5860 = vmatpush1.bf16.msra.mxu1 %v7899_v37  ;;  %v8009_v35 = vld [vmem:[#allocation8 + $0x6cc] ss:$16 sps:$4 sm:$0xff]  }
 0x37a   :  { %5861 = vmatprep.subr.bf16.mxu1 %v7904_v32 }
 0x37c   :  { %5755 = vmatpush1.bf16.msra.mxu0 %v7980_v39 }
 0x37d   :  { %5756 = vmatprep.subr.bf16.mxu0 %v7988_v40  ;;  %5862 = vmatpush1.bf16.msra.mxu1 %v7902_v41 }
 0x37e   :  { %5863 = vmatprep.subr.bf16.mxu1 %v7907_v21  ;;  %v8007_v21 = vld [vmem:[#allocation8 + $0x6c8] ss:$16 sps:$4 sm:$0xff]  }
 0x380   :  { %5757 = vmatpush1.bf16.msra.mxu0 %v7986_v19 }
 0x381   :  { %5758 = vmatprep.subr.bf16.mxu0 %v7994_v15  ;;  %5864 = vmatpush1.bf16.msra.mxu1 %v7905_v43  ;;  %v8015_v15 = vld [vmem:[#allocation8 + $0x6ec] ss:$16 sps:$4 sm:$0xff]  }
 0x382   :  { %5865 = vmatprep.subr.bf16.mxu1 %v7910_v44 }
 0x384   :  { %5759 = vmatpush1.bf16.msra.mxu0 %v7992_v45 }
 0x385   :  { %5760 = vmatprep.subr.bf16.mxu0 %v8000_v46  ;;  %5866 = vmatpush1.bf16.msra.mxu1 %v7908_v47  ;;  %v8013_v46 = vld [vmem:[#allocation8 + $0x6e8] ss:$16 sps:$4 sm:$0xff]  }
 0x386   :  { %5867 = vmatprep.subr.bf16.mxu1 %v7913_v48  ;;  %v8018_v48 = vld [vmem:[#allocation8 + $0x70c] ss:$16 sps:$4 sm:$0xff]  }
 0x388   :  { %5761 = vmatpush1.bf16.msra.mxu0 %v7998_v3  ;;  %v8040_v3 = vld [vmem:[#allocation11] ss:$8 sps:$4 sm:$0xff]  }
 0x389   :  { %5762 = vmatprep.subr.bf16.mxu0 %v8006_v49  ;;  %5868 = vmatpush1.bf16.msra.mxu1 %v7911_v51  ;;  %v8045_v51 = vld [vmem:[#allocation11 + $0x14] ss:$8 sps:$4 sm:$0xff]  }
 0x38a   :  { %5869 = vmatprep.subr.bf16.mxu1 %v7916_v52  ;;  %v8016_v52 = vld [vmem:[#allocation8 + $0x708] ss:$16 sps:$4 sm:$0xff]  }
 0x38c   :  { %5763 = vmatpush1.bf16.msra.mxu0 %v8004_v28  ;;  %v8021_v28 = vld [vmem:[#allocation8 + $0x72c] ss:$16 sps:$4 sm:$0xff]  }
 0x38d   :  { %5764 = vmatprep.subr.bf16.mxu0 %v8012_v57  ;;  %5870 = vmatpush1.bf16.msra.mxu1 %v7914_v63  ;;  %v8048_v57 = vld [vmem:[#allocation11 + $0x24] ss:$8 sps:$4 sm:$0xff]  }
 0x38e   :  { %5871 = vmatprep.subr.bf16.mxu1 %v7919_v12  ;;  %v8019_v63 = vld [vmem:[#allocation8 + $0x728] ss:$16 sps:$4 sm:$0xff]   ;;  %v8024_v12 = vld [vmem:[#allocation8 + $0x74c] ss:$16 sps:$4 sm:$0xff]  }
 0x390   :  { %5765 = vmatpush1.bf16.msra.mxu0 %v8010_v0  ;;  %v8046_v0 = vld [vmem:[#allocation11 + $0x20] ss:$8 sps:$4 sm:$0xff]  }
 0x391   :  { %6362 = vmatprep.subr.bf16.mxu0 %v8042_v58  ;;  %5872 = vmatpush1.bf16.msra.mxu1 %v7917_v56  ;;  %v8051_v58 = vld [vmem:[#allocation11 + $0x34] ss:$8 sps:$4 sm:$0xff]  }
 0x392   :  { %5873 = vmatprep.subr.bf16.mxu1 %v7925_v1  ;;  %v8022_v56 = vld [vmem:[#allocation8 + $0x748] ss:$16 sps:$4 sm:$0xff]   ;;  %v8027_v1 = vld [vmem:[#allocation8 + $0x76c] ss:$16 sps:$4 sm:$0xff]  }
 0x395   :  { %5874 = vmatpush1.bf16.msra.mxu1 %v7923_v2  ;;  %v8049_v2 = vld [vmem:[#allocation11 + $0x30] ss:$8 sps:$4 sm:$0xff]  }
 0x396   :  { %5875 = vmatprep.subr.bf16.mxu1 %v7931_v4  ;;  %v8054_v4 = vld [vmem:[#allocation11 + $0x44] ss:$8 sps:$4 sm:$0xff]  }
 0x399   :  { %5876 = vmatpush1.bf16.msra.mxu1 %v7929_v62  ;;  %v8025_v62 = vld [vmem:[#allocation8 + $0x768] ss:$16 sps:$4 sm:$0xff]  }
 0x39a   :  { %5877 = vmatprep.subr.bf16.mxu1 %v7937_v5  ;;  %v8030_v5 = vld [vmem:[#allocation8 + $0x78c] ss:$16 sps:$4 sm:$0xff]  }
 0x39d   :  { %5878 = vmatpush1.bf16.msra.mxu1 %v7935_v6  ;;  %v8052_v6 = vld [vmem:[#allocation11 + $0x40] ss:$8 sps:$4 sm:$0xff]  }
 0x39e   :  { %5879 = vmatprep.subr.bf16.mxu1 %v7943_v7  ;;  %v8057_v7 = vld [vmem:[#allocation11 + $0x54] ss:$8 sps:$4 sm:$0xff]  }
 0x3a1   :  { %5880 = vmatpush1.bf16.msra.mxu1 %v7941_v16  ;;  %v8028_v16 = vld [vmem:[#allocation8 + $0x788] ss:$16 sps:$4 sm:$0xff]  }
 0x3a2   :  { %5881 = vmatprep.subr.bf16.mxu1 %v7949_v8  ;;  %v8033_v8 = vld [vmem:[#allocation8 + $0x7ac] ss:$16 sps:$4 sm:$0xff]  }
 0x3a5   :  { %5882 = vmatpush1.bf16.msra.mxu1 %v7947_v55  ;;  %v8055_v55 = vld [vmem:[#allocation11 + $0x50] ss:$8 sps:$4 sm:$0xff]  }
 0x3a6   :  { %5883 = vmatprep.subr.bf16.mxu1 %v7955_v9  ;;  %v8060_v9 = vld [vmem:[#allocation11 + $0x64] ss:$8 sps:$4 sm:$0xff]  }
 0x3a9   :  { %5884 = vmatpush1.bf16.msra.mxu1 %v7953_v11  ;;  %v8031_v11 = vld [vmem:[#allocation8 + $0x7a8] ss:$16 sps:$4 sm:$0xff]  }
 0x3aa   :  { %5885 = vmatprep.subr.bf16.mxu1 %v7961_v17  ;;  %v8036_v17 = vld [vmem:[#allocation8 + $0x7cc] ss:$16 sps:$4 sm:$0xff]  }
 0x3ad   :  { %5886 = vmatpush1.bf16.msra.mxu1 %v7959_v20  ;;  %v8058_v20 = vld [vmem:[#allocation11 + $0x60] ss:$8 sps:$4 sm:$0xff]  }
 0x3ae   :  { %5887 = vmatprep.subr.bf16.mxu1 %v7967_v61  ;;  %v8063_v61 = vld [vmem:[#allocation11 + $0x74] ss:$8 sps:$4 sm:$0xff]  }
 0x3b1   :  { %5888 = vmatpush1.bf16.msra.mxu1 %v7965_v23  ;;  %v8034_v23 = vld [vmem:[#allocation8 + $0x7c8] ss:$16 sps:$4 sm:$0xff]  }
 0x3b2   :  { %5898 = vmatprep.subr.bf16.mxu1 %v7973_v24  ;;  %v8039_v24 = vld [vmem:[#allocation8 + $0x7ec] ss:$16 sps:$4 sm:$0xff]  }
 0x3b4   :  { %5890 = vmatmul.mubr.bf16.vlgmr.msra.gmra.mrb[12].mxu1 %v8740_v60  ;;  %v717_v60 = vrot.slane %v8728_v30, %v8702_v38 }
 0x3b5   :  { %5899 = vmatpush1.bf16.msra.mxu1 %v7971_v53  ;;  %v8061_v53 = vld [vmem:[#allocation11 + $0x70] ss:$8 sps:$4 sm:$0xff]  }
 0x3b6   :  { %5900 = vmatprep.subr.bf16.mxu1 %v7979_v25  ;;  %v757_v14 = vrot.slane %v717_v60, %v8663_v13  ;;  %v8066_v25 = vld [vmem:[#allocation11 + $0x84] ss:$8 sps:$4 sm:$0xff]  }
 0x3b7   :  { %v8078_v60 = vld [vmem:[#allocation11 + $0xc4] ss:$8 sps:$4 sm:$0xff]  }
 0x3b9   :  { %5901 = vmatpush1.bf16.msra.mxu1 %v7977_v59  ;;  %v8037_v59 = vld [vmem:[#allocation8 + $0x7e8] ss:$16 sps:$4 sm:$0xff]  }
 0x3ba   :  { %5902 = vmatprep.subr.bf16.mxu1 %v7985_v26  ;;  %v8064_v26 = vld [vmem:[#allocation11 + $0x80] ss:$8 sps:$4 sm:$0xff]  }
 0x3bd   :  { %5903 = vmatpush1.bf16.msra.mxu1 %v7983_v50  ;;  %v8069_v50 = vld [vmem:[#allocation11 + $0x94] ss:$8 sps:$4 sm:$0xff]  }
 0x3be   :  { %5904 = vmatprep.subr.bf16.mxu1 %v7991_v27  ;;  %v8067_v27 = vld [vmem:[#allocation11 + $0x90] ss:$8 sps:$4 sm:$0xff]  }
 0x3c1   :  { %5905 = vmatpush1.bf16.msra.mxu1 %v7989_v54  ;;  %v8072_v54 = vld [vmem:[#allocation11 + $0xa4] ss:$8 sps:$4 sm:$0xff]  }
 0x3c2   :  { %5906 = vmatprep.subr.bf16.mxu1 %v7997_v36  ;;  %v8070_v36 = vld [vmem:[#allocation11 + $0xa0] ss:$8 sps:$4 sm:$0xff]  }
 0x3c5   :  { %5907 = vmatpush1.bf16.msra.mxu1 %v7995_v31  ;;  %v8073_v31 = vld [vmem:[#allocation11 + $0xb0] ss:$8 sps:$4 sm:$0xff]  }
 0x3c6   :  { %5908 = vmatprep.subr.bf16.mxu1 %v8003_v22  ;;  %v8076_v22 = vld [vmem:[#allocation11 + $0xc0] ss:$8 sps:$4 sm:$0xff]  }
 0x3c7   :  { %v3995_v37 = vpop.f32.mrb[8].mxu1 }
 0x3c8   :  { %v7550_v32 = vadd.f32 %v3995_v37, %v753_v34  ;;  %v3997_v39 = vpop.f32.mrb[9].mxu1  ;;  %v8081_v34 = vld [vmem:[#allocation11 + $0xd4] ss:$8 sps:$4 sm:$0xff]  }
 0x3c9   :  { %v7551_v40 = vadd.f32 %v3997_v39, %v757_v14  ;;  %v3999_v41 = vpop.f32.mrb[10].mxu1  ;;  %5909 = vmatpush1.bf16.msra.mxu1 %v8001_v33  ;;  %v8079_v14 = vld [vmem:[#allocation11 + $0xd0] ss:$8 sps:$4 sm:$0xff]   ;;  %v8084_v33 = vld [vmem:[#allocation11 + $0xe4] ss:$8 sps:$4 sm:$0xff]  }
 0x3ca   :  { %vm4008_vm6 = vcmp.gt.f32.partialorder %v7550_v32, 0.0  ;;  %v4017_v30 = vmul.f32 %v7550_v32, %v8680_v10  ;;  %v4000_v19 = vpop.f32.mrb[11].mxu1  ;;  %5910 = vmatprep.subr.bf16.mxu1 %v8009_v35  ;;  %v8082_v35 = vld [vmem:[#allocation11 + $0xe0] ss:$8 sps:$4 sm:$0xff]   ;;  %v8087_v37 = vld [vmem:[#allocation11 + $0xf4] ss:$8 sps:$4 sm:$0xff]  }
 0x3cb   :  { %vm4009_vm7 = vcmp.gt.f32.partialorder %v7551_v40, 0.0  ;;  %v4018_v43 = vmul.f32 %v7551_v40, %v8680_v10  ;;  %v8043_v10 = vld [vmem:[#allocation11 + $0x10] ss:$8 sps:$4 sm:$0xff]   ;;  %v8090_v39 = vld [vmem:[#allocation11 + $0x104] ss:$8 sps:$4 sm:$0xff]  }
 0x3cc   :  { %v4025_v44 = vsel %vm4008_vm6, %v7550_v32, %v4017_v30  ;;  %v8085_v32 = vld [vmem:[#allocation11 + $0xf0] ss:$8 sps:$4 sm:$0xff]   ;;  %v8137_v41 = vld [vmem:[#allocation14] sm:$0xff]  }
 0x3cd   :  { %5911 = vmatpush1.bf16.msra.mxu1 %v8007_v21  ;;  %v4026_v45 = vsel %vm4009_vm7, %v7551_v40, %v4018_v43  ;;  %v8755_v49 = vpack.c.bf16 %v4025_v44, %v4025_v44  ;;  %v8136_v40 = vld [vmem:[#allocation14 + $0x40] sm:$0xff]   ;;  %v8138_v21 = vld [vmem:[#allocation14 + $0x48] sm:$0xff]   ;;  %v8140_v19 = vld [vmem:[#allocation14 + $0x50] sm:$0xff]  }
 0x3ce   :  { %v4034_v47 = vpack.c.bf16 %v4026_v45, %v4026_v45  ;;  %5912 = vmatprep.subr.bf16.mxu1 %v8015_v15  ;;  %v8139_v30 = vld [vmem:[#allocation14 + $0x8] sm:$0xff]   ;;  %v8141_v15 = vld [vmem:[#allocation14 + $0x10] sm:$0xff]   ;;  %v8142_v43 = vld [vmem:[#allocation14 + $0x58] sm:$0xff]  }
 0x3cf   :  { %v8143_v44 = vld [vmem:[#allocation14 + $0x18] sm:$0xff]   ;;  %v8144_v45 = vld [vmem:[#allocation14 + $0x60] sm:$0xff]  }
 0x3d0   :  { %5766 = vmatprep.mubr.bf16.mxu0 %v4034_v47  ;;  %5930 = vmatprep.mubr.bf16.mxu1 %v4034_v47  ;;  %v8146_v47 = vld [vmem:[#allocation14 + $0x68] sm:$0xff]  }
 0x3d1   :  { %5767 = vmatmul.mubr.bf16.vlgmr.msra.gmra.mrb[8].mxu0 %v8755_v49  ;;  %5913 = vmatpush1.bf16.msra.mxu1 %v8013_v46  ;;  %v8145_v46 = vld [vmem:[#allocation14 + $0x20] sm:$0xff]  }
 0x3d2   :  { %5914 = vmatprep.subr.bf16.mxu1 %v8018_v48  ;;  %6363 = vmatpush1.bf16.msra.mxu0 %v8040_v3  ;;  %v8147_v48 = vld [vmem:[#allocation14 + $0x28] sm:$0xff]   ;;  %v4292_v3 = vld [vmem:[#allocation9] sm:$0xf] }
 0x3d3   :  { %6364 = vmatprep.subr.bf16.mxu0 %v8045_v51 }
 0x3d5   :  { %5915 = vmatpush1.bf16.msra.mxu1 %v8016_v52 }
 0x3d6   :  { %5916 = vmatprep.subr.bf16.mxu1 %v8021_v28  ;;  %6365 = vmatpush1.bf16.msra.mxu0 %v8043_v10 }
 0x3d7   :  { %6366 = vmatprep.subr.bf16.mxu0 %v8048_v57 }
 0x3d9   :  { %5917 = vmatpush1.bf16.msra.mxu1 %v8019_v63  ;;  %v5943_v63 = vstv %s7180_s2 }
 0x3da   :  { %5918 = vmatprep.subr.bf16.mxu1 %v8024_v12  ;;  %6367 = vmatpush1.bf16.msra.mxu0 %v8046_v0 }
 0x3db   :  { %6368 = vmatprep.subr.bf16.mxu0 %v8051_v58 }
 0x3dd   :  { %5919 = vmatpush1.bf16.msra.mxu1 %v8022_v56 }
 0x3de   :  { %5920 = vmatprep.subr.bf16.mxu1 %v8027_v1  ;;  %6369 = vmatpush1.bf16.msra.mxu0 %v8049_v2 }
 0x3df   :  { %6370 = vmatprep.subr.bf16.mxu0 %v8054_v4 }
 0x3e1   :  { %5921 = vmatpush1.bf16.msra.mxu1 %v8025_v62 }
 0x3e2   :  { %5922 = vmatprep.subr.bf16.mxu1 %v8030_v5  ;;  %6371 = vmatpush1.bf16.msra.mxu0 %v8052_v6 }
 0x3e3   :  { %6372 = vmatprep.subr.bf16.mxu0 %v8057_v7  ;;  %v8088_v7 = vld [vmem:[#allocation11 + $0x100] ss:$8 sps:$4 sm:$0xff]  }
 0x3e5   :  { %5923 = vmatpush1.bf16.msra.mxu1 %v8028_v16 }
 0x3e6   :  { %5924 = vmatprep.subr.bf16.mxu1 %v8033_v8  ;;  %6373 = vmatpush1.bf16.msra.mxu0 %v8055_v55  ;;  %v8093_v8 = vld [vmem:[#allocation11 + $0x114] ss:$8 sps:$4 sm:$0xff]   ;;  %v8091_v55 = vld [vmem:[#allocation11 + $0x110] ss:$8 sps:$4 sm:$0xff]  }
 0x3e7   :  { %6374 = vmatprep.subr.bf16.mxu0 %v8060_v9  ;;  %v8096_v9 = vld [vmem:[#allocation11 + $0x124] ss:$8 sps:$4 sm:$0xff]  }
 0x3e9   :  { %5925 = vmatpush1.bf16.msra.mxu1 %v8031_v11  ;;  %v8094_v11 = vld [vmem:[#allocation11 + $0x120] ss:$8 sps:$4 sm:$0xff]  }
 0x3ea   :  { %5926 = vmatprep.subr.bf16.mxu1 %v8036_v17  ;;  %6375 = vmatpush1.bf16.msra.mxu0 %v8058_v20  ;;  %v8099_v17 = vld [vmem:[#allocation11 + $0x134] ss:$8 sps:$4 sm:$0xff]   ;;  %v8097_v20 = vld [vmem:[#allocation11 + $0x130] ss:$8 sps:$4 sm:$0xff]  }
 0x3eb   :  { %6376 = vmatprep.subr.bf16.mxu0 %v8063_v61  ;;  %v8102_v61 = vld [vmem:[#allocation11 + $0x144] ss:$8 sps:$4 sm:$0xff]  }
 0x3ed   :  { %5927 = vmatpush1.bf16.msra.mxu1 %v8034_v23  ;;  %v8100_v23 = vld [vmem:[#allocation11 + $0x140] ss:$8 sps:$4 sm:$0xff]  }
 0x3ee   :  { %5928 = vmatprep.subr.bf16.mxu1 %v8039_v24  ;;  %6377 = vmatpush1.bf16.msra.mxu0 %v8061_v53  ;;  %v8105_v24 = vld [vmem:[#allocation11 + $0x154] ss:$8 sps:$4 sm:$0xff]   ;;  %v8103_v53 = vld [vmem:[#allocation11 + $0x150] ss:$8 sps:$4 sm:$0xff]  }
 0x3ef   :  { %6378 = vmatprep.subr.bf16.mxu0 %v8066_v25  ;;  %v8108_v25 = vld [vmem:[#allocation11 + $0x164] ss:$8 sps:$4 sm:$0xff]  }
 0x3f1   :  { %5929 = vmatpush1.bf16.msra.mxu1 %v8037_v59 }
 0x3f2   :  { %6379 = vmatpush1.bf16.msra.mxu0 %v8064_v26  ;;  %7520 = vmatprep.subr.bf16.mxu1 %v8136_v40 }
 0x3f3   :  { %6380 = vmatprep.subr.bf16.mxu0 %v8069_v50  ;;  %v8106_v50 = vld [vmem:[#allocation11 + $0x160] ss:$8 sps:$4 sm:$0xff]  }
 0x3f4   :  { %5931 = vmatmul.mubr.bf16.vlgmr.msra.gmra.mrb[12].mxu1 %v8755_v49  ;;  %v4293_v49 = vunpack.c.l.bf16 %v4292_v3  ;;  %v8130_v3 = vld [vmem:[#allocation11 + $0x1e0] ss:$8 sps:$4 sm:$0xff]  }
 0x3f5   :  { %7521 = vmatpush3.bf16.msra.mxu1 %v8137_v41 }
 0x3f6   :  { %6381 = vmatpush1.bf16.msra.mxu0 %v8067_v27  ;;  %7522 = vmatprep.subr.bf16.mxu1 %v8138_v21  ;;  %v4298_v51 = vrot.slane %v4293_v49, %v8663_v13  ;;  %v4302_v52 = vrot.slane %v4293_v49, %v8666_v18  ;;  %v4306_v59 = vrot.slane %v4293_v49, %v8714_v42  ;;  %v8115_v21 = vld [vmem:[#allocation11 + $0x190] ss:$8 sps:$4 sm:$0xff]  }
 0x3f7   :  { %6382 = vmatprep.subr.bf16.mxu0 %v8072_v54  ;;  %v4310_v26 = vrot.slane %v4293_v49, %v8702_v38  ;;  %v8111_v54 = vld [vmem:[#allocation11 + $0x174] ss:$8 sps:$4 sm:$0xff]  }
 0x3f8   :  { %v4318_v28 = vrot.slane %v4298_v51, %v8663_v13  ;;  %v4322_v10 = vrot.slane %v4302_v52, %v8663_v13  ;;  %v4326_v27 = vrot.slane %v4306_v59, %v8663_v13  ;;  %v8135_v49 = vld [vmem:[#allocation11 + $0x1f4] ss:$8 sps:$4 sm:$0xff]   ;;  %v8133_v51 = vld [vmem:[#allocation11 + $0x1f0] ss:$8 sps:$4 sm:$0xff]  }
 0x3f9   :  { %7523 = vmatpush3.bf16.msra.mxu1 %v8139_v30  ;;  %v8120_v30 = vld [vmem:[#allocation11 + $0x1a4] ss:$8 sps:$4 sm:$0xff]  }
 0x3fa   :  { %6383 = vmatpush1.bf16.msra.mxu0 %v8070_v36  ;;  %7524 = vmatprep.subr.bf16.mxu1 %v8140_v19  ;;  %v4330_v36 = vrot.slane %v4310_v26, %v8663_v13  ;;  %v8118_v19 = vld [vmem:[#allocation11 + $0x1a0] ss:$8 sps:$4 sm:$0xff]  }
 0x3fb   :  { %6384 = vmatprep.subr.bf16.mxu0 %v8075_v29 }
 0x3fd   :  { %7525 = vmatpush3.bf16.msra.mxu1 %v8141_v15  ;;  %v8123_v15 = vld [vmem:[#allocation11 + $0x1b4] ss:$8 sps:$4 sm:$0xff]  }
 0x3fe   :  { %6385 = vmatpush1.bf16.msra.mxu0 %v8073_v31  ;;  %7526 = vmatprep.subr.bf16.mxu1 %v8142_v43  ;;  %v8109_v31 = vld [vmem:[#allocation11 + $0x170] ss:$8 sps:$4 sm:$0xff]  }
 0x3ff   :  { %6386 = vmatprep.subr.bf16.mxu0 %v8078_v60  ;;  %v8121_v43 = vld [vmem:[#allocation11 + $0x1b0] ss:$8 sps:$4 sm:$0xff]  }
 0x401   :  { %7527 = vmatpush3.bf16.msra.mxu1 %v8143_v44  ;;  %v8126_v44 = vld [vmem:[#allocation11 + $0x1c4] ss:$8 sps:$4 sm:$0xff]  }
 0x402   :  { %6387 = vmatpush1.bf16.msra.mxu0 %v8076_v22  ;;  %7528 = vmatprep.subr.bf16.mxu1 %v8144_v45  ;;  %v8124_v45 = vld [vmem:[#allocation11 + $0x1c0] ss:$8 sps:$4 sm:$0xff]  }
 0x403   :  { %6388 = vmatprep.subr.bf16.mxu0 %v8081_v34  ;;  %v8114_v34 = vld [vmem:[#allocation11 + $0x184] ss:$8 sps:$4 sm:$0xff]  }
 0x405   :  { %7529 = vmatpush3.bf16.msra.mxu1 %v8145_v46  ;;  %v8129_v46 = vld [vmem:[#allocation11 + $0x1d4] ss:$8 sps:$4 sm:$0xff]  }
 0x406   :  { %6389 = vmatpush1.bf16.msra.mxu0 %v8079_v14  ;;  %7530 = vmatprep.subr.bf16.mxu1 %v8146_v47  ;;  %v8127_v47 = vld [vmem:[#allocation11 + $0x1d0] ss:$8 sps:$4 sm:$0xff]  }
 0x407   :  { %6390 = vmatprep.subr.bf16.mxu0 %v8084_v33 }
 0x409   :  { %7531 = vmatpush3.bf16.msra.mxu1 %v8147_v48  ;;  %v8132_v48 = vld [vmem:[#allocation11 + $0x1e4] ss:$8 sps:$4 sm:$0xff]  }
 0x40a   :  { %6391 = vmatpush1.bf16.msra.mxu0 %v8082_v35 }
 0x40b   :  { %6392 = vmatprep.subr.bf16.mxu0 %v8087_v37  ;;  %v8112_v37 = vld [vmem:[#allocation11 + $0x180] ss:$8 sps:$4 sm:$0xff]  }
 0x40e   :  { %6393 = vmatpush1.bf16.msra.mxu0 %v8085_v32 }
 0x40f   :  { %6403 = vmatprep.subr.bf16.mxu0 %v8090_v39  ;;  %v8117_v39 = vld [vmem:[#allocation11 + $0x194] ss:$8 sps:$4 sm:$0xff]  }
 0x4a4   :  { %v5768_v57 = vpop.f32.mrb[8].mxu0 }
 0x4a5   :  { %v7552_v12 = vadd.f32 %v5768_v57, %v4318_v28  ;;  %v5770_v0 = vpop.f32.mrb[9].mxu0  ;;  %v8148_v28 = vld [vmem:[#allocation14 + $0x70] sm:$0xff]   ;;  %v8150_v57 = vld [vmem:[#allocation14 + $0x78] sm:$0xff]  }
 0x4a6   :  { %v7553_v58 = vadd.f32 %v5770_v0, %v4322_v10  ;;  %v5772_v56 = vpop.f32.mrb[10].mxu0  ;;  %v8149_v10 = vld [vmem:[#allocation14 + $0x30] sm:$0xff]   ;;  %7532 = vmatprep.subr.bf16.mxu1 %v8148_v28 }
 0x4a7   :  { %vm5939_vm8 = vcmp.gt.f32.partialorder %v7552_v12, 0.0  ;;  %v5944_v1 = vmul.f32 %v7552_v12, %v5943_v63  ;;  %v5773_v2 = vpop.f32.mrb[11].mxu0  ;;  %7533 = vmatpush3.bf16.msra.mxu1 %v8149_v10 }
 0x4a8   :  { %vm5940_vm9 = vcmp.gt.f32.partialorder %v7553_v58, 0.0  ;;  %v5945_v4 = vmul.f32 %v7553_v58, %v5943_v63  ;;  %7534 = vmatprep.subr.bf16.mxu1 %v8150_v57 }
 0x4a9   :  { %v5948_v62 = vsel %vm5939_vm8, %v7552_v12, %v5944_v1  ;;  %v6021_v12 = vld [vmem:[#allocation12] sm:$0x3] }
 0x4aa   :  { %v5949_v5 = vsel %vm5940_vm9, %v7553_v58, %v5945_v4  ;;  %v5952_v16 = vpack.c.bf16 %v5948_v62, %v5948_v62  ;;  %v6022_v0 = vunpack.c.l.bf16 %v6021_v12  ;;  %v6446_v62 = vstv %s7437_s30 }
 0x4ab   :  { %v5953_v6 = vpack.c.bf16 %v5949_v5, %v5949_v5 }
 0x4ac   :  { %v6027_v58 = vrot.slane %v6022_v0, %v8663_v13  ;;  %v6031_v56 = vrot.slane %v6022_v0, %v8666_v18  ;;  %v6486_v18 = vld [vmem:[#allocation15] sm:$0x1] }
 0x4ad   :  { %6394 = vmatprep.mubr.bf16.mxu0 %v5953_v6 }
 0x4ae   :  { %6395 = vmatmul.mubr.bf16.vlgmr.msra.gmra.mrb[12].mxu0 %v5952_v16  ;;  %v6037_v1 = vrot.slane %v6027_v58, %v8663_v13  ;;  %v6041_v2 = vrot.slane %v6031_v56, %v8663_v13 }
 0x4af   :  { %6404 = vmatpush1.bf16.msra.mxu0 %v8088_v7 }
 0x4b0   :  { %6405 = vmatprep.subr.bf16.mxu0 %v8093_v8 }
 0x4b3   :  { %6406 = vmatpush1.bf16.msra.mxu0 %v8091_v55 }
 0x4b4   :  { %6407 = vmatprep.subr.bf16.mxu0 %v8096_v9 }
 0x4b7   :  { %6408 = vmatpush1.bf16.msra.mxu0 %v8094_v11 }
 0x4b8   :  { %6409 = vmatprep.subr.bf16.mxu0 %v8099_v17 }
 0x4bb   :  { %6410 = vmatpush1.bf16.msra.mxu0 %v8097_v20 }
 0x4bc   :  { %6411 = vmatprep.subr.bf16.mxu0 %v8102_v61 }
 0x4bf   :  { %6412 = vmatpush1.bf16.msra.mxu0 %v8100_v23  ;;  %v6487_v23 = vunpack.c.l.bf16 %v6486_v18 }
 0x4c0   :  { %6413 = vmatprep.subr.bf16.mxu0 %v8105_v24  ;;  %v6633_v24 = vld [vmem:[#allocation17] sm:$0x1] }
 0x4c1   :  { %v6634_v26 = vunpack.c.l.bf16 %v6633_v24 }
 0x4c3   :  { %6414 = vmatpush1.bf16.msra.mxu0 %v8103_v53 }
 0x4c4   :  { %6415 = vmatprep.subr.bf16.mxu0 %v8108_v25  ;;  %v6491_v25 = vrot.slane %v6487_v23, %v8663_v13 }
 0x4c7   :  { %6416 = vmatpush1.bf16.msra.mxu0 %v8106_v50  ;;  %v5932_v29 = vpop.f32.mrb[12].mxu1 }
 0x4c8   :  { %v7554_v60 = vadd.f32 %v5932_v29, %v4326_v27  ;;  %v5934_v22 = vpop.f32.mrb[13].mxu1  ;;  %6417 = vmatprep.subr.bf16.mxu0 %v8111_v54 }
 0x4c9   :  { %v7555_v14 = vadd.f32 %v5934_v22, %v4330_v36  ;;  %v5936_v33 = vpop.f32.mrb[14].mxu1  ;;  %v6629_v36 = vstv %s7502_s23 }
 0x4ca   :  { %vm5941_vm10 = vcmp.gt.f32.partialorder %v7554_v60, 0.0  ;;  %v5946_v42 = vmul.f32 %v7554_v60, %v5943_v63  ;;  %v5937_v38 = vpop.f32.mrb[15].mxu1 }
 0x4cb   :  { %vm5942_vm11 = vcmp.gt.f32.partialorder %v7555_v14, 0.0  ;;  %v5947_v35 = vmul.f32 %v7555_v14, %v5943_v63  ;;  %6418 = vmatpush1.bf16.msra.mxu0 %v8109_v31  ;;  %v8151_v63 = vld [vmem:[#allocation14 + $0x38] sm:$0xff]   ;;  %v6638_v31 = vrot.slane %v6634_v26, %v8663_v13 }
 0x4cc   :  { %v5950_v32 = vsel %vm5941_vm10, %v7554_v60, %v5946_v42  ;;  %6419 = vmatprep.subr.bf16.mxu0 %v8114_v34  ;;  %7535 = vmatpush3.bf16.msra.mxu1 %v8151_v63 }
 0x4cd   :  { %v5951_v40 = vsel %vm5942_vm11, %v7555_v14, %v5947_v35  ;;  %v5954_v52 = vpack.c.bf16 %v5950_v32, %v5950_v32  ;;  %v6643_v14 = vstv %s7519_s26 }
 0x4ce   :  { %v5955_v41 = vpack.c.bf16 %v5951_v40, %v5951_v40 }
 0x4cf   :  { %6420 = vmatpush1.bf16.msra.mxu0 %v8112_v37 }
 0x4d0   :  { %6435 = vmatprep.mubr.bf16.mxu0 %v5955_v41  ;;  %6421 = vmatprep.subr.bf16.mxu0 %v8117_v39 }
 0x4d3   :  { %6422 = vmatpush1.bf16.msra.mxu0 %v8115_v21 }
 0x4d4   :  { %6423 = vmatprep.subr.bf16.mxu0 %v8120_v30 }
 0x4d7   :  { %6424 = vmatpush1.bf16.msra.mxu0 %v8118_v19 }
 0x4d8   :  { %6425 = vmatprep.subr.bf16.mxu0 %v8123_v15 }
 0x4db   :  { %6426 = vmatpush1.bf16.msra.mxu0 %v8121_v43 }
 0x4dc   :  { %6427 = vmatprep.subr.bf16.mxu0 %v8126_v44 }
 0x4df   :  { %6428 = vmatpush1.bf16.msra.mxu0 %v8124_v45 }
 0x4e0   :  { %6429 = vmatprep.subr.bf16.mxu0 %v8129_v46 }
 0x4e3   :  { %6430 = vmatpush1.bf16.msra.mxu0 %v8127_v47 }
 0x4e4   :  { %6431 = vmatprep.subr.bf16.mxu0 %v8132_v48 }
 0x4e7   :  { %6432 = vmatpush1.bf16.msra.mxu0 %v8130_v3 }
 0x4e8   :  { %6433 = vmatprep.subr.bf16.mxu0 %v8135_v49 }
 0x4eb   :  { %6434 = vmatpush1.bf16.msra.mxu0 %v8133_v51 }
 0x4ee   :  { %6436 = vmatmul.mubr.bf16.vlgmr.msra.gmra.mrb[12].mxu0 %v5954_v52 }
 0x5c1   :  { %v6437_v4 = vpop.f32.mrb[12].mxu0 }
 0x5c2   :  { %v7556_v5 = vadd.f32 %v6437_v4, %v6037_v1  ;;  %v6439_v6 = vpop.f32.mrb[13].mxu0 }
 0x5c3   :  { %v7557_v7 = vadd.f32 %v6439_v6, %v6041_v2  ;;  %v6441_v16 = vpop.f32.mrb[14].mxu0 }
 0x5c4   :  { %vm6444_vm12 = vcmp.gt.f32.partialorder %v7556_v5, 0.0  ;;  %v6447_v8 = vmul.f32 %v7556_v5, %v6446_v62  ;;  %v6442_v55 = vpop.f32.mrb[15].mxu0 }
 0x5c5   :  { %vm6445_vm13 = vcmp.gt.f32.partialorder %v7557_v7, 0.0  ;;  %v6448_v9 = vmul.f32 %v7557_v7, %v6446_v62 }
 0x5c6   :  { %v6449_v11 = vsel %vm6444_vm12, %v7556_v5, %v6447_v8 }
 0x5c7   :  { %v6450_v17 = vsel %vm6445_vm13, %v7557_v7, %v6448_v9  ;;  %v6451_v61 = vpack.c.bf16 %v6449_v11, %v6449_v11 }
 0x5c8   :  { %v6452_v20 = vpack.c.bf16 %v6450_v17, %v6450_v17 }
 0x5ca   :  { %6620 = vmatprep.mubr.bf16.mxu1 %v6452_v20 }
 0x5cb   :  { %6621 = vmatmul.mubr.bf16.vlgmr.msra.gmra.mrb[16].mxu1 %v6451_v61 }
 0x69e   :  { %v7536_v53 = vpop.f32.mrb[16].mxu1 }
 0x69f   :  { %v7537_v59 = vpop.f32.mrb[17].mxu1 }
 0x6a0   :  { %v7538_v50 = vadd.f32 %v7537_v59, %v7536_v53  ;;  %v7539_v27 = vpop.f32.mrb[18].mxu1 }
 0x6a1   :  { %v7540_v54 = vpop.f32.mrb[19].mxu1 }
 0x6a2   :  { %v6623_v29 = vadd.f32 %v7538_v50, %v6491_v25 }
 0x6a4   :  { %vm6628_vm14 = vcmp.gt.f32.partialorder %v6623_v29, 0.0  ;;  %v6630_v60 = vmul.f32 %v6629_v36, %v6623_v29 }
 0x6a6   :  { %v6631_v22 = vsel %vm6628_vm14, %v6623_v29, %v6630_v60 }
 0x6a7   :  { %6632 = vst [vmem:[%s8790_s11] sm:$0xff] %v6631_v22  ;;  %v6639_v34 = vmul.f32 %v6638_v31, %v6631_v22 }
 0x6a9   :  { %6640 = vadd.xlane.f32.xlu0 %v6639_v34 }
 0x736   :  { %v6641_v33 = vpop.xlane.xlu0 %6640 }
 0x737   :  { %v6644_v42 = vadd.f32 %v6643_v14, %v6641_v33 }
 0x739   :  { %6645 = vst [vmem:[%s8791_s12] sm:$0xff] %v6644_v42 }
 0x73a   :  { %6654 = vsyncpa [#allocation3], 1 }
 0x73b   :  { %6655 = vsyncpa [#allocation7], 1 }
 0x73c   :  { %6656 = vsyncpa [#allocation10], 1 }
 0x73d   :  { %6657 = vsyncpa [#allocation13], 1 }
 0x73e   :  { %6658 = vsyncpa [#allocation16], 1 }
 0x73f   :  { %6659 = vsyncpa [#allocation4], 1 }

</bundles_post_ra>
